<compile_context>
chip_gen: v5e
topology: v5e:2x2
jax: 0.10.0
libtpu: 0.0.40
codegen_flags: <defaults>
</compile_context>

<pallas_src>
import functools

import jax
import jax.numpy as jnp
from jax.experimental import pallas as pl
from jax.experimental.pallas import tpu as pltpu


# -----------------------------------------------------------------------------
# In-kernel helpers
# -----------------------------------------------------------------------------
def _gn_silu_2d(x2, a_scaled, gamma, beta, eps):
    """GroupNorm (affine) + SiLU on a (M, C) fp32 value.

    a_scaled[i, j] = 1/(M*cg) iff channels i, j are in the same group, else 0.
    It is a constant kernel input (not rebuilt per grid step).
    """
    sum_c = jnp.sum(x2, axis=0, keepdims=True)                               # (1, C)
    mean_c = jnp.dot(sum_c, a_scaled, preferred_element_type=jnp.float32)    # group mean per channel
    diff = x2 - mean_c
    sq_c = jnp.sum(diff * diff, axis=0, keepdims=True)
    var_c = jnp.dot(sq_c, a_scaled, preferred_element_type=jnp.float32)      # group var per channel
    y = diff * jax.lax.rsqrt(var_c + eps)
    y = y * gamma + beta
    return y * jax.nn.sigmoid(y)                                             # SiLU / swish


def _im2col_3x3_s1(y):
    """(H, W, C) -> (H, W, 9C) im2col for a 3x3, stride-1, pad-1 conv.

    Shifts are built with zero-concats along leading/sublane dims (no HBM pad,
    no per-(dy,dx) strided slices); a single K=9C matmul follows.
    Channel order of the result is (dy, dx, ci), matching HWIO weights.
    """
    H, W, C = y.shape
    zc = jnp.zeros((H, 1, C), y.dtype)
    xl = jnp.concatenate([zc, y[:, :W - 1, :]], axis=1)    # column j-1 (dx=0)
    xr = jnp.concatenate([y[:, 1:, :], zc], axis=1)        # column j+1 (dx=2)
    c3 = jnp.concatenate([xl, y, xr], axis=-1)             # (H, W, 3C) dx = 0,1,2
    zr = jnp.zeros((1, W, 3 * C), y.dtype)
    top = jnp.concatenate([zr, c3[:H - 1]], axis=0)        # row i-1 (dy=0)
    bot = jnp.concatenate([c3[1:], zr], axis=0)            # row i+1 (dy=2)
    return jnp.concatenate([top, c3, bot], axis=-1)        # (H, W, 9C)


# -----------------------------------------------------------------------------
# Kernel 1: fused ConvBlock2D = GN1 + SiLU + conv3x3(s1,p1) + GN2 + SiLU
# (one image per grid step; dropout p=0 is identity; temb is None)
# -----------------------------------------------------------------------------
def _convblock_kernel(x_ref, g1_ref, b1_ref, a1_ref, w_ref, bias_ref,
                      g2_ref, b2_ref, a2_ref, o_ref, *, eps):
    _, H, W, Cin = x_ref.shape
    Cout = o_ref.shape[3]

    x2 = x_ref[0].astype(jnp.float32).reshape(H * W, Cin)

    # GroupNorm1 + SiLU (fp32)
    y = _gn_silu_2d(x2, a1_ref[...], g1_ref[...].astype(jnp.float32),
                    b1_ref[...].astype(jnp.float32), eps)

    # 3x3 stride-1 pad-1 conv as one im2col matmul (bf16 operands, f32 acc)
    col9 = _im2col_3x3_s1(y.reshape(H, W, Cin))
    acc = jnp.dot(col9.reshape(H * W, 9 * Cin).astype(jnp.bfloat16),
                  w_ref[...], preferred_element_type=jnp.float32)
    acc = acc + bias_ref[...].astype(jnp.float32)

    # GroupNorm2 + SiLU (dropout p=0 -> identity)
    h = _gn_silu_2d(acc, a2_ref[...], g2_ref[...].astype(jnp.float32),
                    b2_ref[...].astype(jnp.float32), eps)
    o_ref[0] = h.reshape(H, W, Cout).astype(o_ref.dtype)


def _group_matrix(C, groups, hw):
    """(C, C) same-group matrix, pre-scaled by 1/(elements per group)."""
    cg = C // groups
    gid = jnp.arange(C, dtype=jnp.int32) // cg
    same = (gid[:, None] == gid[None, :]).astype(jnp.float32)
    return same / float(hw * cg)


def conv_block2d(x_nhwc, layer, *, groups, eps):
    N, H, W, Cin = x_nhwc.shape
    Cout = layer["conv_w"].shape[-1]
    a1 = _group_matrix(Cin, groups, H * W)
    a2 = _group_matrix(Cout, groups, H * W)
    w9 = layer["conv_w"].reshape(9 * Cin, Cout).astype(jnp.bfloat16)  # HWIO -> (9Cin, Cout)

    kernel = functools.partial(_convblock_kernel, eps=eps)
    return pl.pallas_call(
        kernel,
        out_shape=jax.ShapeDtypeStruct((N, H, W, Cout), x_nhwc.dtype),
        grid=(N,),
        in_specs=[
            pl.BlockSpec((1, H, W, Cin), lambda n: (n, 0, 0, 0)),
            pl.BlockSpec((1, Cin), lambda n: (0, 0)),
            pl.BlockSpec((1, Cin), lambda n: (0, 0)),
            pl.BlockSpec((Cin, Cin), lambda n: (0, 0)),
            pl.BlockSpec((9 * Cin, Cout), lambda n: (0, 0)),
            pl.BlockSpec((1, Cout), lambda n: (0, 0)),
            pl.BlockSpec((1, Cout), lambda n: (0, 0)),
            pl.BlockSpec((1, Cout), lambda n: (0, 0)),
            pl.BlockSpec((Cout, Cout), lambda n: (0, 0)),
        ],
        out_specs=pl.BlockSpec((1, H, W, Cout), lambda n: (n, 0, 0, 0)),
        compiler_params=pltpu.CompilerParams(dimension_semantics=("parallel",)),
    )(x_nhwc,
      layer["gn1_gamma"].reshape(1, Cin), layer["gn1_beta"].reshape(1, Cin), a1,
      w9, layer["conv_b"].reshape(1, Cout).astype(jnp.float32),
      layer["gn2_gamma"].reshape(1, Cout), layer["gn2_beta"].reshape(1, Cout), a2)


# -----------------------------------------------------------------------------
# Kernel 2: Downsample2D(use_conv=True): dedicated 3x3 stride-2 pad-1 conv.
# Input arrives with adjacent column pairs folded into the lane dim
# ((N, H, W/2, 2C), a free HBM reshape), so stride-2 column access is just a
# static lane slice; stride-2 row access is a leading-dim reshape + index.
# Only (H/2)*(W/2) output pixels are ever computed.
# -----------------------------------------------------------------------------
def _down_conv_s2_kernel(xp_ref, w_ref, bias_ref, o_ref):
    _, H, Wo, C2 = xp_ref.shape
    C = C2 // 2
    Ho = H // 2
    Cout = o_ref.shape[3]

    x2 = xp_ref[0].astype(jnp.float32)                    # (H, Wo, 2C): [col 2j | col 2j+1]
    odd = x2[:, :, C:]                                    # column 2j+1
    odd_prev = jnp.concatenate(
        [jnp.zeros((H, 1, C), jnp.float32), odd[:, :Wo - 1, :]], axis=1)   # column 2j-1 (pad)
    c3 = jnp.concatenate([odd_prev, x2], axis=-1)         # (H, Wo, 3C): dx = 0,1,2

    c3r = c3.reshape(Ho, 2, Wo, 3 * C)                    # split rows by parity
    even_rows = c3r[:, 0]                                 # input row 2i   -> dy = 1
    odd_rows = c3r[:, 1]                                  # input row 2i+1 -> dy = 2
    prev_rows = jnp.concatenate(
        [jnp.zeros((1, Wo, 3 * C), jnp.float32), odd_rows[:Ho - 1]], axis=0)  # row 2i-1 -> dy = 0

    col9 = jnp.concatenate([prev_rows, even_rows, odd_rows], axis=-1)     # (Ho, Wo, 9C)
    acc = jnp.dot(col9.reshape(Ho * Wo, 9 * C).astype(jnp.bfloat16),
                  w_ref[...], preferred_element_type=jnp.float32)
    acc = acc + bias_ref[...].astype(jnp.float32)
    o_ref[0] = acc.reshape(Ho, Wo, Cout).astype(o_ref.dtype)


def downsample2d_conv(x_nhwc, w_hwio, b):
    N, H, W, C = x_nhwc.shape
    assert H % 2 == 0 and W % 2 == 0, "stride-2 downsample expects even H, W"
    Cout = w_hwio.shape[-1]
    Ho, Wo = H // 2, W // 2
    xp = x_nhwc.reshape(N, H, Wo, 2 * C)                  # layout-preserving (free in HBM)
    w9 = w_hwio.reshape(9 * C, Cout).astype(jnp.bfloat16)
    return pl.pallas_call(
        _down_conv_s2_kernel,
        out_shape=jax.ShapeDtypeStruct((N, Ho, Wo, Cout), x_nhwc.dtype),
        grid=(N,),
        in_specs=[
            pl.BlockSpec((1, H, Wo, 2 * C), lambda n: (n, 0, 0, 0)),
            pl.BlockSpec((9 * C, Cout), lambda n: (0, 0)),
            pl.BlockSpec((1, Cout), lambda n: (0, 0)),
        ],
        out_specs=pl.BlockSpec((1, Ho, Wo, Cout), lambda n: (n, 0, 0, 0)),
        compiler_params=pltpu.CompilerParams(dimension_semantics=("parallel",)),
    )(xp, w9, b.reshape(1, Cout).astype(jnp.float32))


# -----------------------------------------------------------------------------
# Module: parameter init + forward
# -----------------------------------------------------------------------------
def make_params(key, in_channels, out_channels, num_layers):
    layers = []
    cin = in_channels
    for _ in range(num_layers):
        key, k1, k2, k3, k4, k5, k6 = jax.random.split(key, 7)
        layers.append(dict(
            gn1_gamma=1.0 + 0.1 * jax.random.normal(k1, (cin,), jnp.float32),
            gn1_beta=0.1 * jax.random.normal(k2, (cin,), jnp.float32),
            conv_w=0.05 * jax.random.normal(k3, (3, 3, cin, out_channels), jnp.float32),  # HWIO
            conv_b=0.05 * jax.random.normal(k4, (out_channels,), jnp.float32),
            gn2_gamma=1.0 + 0.1 * jax.random.normal(k5, (out_channels,), jnp.float32),
            gn2_beta=0.1 * jax.random.normal(k6, (out_channels,), jnp.float32),
        ))
        cin = out_channels
    key, kd1, kd2 = jax.random.split(key, 3)
    down = dict(
        conv_w=0.05 * jax.random.normal(kd1, (3, 3, out_channels, out_channels), jnp.float32),
        conv_b=0.05 * jax.random.normal(kd2, (out_channels,), jnp.float32),
    )
    return dict(layers=layers, down=down)


def simple_down_encoder_block2d(x_nchw, params, *, groups=32, eps=1e-6):
    x = jnp.transpose(x_nchw, (0, 2, 3, 1))               # NCHW -> NHWC (boundary glue)
    for layer in params["layers"]:
        x = conv_block2d(x, layer, groups=groups, eps=eps)
    y = downsample2d_conv(x, params["down"]["conv_w"], params["down"]["conv_b"])
    return jnp.transpose(y, (0, 3, 1, 2))                 # NHWC -> NCHW


# -----------------------------------------------------------------------------
# Pure-JAX fp32 reference (correctness check)
# -----------------------------------------------------------------------------
def _ref_gn_silu(x_nhwc, gamma, beta, groups, eps):
    N, H, W, C = x_nhwc.shape
    cg = C // groups
    xr = x_nhwc.reshape(N, H * W, groups, cg)
    mean = jnp.mean(xr, axis=(1, 3), keepdims=True)
    var = jnp.mean((xr - mean) ** 2, axis=(1, 3), keepdims=True)
    xn = ((xr - mean) * jax.lax.rsqrt(var + eps)).reshape(N, H, W, C)
    y = xn * gamma + beta
    return y * jax.nn.sigmoid(y)


def _ref_conv(x_nhwc, w_hwio, b, stride):
    out = jax.lax.conv_general_dilated(
        x_nhwc, w_hwio, window_strides=(stride, stride),
        padding=((1, 1), (1, 1)),
        dimension_numbers=("NHWC", "HWIO", "NHWC"))
    return out + b


def _ref_forward(x_nchw, params, groups, eps):
    x = jnp.transpose(x_nchw, (0, 2, 3, 1))
    for layer in params["layers"]:
        h = _ref_gn_silu(x, layer["gn1_gamma"], layer["gn1_beta"], groups, eps)
        h = _ref_conv(h, layer["conv_w"], layer["conv_b"], stride=1)
        h = _ref_gn_silu(h, layer["gn2_gamma"], layer["gn2_beta"], groups, eps)
        x = h
    y = _ref_conv(x, params["down"]["conv_w"], params["down"]["conv_b"], stride=2)
    return jnp.transpose(y, (0, 3, 1, 2))


if __name__ == "__main__":
    # Small shapes consistent with the module defaults (groups=32).
    N, Cin, Cout, H, W = 2, 32, 64, 16, 16
    num_layers, groups, eps = 1, 32, 1e-6

    key = jax.random.PRNGKey(0)
    key, kx, kp = jax.random.split(key, 3)
    x = jax.random.normal(kx, (N, Cin, H, W), jnp.float32)   # NCHW input
    params = make_params(kp, Cin, Cout, num_layers)

    fwd = jax.jit(functools.partial(simple_down_encoder_block2d, groups=groups, eps=eps))
    out = jax.block_until_ready(fwd(x, params))
    assert out.shape == (N, Cout, H // 2, W // 2), out.shape

    ref = jax.block_until_ready(_ref_forward(x, params, groups, eps))
    # bf16 MXU operands in the kernel -> relaxed tolerance vs the f32 reference.
    max_err = float(jnp.max(jnp.abs(out - ref)))
    assert jnp.allclose(out, ref, rtol=5e-2, atol=5e-2), max_err

    print("KERNEL_OK")
</pallas_src>

<mosaic_0001>
module attributes {stable_mosaic.version = 11 : i64} {
  func.func @_down_conv_s2_kernel(%arg0: i32, %arg1: memref<1x16x8x128xf32, #tpu.memory_space<vmem>>, %arg2: memref<576x64xbf16, #tpu.memory_space<vmem>>, %arg3: memref<1x64xf32, #tpu.memory_space<vmem>>, %arg4: memref<1x8x8x64xf32, #tpu.memory_space<vmem>>) attributes {dimension_semantics = [#tpu.dimension_semantics<parallel>], iteration_bounds = array<i64: 2>, scalar_prefetch = 0 : i64, scratch_operands = 0 : i64, tpu.core_type = #tpu.core_type<tc>, window_params = [{transform_indices = @transform_0, window_bounds = array<i64: 1, 16, 8, 128>}, {pipeline_mode = #tpu.pipeline_mode<synchronous>, transform_indices = @transform_1, window_bounds = array<i64: 576, 64>}, {pipeline_mode = #tpu.pipeline_mode<synchronous>, transform_indices = @transform_2, window_bounds = array<i64: 1, 64>}, {transform_indices = @transform_3, window_bounds = array<i64: 1, 8, 8, 64>}]} {
    %c0 = arith.constant 0 : index
    %c0_0 = arith.constant 0 : index
    %c0_1 = arith.constant 0 : index
    %c0_2 = arith.constant 0 : index
    %0 = vector.load %arg1[%c0, %c0_0, %c0_1, %c0_2] : memref<1x16x8x128xf32, #tpu.memory_space<vmem>>, vector<1x16x8x128xf32>
    %1 = vector.shape_cast %0 : vector<1x16x8x128xf32> to vector<16x8x128xf32>
    %2 = vector.extract_strided_slice %1 {offsets = [0, 0, 64], sizes = [16, 8, 64], strides = [1, 1, 1]} : vector<16x8x128xf32> to vector<16x8x64xf32>
    %cst = arith.constant 0.000000e+00 : f32
    %3 = vector.broadcast %cst : f32 to vector<16x1x64xf32>
    %4 = vector.extract_strided_slice %2 {offsets = [0, 0, 0], sizes = [16, 7, 64], strides = [1, 1, 1]} : vector<16x8x64xf32> to vector<16x7x64xf32>
    %5 = tpu.concatenate %3, %4 in 1 : vector<16x1x64xf32>, vector<16x7x64xf32> -> vector<16x8x64xf32>
    %6 = tpu.concatenate %5, %1 in 2 : vector<16x8x64xf32>, vector<16x8x128xf32> -> vector<16x8x192xf32>
    %7 = vector.shape_cast %6 : vector<16x8x192xf32> to vector<8x2x8x192xf32>
    %8 = vector.extract_strided_slice %7 {offsets = [0, 0, 0, 0], sizes = [8, 1, 8, 192], strides = [1, 1, 1, 1]} : vector<8x2x8x192xf32> to vector<8x1x8x192xf32>
    %9 = vector.shape_cast %8 : vector<8x1x8x192xf32> to vector<8x8x192xf32>
    %10 = vector.extract_strided_slice %7 {offsets = [0, 1, 0, 0], sizes = [8, 1, 8, 192], strides = [1, 1, 1, 1]} : vector<8x2x8x192xf32> to vector<8x1x8x192xf32>
    %11 = vector.shape_cast %10 : vector<8x1x8x192xf32> to vector<8x8x192xf32>
    %cst_3 = arith.constant 0.000000e+00 : f32
    %12 = vector.broadcast %cst_3 : f32 to vector<1x8x192xf32>
    %13 = vector.extract_strided_slice %11 {offsets = [0, 0, 0], sizes = [7, 8, 192], strides = [1, 1, 1]} : vector<8x8x192xf32> to vector<7x8x192xf32>
    %14 = tpu.concatenate %12, %13 in 0 : vector<1x8x192xf32>, vector<7x8x192xf32> -> vector<8x8x192xf32>
    %15 = tpu.concatenate %14, %9, %11 in 2 : vector<8x8x192xf32>, vector<8x8x192xf32>, vector<8x8x192xf32> -> vector<8x8x576xf32>
    %16 = vector.shape_cast %15 : vector<8x8x576xf32> to vector<64x576xf32>
    %17 = arith.truncf %16 : vector<64x576xf32> to vector<64x576xbf16>
    %c0_4 = arith.constant 0 : index
    %c0_5 = arith.constant 0 : index
    %18 = vector.load %arg2[%c0_4, %c0_5] : memref<576x64xbf16, #tpu.memory_space<vmem>>, vector<576x64xbf16>
    %cst_6 = arith.constant dense<0.000000e+00> : vector<64x64xf32>
    %19 = tpu.matmul %17, %18, %cst_6 {dimension_numbers = #tpu.dot_dimension_numbers<[1], [0], [0], [1], [0, 0, 1, 1], [], []>} : vector<64x576xbf16>, vector<576x64xbf16>, vector<64x64xf32> -> vector<64x64xf32>
    %c0_7 = arith.constant 0 : index
    %c0_8 = arith.constant 0 : index
    %20 = vector.load %arg3[%c0_7, %c0_8] : memref<1x64xf32, #tpu.memory_space<vmem>>, vector<1x64xf32>
    %21 = vector.broadcast %20 : vector<1x64xf32> to vector<64x64xf32>
    %22 = arith.addf %19, %21 : vector<64x64xf32>
    %23 = vector.shape_cast %22 : vector<64x64xf32> to vector<8x8x64xf32>
    %c0_9 = arith.constant 0 : index
    %c0_10 = arith.constant 0 : index
    %c0_11 = arith.constant 0 : index
    %c0_12 = arith.constant 0 : index
    %24 = vector.load %arg4[%c0_9, %c0_10, %c0_11, %c0_12] : memref<1x8x8x64xf32, #tpu.memory_space<vmem>>, vector<1x8x8x64xf32>
    %25 = vector.shape_cast %24 : vector<1x8x8x64xf32> to vector<8x8x64xf32>
    %26 = vector.shape_cast %23 : vector<8x8x64xf32> to vector<1x8x8x64xf32>
    tpu.vector_store %arg4[%c0_9, %c0_10, %c0_11, %c0_12], %26 {strides = array<i32>} : memref<1x8x8x64xf32, #tpu.memory_space<vmem>>, vector<1x8x8x64xf32>,
    return
  }
  func.func @transform_0(%arg0: i32) -> (i32, i32, i32, i32) {
    %c0_i32 = arith.constant 0 : i32
    %c0_i32_0 = arith.constant 0 : i32
    %c0_i32_1 = arith.constant 0 : i32
    %c0_i32_2 = arith.constant 0 : i32
    return %arg0, %c0_i32, %c0_i32_0, %c0_i32_1 : i32, i32, i32, i32
  }
  func.func @transform_1(%arg0: i32) -> (i32, i32) {
    %c0_i32 = arith.constant 0 : i32
    %c0_i32_0 = arith.constant 0 : i32
    %c0_i32_1 = arith.constant 0 : i32
    return %c0_i32, %c0_i32_0 : i32, i32
  }
  func.func @transform_2(%arg0: i32) -> (i32, i32) {
    %c0_i32 = arith.constant 0 : i32
    %c0_i32_0 = arith.constant 0 : i32
    %c0_i32_1 = arith.constant 0 : i32
    return %c0_i32, %c0_i32_0 : i32, i32
  }
  func.func @transform_3(%arg0: i32) -> (i32, i32, i32, i32) {
    %c0_i32 = arith.constant 0 : i32
    %c0_i32_0 = arith.constant 0 : i32
    %c0_i32_1 = arith.constant 0 : i32
    %c0_i32_2 = arith.constant 0 : i32
    return %arg0, %c0_i32, %c0_i32_0, %c0_i32_1 : i32, i32, i32, i32
  }
}

module attributes {stable_mosaic.version = 11 : i64} {
  func.func @_convblock_kernel(%arg0: i32, %arg1: memref<1x16x16x32xf32, #tpu.memory_space<vmem>>, %arg2: memref<1x32xf32, #tpu.memory_space<vmem>>, %arg3: memref<1x32xf32, #tpu.memory_space<vmem>>, %arg4: memref<32x32xf32, #tpu.memory_space<vmem>>, %arg5: memref<288x64xbf16, #tpu.memory_space<vmem>>, %arg6: memref<1x64xf32, #tpu.memory_space<vmem>>, %arg7: memref<1x64xf32, #tpu.memory_space<vmem>>, %arg8: memref<1x64xf32, #tpu.memory_space<vmem>>, %arg9: memref<64x64xf32, #tpu.memory_space<vmem>>, %arg10: memref<1x16x16x64xf32, #tpu.memory_space<vmem>>) attributes {dimension_semantics = [#tpu.dimension_semantics<parallel>], iteration_bounds = array<i64: 2>, scalar_prefetch = 0 : i64, scratch_operands = 0 : i64, tpu.core_type = #tpu.core_type<tc>, window_params = [{transform_indices = @transform_0, window_bounds = array<i64: 1, 16, 16, 32>}, {pipeline_mode = #tpu.pipeline_mode<synchronous>, transform_indices = @transform_1, window_bounds = array<i64: 1, 32>}, {pipeline_mode = #tpu.pipeline_mode<synchronous>, transform_indices = @transform_2, window_bounds = array<i64: 1, 32>}, {pipeline_mode = #tpu.pipeline_mode<synchronous>, transform_indices = @transform_3, window_bounds = array<i64: 32, 32>}, {pipeline_mode = #tpu.pipeline_mode<synchronous>, transform_indices = @transform_4, window_bounds = array<i64: 288, 64>}, {pipeline_mode = #tpu.pipeline_mode<synchronous>, transform_indices = @transform_5, window_bounds = array<i64: 1, 64>}, {pipeline_mode = #tpu.pipeline_mode<synchronous>, transform_indices = @transform_6, window_bounds = array<i64: 1, 64>}, {pipeline_mode = #tpu.pipeline_mode<synchronous>, transform_indices = @transform_7, window_bounds = array<i64: 1, 64>}, {pipeline_mode = #tpu.pipeline_mode<synchronous>, transform_indices = @transform_8, window_bounds = array<i64: 64, 64>}, {transform_indices = @transform_9, window_bounds = array<i64: 1, 16, 16, 64>}]} {
    %c0 = arith.constant 0 : index
    %c0_0 = arith.constant 0 : index
    %c0_1 = arith.constant 0 : index
    %c0_2 = arith.constant 0 : index
    %0 = vector.load %arg1[%c0, %c0_0, %c0_1, %c0_2] : memref<1x16x16x32xf32, #tpu.memory_space<vmem>>, vector<1x16x16x32xf32>
    %1 = vector.shape_cast %0 : vector<1x16x16x32xf32> to vector<16x16x32xf32>
    %2 = vector.shape_cast %1 : vector<16x16x32xf32> to vector<256x32xf32>
    %c0_3 = arith.constant 0 : index
    %c0_4 = arith.constant 0 : index
    %3 = vector.load %arg4[%c0_3, %c0_4] : memref<32x32xf32, #tpu.memory_space<vmem>>, vector<32x32xf32>
    %c0_5 = arith.constant 0 : index
    %c0_6 = arith.constant 0 : index
    %4 = vector.load %arg2[%c0_5, %c0_6] : memref<1x32xf32, #tpu.memory_space<vmem>>, vector<1x32xf32>
    %c0_7 = arith.constant 0 : index
    %c0_8 = arith.constant 0 : index
    %5 = vector.load %arg3[%c0_7, %c0_8] : memref<1x32xf32, #tpu.memory_space<vmem>>, vector<1x32xf32>
    %cst = arith.constant dense<0.000000e+00> : vector<32xf32>
    %6 = vector.multi_reduction <add>, %2, %cst [0] : vector<256x32xf32> to vector<32xf32>
    %7 = vector.shape_cast %6 : vector<32xf32> to vector<1x32xf32>
    %cst_9 = arith.constant dense<0.000000e+00> : vector<1x32xf32>
    %8 = tpu.matmul %7, %3, %cst_9 {dimension_numbers = #tpu.dot_dimension_numbers<[1], [0], [0], [1], [0, 0, 1, 1], [], []>} : vector<1x32xf32>, vector<32x32xf32>, vector<1x32xf32> -> vector<1x32xf32>
    %9 = vector.broadcast %8 : vector<1x32xf32> to vector<256x32xf32>
    %10 = arith.subf %2, %9 : vector<256x32xf32>
    %11 = arith.mulf %10, %10 : vector<256x32xf32>
    %cst_10 = arith.constant dense<0.000000e+00> : vector<32xf32>
    %12 = vector.multi_reduction <add>, %11, %cst_10 [0] : vector<256x32xf32> to vector<32xf32>
    %13 = vector.shape_cast %12 : vector<32xf32> to vector<1x32xf32>
    %cst_11 = arith.constant dense<0.000000e+00> : vector<1x32xf32>
    %14 = tpu.matmul %13, %3, %cst_11 {dimension_numbers = #tpu.dot_dimension_numbers<[1], [0], [0], [1], [0, 0, 1, 1], [], []>} : vector<1x32xf32>, vector<32x32xf32>, vector<1x32xf32> -> vector<1x32xf32>
    %cst_12 = arith.constant 9.99999997E-7 : f32
    %15 = vector.broadcast %cst_12 : f32 to vector<1x32xf32>
    %16 = arith.addf %14, %15 : vector<1x32xf32>
    %17 = math.rsqrt %16 : vector<1x32xf32>
    %18 = vector.broadcast %17 : vector<1x32xf32> to vector<256x32xf32>
    %19 = arith.mulf %10, %18 : vector<256x32xf32>
    %20 = vector.broadcast %4 : vector<1x32xf32> to vector<256x32xf32>
    %21 = arith.mulf %19, %20 : vector<256x32xf32>
    %22 = vector.broadcast %5 : vector<1x32xf32> to vector<256x32xf32>
    %23 = arith.addf %21, %22 : vector<256x32xf32>
    %24 = arith.negf %23 : vector<256x32xf32>
    %25 = math.exp %24 : vector<256x32xf32>
    %cst_13 = arith.constant 1.000000e+00 : f32
    %26 = vector.broadcast %cst_13 : f32 to vector<256x32xf32>
    %27 = arith.addf %26, %25 : vector<256x32xf32>
    %28 = arith.divf %26, %27 : vector<256x32xf32>
    %29 = arith.mulf %23, %28 : vector<256x32xf32>
    %30 = vector.shape_cast %29 : vector<256x32xf32> to vector<16x16x32xf32>
    %cst_14 = arith.constant 0.000000e+00 : f32
    %31 = vector.broadcast %cst_14 : f32 to vector<16x1x32xf32>
    %32 = vector.extract_strided_slice %30 {offsets = [0, 0, 0], sizes = [16, 15, 32], strides = [1, 1, 1]} : vector<16x16x32xf32> to vector<16x15x32xf32>
    %33 = tpu.concatenate %31, %32 in 1 : vector<16x1x32xf32>, vector<16x15x32xf32> -> vector<16x16x32xf32>
    %34 = vector.extract_strided_slice %30 {offsets = [0, 1, 0], sizes = [16, 15, 32], strides = [1, 1, 1]} : vector<16x16x32xf32> to vector<16x15x32xf32>
    %35 = tpu.concatenate %34, %31 in 1 : vector<16x15x32xf32>, vector<16x1x32xf32> -> vector<16x16x32xf32>
    %36 = tpu.concatenate %33, %30, %35 in 2 : vector<16x16x32xf32>, vector<16x16x32xf32>, vector<16x16x32xf32> -> vector<16x16x96xf32>
    %cst_15 = arith.constant 0.000000e+00 : f32
    %37 = vector.broadcast %cst_15 : f32 to vector<1x16x96xf32>
    %38 = vector.extract_strided_slice %36 {offsets = [0, 0, 0], sizes = [15, 16, 96], strides = [1, 1, 1]} : vector<16x16x96xf32> to vector<15x16x96xf32>
    %39 = tpu.concatenate %37, %38 in 0 : vector<1x16x96xf32>, vector<15x16x96xf32> -> vector<16x16x96xf32>
    %40 = vector.extract_strided_slice %36 {offsets = [1, 0, 0], sizes = [15, 16, 96], strides = [1, 1, 1]} : vector<16x16x96xf32> to vector<15x16x96xf32>
    %41 = tpu.concatenate %40, %37 in 0 : vector<15x16x96xf32>, vector<1x16x96xf32> -> vector<16x16x96xf32>
    %42 = tpu.concatenate %39, %36, %41 in 2 : vector<16x16x96xf32>, vector<16x16x96xf32>, vector<16x16x96xf32> -> vector<16x16x288xf32>
    %43 = vector.shape_cast %42 : vector<16x16x288xf32> to vector<256x288xf32>
    %44 = arith.truncf %43 : vector<256x288xf32> to vector<256x288xbf16>
    %c0_16 = arith.constant 0 : index
    %c0_17 = arith.constant 0 : index
    %45 = vector.load %arg5[%c0_16, %c0_17] : memref<288x64xbf16, #tpu.memory_space<vmem>>, vector<288x64xbf16>
    %cst_18 = arith.constant dense<0.000000e+00> : vector<256x64xf32>
    %46 = tpu.matmul %44, %45, %cst_18 {dimension_numbers = #tpu.dot_dimension_numbers<[1], [0], [0], [1], [0, 0, 1, 1], [], []>} : vector<256x288xbf16>, vector<288x64xbf16>, vector<256x64xf32> -> vector<256x64xf32>
    %c0_19 = arith.constant 0 : index
    %c0_20 = arith.constant 0 : index
    %47 = vector.load %arg6[%c0_19, %c0_20] : memref<1x64xf32, #tpu.memory_space<vmem>>, vector<1x64xf32>
    %48 = vector.broadcast %47 : vector<1x64xf32> to vector<256x64xf32>
    %49 = arith.addf %46, %48 : vector<256x64xf32>
    %c0_21 = arith.constant 0 : index
    %c0_22 = arith.constant 0 : index
    %50 = vector.load %arg9[%c0_21, %c0_22] : memref<64x64xf32, #tpu.memory_space<vmem>>, vector<64x64xf32>
    %c0_23 = arith.constant 0 : index
    %c0_24 = arith.constant 0 : index
    %51 = vector.load %arg7[%c0_23, %c0_24] : memref<1x64xf32, #tpu.memory_space<vmem>>, vector<1x64xf32>
    %c0_25 = arith.constant 0 : index
    %c0_26 = arith.constant 0 : index
    %52 = vector.load %arg8[%c0_25, %c0_26] : memref<1x64xf32, #tpu.memory_space<vmem>>, vector<1x64xf32>
    %cst_27 = arith.constant dense<0.000000e+00> : vector<64xf32>
    %53 = vector.multi_reduction <add>, %49, %cst_27 [0] : vector<256x64xf32> to vector<64xf32>
    %54 = vector.shape_cast %53 : vector<64xf32> to vector<1x64xf32>
    %cst_28 = arith.constant dense<0.000000e+00> : vector<1x64xf32>
    %55 = tpu.matmul %54, %50, %cst_28 {dimension_numbers = #tpu.dot_dimension_numbers<[1], [0], [0], [1], [0, 0, 1, 1], [], []>} : vector<1x64xf32>, vector<64x64xf32>, vector<1x64xf32> -> vector<1x64xf32>
    %56 = vector.broadcast %55 : vector<1x64xf32> to vector<256x64xf32>
    %57 = arith.subf %49, %56 : vector<256x64xf32>
    %58 = arith.mulf %57, %57 : vector<256x64xf32>
    %cst_29 = arith.constant dense<0.000000e+00> : vector<64xf32>
    %59 = vector.multi_reduction <add>, %58, %cst_29 [0] : vector<256x64xf32> to vector<64xf32>
    %60 = vector.shape_cast %59 : vector<64xf32> to vector<1x64xf32>
    %cst_30 = arith.constant dense<0.000000e+00> : vector<1x64xf32>
    %61 = tpu.matmul %60, %50, %cst_30 {dimension_numbers = #tpu.dot_dimension_numbers<[1], [0], [0], [1], [0, 0, 1, 1], [], []>} : vector<1x64xf32>, vector<64x64xf32>, vector<1x64xf32> -> vector<1x64xf32>
    %cst_31 = arith.constant 9.99999997E-7 : f32
    %62 = vector.broadcast %cst_31 : f32 to vector<1x64xf32>
    %63 = arith.addf %61, %62 : vector<1x64xf32>
    %64 = math.rsqrt %63 : vector<1x64xf32>
    %65 = vector.broadcast %64 : vector<1x64xf32> to vector<256x64xf32>
    %66 = arith.mulf %57, %65 : vector<256x64xf32>
    %67 = vector.broadcast %51 : vector<1x64xf32> to vector<256x64xf32>
    %68 = arith.mulf %66, %67 : vector<256x64xf32>
    %69 = vector.broadcast %52 : vector<1x64xf32> to vector<256x64xf32>
    %70 = arith.addf %68, %69 : vector<256x64xf32>
    %71 = arith.negf %70 : vector<256x64xf32>
    %72 = math.exp %71 : vector<256x64xf32>
    %cst_32 = arith.constant 1.000000e+00 : f32
    %73 = vector.broadcast %cst_32 : f32 to vector<256x64xf32>
    %74 = arith.addf %73, %72 : vector<256x64xf32>
    %75 = arith.divf %73, %74 : vector<256x64xf32>
    %76 = arith.mulf %70, %75 : vector<256x64xf32>
    %77 = vector.shape_cast %76 : vector<256x64xf32> to vector<16x16x64xf32>
    %c0_33 = arith.constant 0 : index
    %c0_34 = arith.constant 0 : index
    %c0_35 = arith.constant 0 : index
    %c0_36 = arith.constant 0 : index
    %78 = vector.load %arg10[%c0_33, %c0_34, %c0_35, %c0_36] : memref<1x16x16x64xf32, #tpu.memory_space<vmem>>, vector<1x16x16x64xf32>
    %79 = vector.shape_cast %78 : vector<1x16x16x64xf32> to vector<16x16x64xf32>
    %80 = vector.shape_cast %77 : vector<16x16x64xf32> to vector<1x16x16x64xf32>
    tpu.vector_store %arg10[%c0_33, %c0_34, %c0_35, %c0_36], %80 {strides = array<i32>} : memref<1x16x16x64xf32, #tpu.memory_space<vmem>>, vector<1x16x16x64xf32>,
    return
  }
  func.func @transform_0(%arg0: i32) -> (i32, i32, i32, i32) {
    %c0_i32 = arith.constant 0 : i32
    %c0_i32_0 = arith.constant 0 : i32
    %c0_i32_1 = arith.constant 0 : i32
    %c0_i32_2 = arith.constant 0 : i32
    return %arg0, %c0_i32, %c0_i32_0, %c0_i32_1 : i32, i32, i32, i32
  }
  func.func @transform_1(%arg0: i32) -> (i32, i32) {
    %c0_i32 = arith.constant 0 : i32
    %c0_i32_0 = arith.constant 0 : i32
    %c0_i32_1 = arith.constant 0 : i32
    return %c0_i32, %c0_i32_0 : i32, i32
  }
  func.func @transform_2(%arg0: i32) -> (i32, i32) {
    %c0_i32 = arith.constant 0 : i32
    %c0_i32_0 = arith.constant 0 : i32
    %c0_i32_1 = arith.constant 0 : i32
    return %c0_i32, %c0_i32_0 : i32, i32
  }
  func.func @transform_3(%arg0: i32) -> (i32, i32) {
    %c0_i32 = arith.constant 0 : i32
    %c0_i32_0 = arith.constant 0 : i32
    %c0_i32_1 = arith.constant 0 : i32
    return %c0_i32, %c0_i32_0 : i32, i32
  }
  func.func @transform_4(%arg0: i32) -> (i32, i32) {
    %c0_i32 = arith.constant 0 : i32
    %c0_i32_0 = arith.constant 0 : i32
    %c0_i32_1 = arith.constant 0 : i32
    return %c0_i32, %c0_i32_0 : i32, i32
  }
  func.func @transform_5(%arg0: i32) -> (i32, i32) {
    %c0_i32 = arith.constant 0 : i32
    %c0_i32_0 = arith.constant 0 : i32
    %c0_i32_1 = arith.constant 0 : i32
    return %c0_i32, %c0_i32_0 : i32, i32
  }
  func.func @transform_6(%arg0: i32) -> (i32, i32) {
    %c0_i32 = arith.constant 0 : i32
    %c0_i32_0 = arith.constant 0 : i32
    %c0_i32_1 = arith.constant 0 : i32
    return %c0_i32, %c0_i32_0 : i32, i32
  }
  func.func @transform_7(%arg0: i32) -> (i32, i32) {
    %c0_i32 = arith.constant 0 : i32
    %c0_i32_0 = arith.constant 0 : i32
    %c0_i32_1 = arith.constant 0 : i32
    return %c0_i32, %c0_i32_0 : i32, i32
  }
  func.func @transform_8(%arg0: i32) -> (i32, i32) {
    %c0_i32 = arith.constant 0 : i32
    %c0_i32_0 = arith.constant 0 : i32
    %c0_i32_1 = arith.constant 0 : i32
    return %c0_i32, %c0_i32_0 : i32, i32
  }
  func.func @transform_9(%arg0: i32) -> (i32, i32, i32, i32) {
    %c0_i32 = arith.constant 0 : i32
    %c0_i32_0 = arith.constant 0 : i32
    %c0_i32_1 = arith.constant 0 : i32
    %c0_i32_2 = arith.constant 0 : i32
    return %arg0, %c0_i32, %c0_i32_0, %c0_i32_1 : i32, i32, i32, i32
  }
}

</mosaic_0001>

<bundles_post_ra>
// kernel: simple_down_encoder_block2d.3
= control target key start
LH: loop header
LB: loop body
LE: loop exit
PB: predicated region body
PF: predicated region fallthrough
CT: control target
= control target key end

     0   :  { %8 = vsyncpa [#allocation3], 0  ;;  %s1853_s0 = inlined_call_operand.vmem [shape: f32[2,16,8,128], index: 0, kind: input, shape index: {}]   ;;  %s1854_s1 = inlined_call_operand.vmem [shape: bf16[576,64], index: 1, kind: input, shape index: {}]   ;;  %s1855_s2 = inlined_call_operand.vmem [shape: f32[1,64], index: 2, kind: input, shape index: {}]   ;;  %s1856_s3 = inlined_call_operand.hbm [shape: f32[2,8,8,64], index: 3, kind: output, shape index: {}]  }
   0x1   :  { %10 = vsyncpa [#allocation3 + $0x1], 0  ;;  %s1447_s12 = smov 0   ;;  %s1449_s13 = smov 0  }
   0x2   :  { %s1451_s14 = smov 0   ;;  %s1453_s15 = smov 0  }
   0x3 LB: > { %s1468_s16 = sadd.s32 4294967295, %s1420_s15   ;;  %s975_s17 = sadd.s32 4294967294, %s1420_s15   ;;  %s1420_s15 = sphi %s1453_s15, %s1862_s15   ;;  %s1416_s14 = sphi %s1451_s14, %s1861_s14   ;;  %s1412_s13 = sphi %s1449_s13, %s1860_s13   ;;  %s1408_s12 = sphi %s1447_s12, %s1859_s12  }
   0x4   : > { %s1472_s18 = sadd.s32 1, %s1420_s15   ;;  %s91_s19 = sadd.s32 1, %s1416_s14 }
   0x5   : > { %s88_s20 = ssub.s32 %s1420_s15, %s1472_s18  ;;  %p101_p0 = scmp.ne.s32.totalorder %s1416_s14, %s1412_s13 }
   0x6   : > { %p89_p1 = scmp.eq.s32.totalorder %s88_s20, 0  ;;  %p102_p2 = scmp.eq.s32.totalorder %s1468_s16, 1 }
   0x7   : > { %p107_p3 = scmp.ne.s32.totalorder %s1412_s13, %s1408_s12  ;;  %p108_p4 = scmp.eq.s32.totalorder %s975_s17, 1 }
   0x8   : > { %s1483_s21 = scalar_select %p89_p1, %s1416_s14, %s91_s19  }
   0x9   : > { %p1485_p5 = por %p102_p2, %p101_p0  ;;  %p1489_p6 = por %p108_p4, %p107_p3 }
   0xa   : > { %p978_p7 = scmp.ge.s32.totalorder %s1420_s15, 1  ;;  %p140_p8 = scmp.lt.s32.totalorder %s1420_s15, 3 }
   0xc   : > { %p141_p9 = pnand %p978_p7, %p140_p8 }
   0xd   : > { %p164_p10 = scmp.lt.s32.totalorder (!%p141_p9), %s1468_s16, 1  ;;  %s1422_s29 = smov (!%p141_p9), 64  }
   0xe   : > { %144 = sbr.rel (%p141_p9) target bundleno = 555 (0x22b), region = 32  ;;  %s161_s9 = sand.u32 (!%p141_p9), 1, %s1412_s13  }
   0xf   : > { %s979_s10 = sshll.u32 (!%p141_p9), %s161_s9, 6  ;;  %s1176_s17 = sshll.u32 (!%p141_p9), %s1468_s16, 6 }
  0x10   : > { %s1794_s11 = scalar_lea.vmem (!%p141_p9), [#allocation2], %s979_s10  ;;  %s1378_s6 = scalar_lea.hbm (!%p141_p9), %s1856_s3, 128 }
  0x13   : > { %s165_s24 = scalar_select %p164_p10, %s1468_s16, 1  ;;  %vm266_vm0 = vcmask 1040384   ;;  %vm331_vm1 = vcmask 523264   ;;  %v1147_v52 = vld [vmem:[%s1854_s1 + $0x38] sm:$0xff]  ;;  %v1146_v53 = vld [vmem:[%s1854_s1 + $0x30] sm:$0xff]  ;;  %v1145_v56 = vld [vmem:[%s1854_s1 + $0x28] sm:$0xff] }
  0x14   : > { %744 = vmatpush.bf16.msra.mxu0 %v1147_v52  ;;  %1177 = vmatpush.bf16.msra.mxu1 %v1147_v52  ;;  %v1144_v59 = vld [vmem:[%s1854_s1 + $0x20] sm:$0xff]  ;;  %v1171_v60 = vld [vmem:[%s1854_s1 + $0xf8] sm:$0xff]  ;;  %vm1126_vm2 = vmneg %vm331_vm1  ;;  %vm1424_vm3 = vmmov 1   ;;  %s898_s16 = scalar_lea.sflag [#allocation3], %s161_s9 }
  0x15   : > { %s1139_s25 = sshll.u32 %s165_s24, 7  ;;  %1178 = vmatpush.bf16.msra.mxu2 %v1147_v52  ;;  %831 = vmatpush.bf16.msra.mxu3 %v1171_v60  ;;  %vm1127_vm4 = vmpackc.low %vm1424_vm3, %vm1126_vm2  ;;  %s909_s24 = scalar_lea.hbm %s1856_s3, %s1176_s17 }
  0x16   : > { %s1500_s28 = scalar_lea.vmem %s1853_s0, %s1139_s25  ;;  %s910_s25 = sshll.u32 %s1794_s11, 4  ;;  %s911_s25 = int_to_ptr.vmem [resolvable:$true] %s910_s25 }
  0x17   : > { %v174_v0 = vld [vmem:[%s1500_s28 + $0x20] sm:$0xff]  ;;  %v176_v1 = vld [vmem:[%s1500_s28 + $0x30] sm:$0xff]  ;;  %v173_v2 = vld [vmem:[%s1500_s28 + $0x18] sm:$0xff]  ;;  %s912_s26 = sshll.u32 %s909_s24, 4  ;;  %s913_s26 = int_to_ptr.hbm [resolvable:$true] %s912_s26 }
  0x18   : > { %v206_v3 = vrot.slane %v174_v0, 7  ;;  %v208_v4 = vrot.slane %v176_v1, 7  ;;  %v175_v5 = vld [vmem:[%s1500_s28 + $0x28] sm:$0xff]  ;;  %v205_v6 = vrot.slane %v173_v2, 7  ;;  %v170_v7 = vld [vmem:[%s1500_s28] sm:$0xff]  ;;  %v172_v8 = vld [vmem:[%s1500_s28 + $0x10] sm:$0xff]  ;;  %v1262_v15 = vpack.i.bf16 %v176_v1, %v174_v0  ;;  %745 = vmatpush.bf16.msra.mxu0 %v1146_v53  ;;  %1179 = vmatpush.bf16.msra.mxu1 %v1146_v53 }
  0x19   : > { %v207_v9 = vrot.slane %v175_v5, 7  ;;  %v202_v10 = vrot.slane %v170_v7, 7  ;;  %v204_v11 = vrot.slane %v172_v8, 7  ;;  %v1252_v16 = vpack.i.bf16 %v175_v5, %v173_v2  ;;  %v177_v18 = vld [vmem:[%s1500_s28 + $0x38] sm:$0xff]  ;;  %v179_v19 = vld [vmem:[%s1500_s28 + $0x48] sm:$0xff]  ;;  %v178_v29 = vld [vmem:[%s1500_s28 + $0x40] sm:$0xff]  ;;  %1180 = vmatpush.bf16.msra.mxu2 %v1146_v53 }
  0x1a   : > { %v1257_v12 = vpack.i.bf16 %v208_v4, %v206_v3  ;;  %v1242_v17 = vpack.i.bf16 %v172_v8, %v170_v7  ;;  %v181_v20 = vld [vmem:[%s1500_s28 + $0x58] sm:$0xff]  ;;  %v183_v21 = vld [vmem:[%s1500_s28 + $0x68] sm:$0xff]  ;;  %v209_v22 = vrot.slane %v177_v18, 7  ;;  %v211_v23 = vrot.slane %v179_v19, 7  ;;  %v180_v30 = vld [vmem:[%s1500_s28 + $0x50] sm:$0xff]  ;;  %s1372_s27 = sshra.s32 %s913_s26, 4  ;;  %s1373_s27 = int_to_ptr.hbm [resolvable:$true] %s1372_s27 }
  0x1b   : > { %v1247_v13 = vpack.i.bf16 %v207_v9, %v205_v6  ;;  %v1237_v14 = vpack.i.bf16 %v204_v11, %v202_v10  ;;  %v213_v24 = vrot.slane %v181_v20, 7  ;;  %v215_v25 = vrot.slane %v183_v21, 7  ;;  %v171_v36 = vld [vmem:[%s1500_s28 + $0x8] sm:$0xff]  ;;  %v1529_v39 = vld [vmem:[%s1500_s28 + $0x60] sm:$0xff]  ;;  %v1532_v40 = vld [vmem:[%s1500_s28 + $0x70] sm:$0xff]  ;;  %s1374_s30 = scalar_lea.hbm %s1373_s27, 64  ;;  %p1379_p0 = scmp.lt.s32.totalorder %s1373_s27, %s1856_s3 }
  0x1c   : > { %1258 = vrot.lane.b32.xlu2 %v1257_v12, %s1422_s29  ;;  %v1277_v26 = vpack.i.bf16 %v211_v23, %v209_v22  ;;  %v1272_v27 = vpack.i.bf16 %v183_v21, %v181_v20  ;;  %v210_v31 = vrot.slane %v178_v29, 7  ;;  %v212_v32 = vrot.slane %v180_v30, 7  ;;  %746 = vmatpush.bf16.msra.mxu0 %v1145_v56  ;;  %v1143_v2 = vld [vmem:[%s1854_s1 + $0x18] sm:$0xff]  ;;  %v1170_v3 = vld [vmem:[%s1854_s1 + $0xf0] sm:$0xff]  ;;  %v1140_v22 = vld [vmem:[%s1854_s1] sm:$0xff]  ;;  %p1375_p11 = scmp.ne.s32.totalorder %s1373_s27, %s1374_s30  ;;  %p1380_p1 = scmp.lt.s32.totalorder %s1378_s6, %s1374_s30 }
  0x1d   : > { %1248 = vrot.lane.b32.xlu1 %v1247_v13, %s1422_s29  ;;  %1238 = vrot.lane.b32.xlu0 %v1237_v14, %s1422_s29  ;;  %v1267_v28 = vpack.i.bf16 %v215_v25, %v213_v24  ;;  %v1292_v33 = vpack.i.bf16 %v180_v30, %v178_v29  ;;  %v1282_v35 = vpack.i.bf16 %v179_v19, %v177_v18  ;;  %v203_v37 = vrot.slane %v171_v36, 7  ;;  %v1142_v13 = vld [vmem:[%s1854_s1 + $0x10] sm:$0xff]  ;;  %v1169_v14 = vld [vmem:[%s1854_s1 + $0xe8] sm:$0xff] }
  0x1e   : > { %v1287_v34 = vpack.i.bf16 %v212_v32, %v210_v31  ;;  %v214_v41 = vrot.slane %v1529_v39, 7  ;;  %v216_v42 = vrot.slane %v1532_v40, 7  ;;  %v1317_v51 = vpack.i.bf16 %v1532_v40, %v1529_v39  ;;  %1181 = vmatpush.bf16.msra.mxu1 %v1145_v56  ;;  %1182 = vmatpush.bf16.msra.mxu2 %v1145_v56  ;;  %v1141_v18 = vld [vmem:[%s1854_s1 + $0x8] sm:$0xff]  ;;  %v1168_v19 = vld [vmem:[%s1854_s1 + $0xe0] sm:$0xff]  ;;  %v1167_v23 = vld [vmem:[%s1854_s1 + $0xd8] sm:$0xff]  ;;  %p1376_p12 = pnand %p1375_p11, %p1485_p5  ;;  %p1381_p2 = por %p1380_p1, %p1379_p0 }
  0x1f   : > { %v1297_v38 = vpack.i.bf16 %v171_v36, %v203_v37  ;;  %832 = vmatpush.bf16.msra.mxu3 %v1170_v3  ;;  %v1175_v24 = vld [vmem:[%s1854_s1 + $0x118] sm:$0xff]  ;;  %v1166_v31 = vld [vmem:[%s1854_s1 + $0xd0] sm:$0xff] }
  0x20   : > { %v1312_v43 = vpack.i.bf16 %v216_v42, %v214_v41  ;;  %747 = vmatpush.bf16.msra.mxu0 %v1144_v59  ;;  %v1174_v32 = vld [vmem:[%s1854_s1 + $0x110] sm:$0xff]  ;;  %v1165_v41 = vld [vmem:[%s1854_s1 + $0xc8] sm:$0xff]  ;;  %p1377_p13 = pneg %p1376_p12 }
  0x22   : > { %1183 = vmatpush.bf16.msra.mxu1 %v1144_v59  ;;  %1184 = vmatpush.bf16.msra.mxu2 %v1144_v59  ;;  %p1382_p3 = pnand %p1381_p2, %p1377_p13 }
  0x23   : > { %833 = vmatpush.bf16.msra.mxu3 %v1169_v14 }
  0x24   : > { %1263 = vrot.lane.b32.xlu2 %v1262_v15, %s1422_s29  ;;  %748 = vmatpush.bf16.msra.mxu0 %v1143_v2 }
  0x25   : > { %1253 = vrot.lane.b32.xlu1 %v1252_v16, %s1422_s29  ;;  %1243 = vrot.lane.b32.xlu0 %v1242_v17, %s1422_s29 }
  0x26   : > { %1185 = vmatpush.bf16.msra.mxu1 %v1143_v2  ;;  %1186 = vmatpush.bf16.msra.mxu2 %v1143_v2 }
  0x27   : > { %834 = vmatpush.bf16.msra.mxu3 %v1168_v19 }
  0x28   : > { %749 = vmatpush.bf16.msra.mxu0 %v1142_v13 }
  0x2a   : > { %1187 = vmatpush.bf16.msra.mxu1 %v1142_v13  ;;  %1188 = vmatpush.bf16.msra.mxu2 %v1142_v13 }
  0x2b   : > { %835 = vmatpush.bf16.msra.mxu3 %v1167_v23 }
  0x2c   : > { %1278 = vrot.lane.b32.xlu2 %v1277_v26, %s1422_s29  ;;  %750 = vmatpush.bf16.msra.mxu0 %v1141_v18 }
  0x2d   : > { %1273 = vrot.lane.b32.xlu1 %v1272_v27, %s1422_s29  ;;  %1268 = vrot.lane.b32.xlu0 %v1267_v28, %s1422_s29 }
  0x2e   : > { %1189 = vmatpush.bf16.msra.mxu1 %v1141_v18  ;;  %1190 = vmatpush.bf16.msra.mxu2 %v1141_v18 }
  0x2f   : > { %836 = vmatpush.bf16.msra.mxu3 %v1166_v31  ;;  %v1159_v31 = vld [vmem:[%s1854_s1 + $0x98] sm:$0xff] }
  0x30   : > { %751 = vmatpush.bf16.msra.mxu0 %v1140_v22 }
  0x32   : > { %1191 = vmatpush.bf16.msra.mxu1 %v1140_v22  ;;  %1192 = vmatpush.bf16.msra.mxu2 %v1140_v22 }
  0x33   : > { %837 = vmatpush.bf16.msra.mxu3 %v1165_v41 }
  0x34   : > { %1293 = vrot.lane.b32.xlu2 %v1292_v33, %s1422_s29  ;;  %864 = vmatpush.bf16.msrb.mxu0 %v1175_v24  ;;  %v1153_v24 = vld [vmem:[%s1854_s1 + $0x68] sm:$0xff] }
  0x35   : > { %1288 = vrot.lane.b32.xlu1 %v1287_v34, %s1422_s29  ;;  %1283 = vrot.lane.b32.xlu0 %v1282_v35, %s1422_s29 }
  0x38   : > { %865 = vmatpush.bf16.msrb.mxu0 %v1174_v32  ;;  %v1150_v32 = vld [vmem:[%s1854_s1 + $0x50] sm:$0xff] }
  0x3d   : > { %1298 = vrot.lane.b32.xlu0 %v1297_v38, %s1422_s29  ;;  %v185_v38 = vld [vmem:[%s1500_s28 + $0x78] sm:$0xff] }
  0x45   : > { %1313 = vrot.lane.b32.xlu0 %v1312_v43, %s1422_s29  ;;  %v1173_v43 = vld [vmem:[%s1854_s1 + $0x108] sm:$0xff] }
  0x46   : > { %866 = vmatpush.bf16.msrb.mxu0 %v1173_v43 }
  0x76   : > { %v1259_v44 = vpop.permute.xlu2 %1258 }
  0x77   : > { %v1261_v45 = vunpack.i.h.bf16 %v1259_v44  ;;  %v1260_v61 = vunpack.i.l.bf16 %v1259_v44 }
  0x79   : > { %v273_v46 = vsel %vm266_vm0, 0.0, %v1261_v45  ;;  %v271_v10 = vsel %vm266_vm0, 0.0, %v1260_v61  ;;  %v217_v45 = vrot.slane %v185_v38, 7 }
  0x7e   : > { %v1264_v47 = vpop.permute.xlu2 %1263 }
  0x7f   : > { %v1266_v48 = vunpack.i.h.bf16 %v1264_v47  ;;  %v1265_v6 = vunpack.i.l.bf16 %v1264_v47 }
  0x81   : > { %v338_v49 = vsel %vm331_vm1, %v273_v46, %v1266_v48  ;;  %v336_v15 = vsel %vm331_vm1, %v271_v10, %v1265_v6 }
  0x82   : > { %v1327_v50 = vpack.i.bf16 %v1266_v48, %v338_v49  ;;  %v1322_v20 = vpack.i.bf16 %v1265_v6, %v336_v15 }
  0x84   : > { %1328 = vrot.lane.b32.xlu0 %v1327_v50, %s1422_s29  ;;  %v1164_v50 = vld [vmem:[%s1854_s1 + $0xc0] sm:$0xff] }
  0x85   : > { %838 = vmatpush.bf16.msra.mxu3 %v1164_v50 }
  0x86   : > { %v1571_v9 = vpop.permute.xlu2 %1278 }
  0x8e   : > { %v1294_v21 = vpop.permute.xlu2 %1293 }
  0x8f   : > { %v1548_v54 = vpop.permute.xlu1 %1248  ;;  %v1239_v55 = vpop.permute.xlu0 %1238  ;;  %v1296_v26 = vunpack.i.h.bf16 %v1294_v21  ;;  %v1295_v27 = vunpack.i.l.bf16 %v1294_v21 }
  0x90   : > { %v1241_v57 = vunpack.i.h.bf16 %v1239_v55  ;;  %v1240_v58 = vunpack.i.l.bf16 %v1239_v55  ;;  %v1250_v33 = vunpack.i.l.bf16 %v1548_v54  ;;  %v1251_v46 = vunpack.i.h.bf16 %v1548_v54 }
  0x91   : > { %v1352_v54 = vpack.i.bf16 %v185_v38, %v217_v45 }
  0x92   : > { %v269_v4 = vsel %vm266_vm0, 0.0, %v1241_v57  ;;  %v267_v5 = vsel %vm266_vm0, 0.0, %v1240_v58  ;;  %v270_v44 = vsel %vm266_vm0, 0.0, %v1250_v33  ;;  %v272_v56 = vsel %vm266_vm0, 0.0, %v1251_v46  ;;  %v1158_v33 = vld [vmem:[%s1854_s1 + $0x90] sm:$0xff] }
  0x93   : > { %v1423_v58 = vmov 0.0  }
  0x97   : > { %v1559_v62 = vpop.permute.xlu1 %1253  ;;  %v1244_v63 = vpop.permute.xlu0 %1243 }
  0x98   : > { %v1246_v0 = vunpack.i.h.bf16 %v1244_v63  ;;  %v1245_v1 = vunpack.i.l.bf16 %v1244_v63  ;;  %v1625_v42 = vunpack.i.l.bf16 %v1559_v62  ;;  %v1645_v53 = vunpack.i.h.bf16 %v1559_v62  ;;  %v1155_v62 = vld [vmem:[%s1854_s1 + $0x78] sm:$0xff] }
  0x99   : > { %v1163_v63 = vld [vmem:[%s1854_s1 + $0xb8] sm:$0xff]  ;;  %773 = vmatpush.bf16.msrb.mxu1 %v1155_v62 }
  0x9a   : > { %v334_v7 = vsel %vm331_vm1, %v269_v4, %v1246_v0  ;;  %v332_v8 = vsel %vm331_vm1, %v267_v5, %v1245_v1  ;;  %v335_v52 = vsel %vm331_vm1, %v270_v44, %v1625_v42  ;;  %v337_v61 = vsel %vm331_vm1, %v272_v56, %v1645_v53  ;;  %802 = vmatpush.bf16.msrb.mxu2 %v1163_v63 }
  0x9b   : > { %v1307_v11 = vpack.i.bf16 %v1246_v0, %v334_v7  ;;  %v1302_v12 = vpack.i.bf16 %v1245_v1, %v332_v8  ;;  %v425_v0 = vpack.c.bf16 %v337_v61, %v335_v52  ;;  %v1280_v1 = vunpack.i.l.bf16 %v1571_v9 }
  0x9c   : > { %v1281_v7 = vunpack.i.h.bf16 %v1571_v9 }
  0x9d   : > { %1308 = vrot.lane.b32.xlu2 %v1307_v11, %s1422_s29  ;;  %1303 = vrot.lane.b32.xlu1 %v1302_v12, %s1422_s29  ;;  %v274_v3 = vsel %vm266_vm0, 0.0, %v1280_v1 }
  0x9e   : > { %757 = vmatmul.bf16.vlgmr.msra.gmra.mxu1 %v425_v0  ;;  %v276_v15 = vsel %vm266_vm0, 0.0, %v1281_v7 }
  0x9f   : > { %v1583_v16 = vpop.permute.xlu1 %1273  ;;  %v1585_v17 = vpop.permute.xlu0 %1268 }
  0xa0   : > { %v1271_v8 = vunpack.i.h.bf16 %v1585_v17  ;;  %v1270_v10 = vunpack.i.l.bf16 %v1585_v17  ;;  %v1676_v12 = vunpack.i.h.bf16 %v1583_v16  ;;  %v1679_v13 = vunpack.i.l.bf16 %v1583_v16  ;;  %v1154_v17 = vld [vmem:[%s1854_s1 + $0x70] sm:$0xff] }
  0xa1   : > { %v1162_v16 = vld [vmem:[%s1854_s1 + $0xb0] sm:$0xff]  ;;  %774 = vmatpush.bf16.msrb.mxu1 %v1154_v17 }
  0xa2   : > { %v280_v9 = vsel %vm266_vm0, 0.0, %v1271_v8  ;;  %v278_v18 = vsel %vm266_vm0, 0.0, %v1270_v10  ;;  %803 = vmatpush.bf16.msrb.mxu2 %v1162_v16 }
  0xa3   : > { %v343_v19 = vsel %vm331_vm1, %v278_v18, %v1679_v13 }
  0xa5   : > { %1323 = vrot.lane.b32.xlu2 %v1322_v20, %s1422_s29  ;;  %1318 = vrot.lane.b32.xlu1 %v1317_v51, %s1422_s29  ;;  %v1172_v51 = vld [vmem:[%s1854_s1 + $0x100] sm:$0xff]  ;;  %v1698_v20 = vsel %vm331_vm1, %v280_v9, %v1676_v12 }
  0xa6   : > { %867 = vmatpush.bf16.msrb.mxu0 %v1172_v51  ;;  %v435_v22 = vpack.c.bf16 %v1698_v20, %v343_v19  ;;  %775 = vmatpush.bf16.msrb.mxu1 %v1153_v24 }
  0xa7   : > { %v1289_v25 = vpop.permute.xlu1 %1288  ;;  %v1607_v28 = vpop.permute.xlu0 %1283 }
  0xa8   : > { %v1291_v29 = vunpack.i.h.bf16 %v1289_v25  ;;  %v1290_v30 = vunpack.i.l.bf16 %v1289_v25  ;;  %v1662_v2 = vunpack.i.l.bf16 %v1607_v28  ;;  %v1682_v14 = vunpack.i.h.bf16 %v1607_v28  ;;  %767 = vmatmul.bf16.vlgmr.msra.gmra.mxu2 %v435_v22  ;;  %v1160_v28 = vld [vmem:[%s1854_s1 + $0xa0] sm:$0xff] }
  0xaa   : > { %v277_v34 = vsel %vm266_vm0, 0.0, %v1291_v29  ;;  %v275_v35 = vsel %vm266_vm0, 0.0, %v1290_v30  ;;  %v339_v4 = vsel %vm331_vm1, %v274_v3, %v1662_v2  ;;  %v429_v11 = vpack.c.bf16 %v1662_v2, %v1645_v53  ;;  %v1151_v29 = vld [vmem:[%s1854_s1 + $0x58] sm:$0xff] }
  0xab   : > { %v342_v36 = vsel %vm331_vm1, %v277_v34, %v1296_v26  ;;  %v340_v37 = vsel %vm331_vm1, %v275_v35, %v1295_v27  ;;  %v428_v6 = vpack.c.bf16 %v339_v4, %v337_v61  ;;  %v341_v21 = vsel %vm331_vm1, %v276_v15, %v1682_v14  ;;  %v1149_v34 = vld [vmem:[%s1854_s1 + $0x48] sm:$0xff] }
  0xac   : > { %v1337_v39 = vpack.i.bf16 %v1296_v26, %v342_v36  ;;  %v1332_v40 = vpack.i.bf16 %v1295_v27, %v340_v37  ;;  %v433_v23 = vpack.c.bf16 %v343_v19, %v341_v21  ;;  %v430_v25 = vpack.c.bf16 %v341_v21, %v339_v4  ;;  %v1161_v26 = vld [vmem:[%s1854_s1 + $0xa8] sm:$0xff]  ;;  %v1152_v27 = vld [vmem:[%s1854_s1 + $0x60] sm:$0xff] }
  0xad   : > { %804 = vmatpush.bf16.msrb.mxu2 %v1161_v26  ;;  %776 = vmatpush.bf16.msrb.mxu1 %v1152_v27  ;;  %v434_v30 = vpack.c.bf16 %v1679_v13, %v1682_v14  ;;  %v1157_v35 = vld [vmem:[%s1854_s1 + $0x88] sm:$0xff]  ;;  %v1148_v36 = vld [vmem:[%s1854_s1 + $0x40] sm:$0xff] }
  0xae   : > { %1338 = vrot.lane.b32.xlu2 %v1337_v39, %s1422_s29  ;;  %1333 = vrot.lane.b32.xlu1 %v1332_v40, %s1422_s29  ;;  %v1156_v37 = vld [vmem:[%s1854_s1 + $0x80] sm:$0xff] }
  0xaf   : > { %v1299_v47 = vpop.permute.xlu0 %1298  ;;  %762 = vmatmul.bf16.gmra.mxu1 %v430_v25 }
  0xb0   : > { %v1634_v48 = vunpack.i.h.bf16 %v1299_v47  ;;  %v1300_v49 = vunpack.i.l.bf16 %v1299_v47 }
  0xb1   : > { %805 = vmatpush.bf16.msrb.mxu2 %v1160_v28  ;;  %777 = vmatpush.bf16.msrb.mxu1 %v1151_v29 }
  0xb2   : > { %v268_v55 = vsel %vm266_vm0, 0.0, %v1300_v49  ;;  %v424_v5 = vpack.c.bf16 %v1625_v42, %v1634_v48 }
  0xb3   : > { %v333_v57 = vsel %vm331_vm1, %v268_v55, %v1634_v48 }
  0xb4   : > { %v420_v59 = vpack.c.bf16 %v333_v57, %v1423_v58  ;;  %v423_v60 = vpack.c.bf16 %v335_v52, %v333_v57 }
  0xb5   : > { %806 = vmatpush.bf16.msrb.mxu2 %v1159_v31  ;;  %778 = vmatpush.bf16.msrb.mxu1 %v1150_v32  ;;  %v1773_v32 = vld [vmem:[%s1855_s2] ss:$0 sm:$0xff] }
  0xb6   : > { %1353 = vrot.lane.b32.xlu2 %v1352_v54, %s1422_s29  ;;  %752 = vmatmul.bf16.vlgmr.msra.gmra.mxu0 %v420_v59 }
  0xb7   : > { %839 = vmatmul.bf16.vlgmr.msra.gmra.mxu3 %v423_v60  ;;  %v1314_v44 = vpop.permute.xlu0 %1313 }
  0xb8   : > { %v1316_v54 = vunpack.i.h.bf16 %v1314_v44  ;;  %v1315_v58 = vunpack.i.l.bf16 %v1314_v44 }
  0xb9   : > { %807 = vmatpush.bf16.msrb.mxu2 %v1158_v33  ;;  %779 = vmatpush.bf16.msrb.mxu1 %v1149_v34 }
  0xba   : > { %v281_v63 = vsel %vm266_vm0, 0.0, %v1316_v54  ;;  %v279_v0 = vsel %vm266_vm0, 0.0, %v1315_v58 }
  0xbd   : > { %808 = vmatpush.bf16.msrb.mxu2 %v1157_v35  ;;  %780 = vmatpush.bf16.msrb.mxu1 %v1148_v36 }
  0xc1   : > { %809 = vmatpush.bf16.msrb.mxu2 %v1156_v37 }
  0xc6   : > { %1130 = vmatmul.msk.bf16.vlgmr.msrb.gmra.mxu0 %vm331_vm1, %v424_v5 }
  0xc7   : > { %844 = vmatmul.bf16.gmra.mxu3 %v428_v6 }
  0xd6   : > { %1131 = vmatmul.msk.bf16.gmra.mxu0 %vm331_vm1, %v429_v11 }
  0xd7   : > { %849 = vmatmul.bf16.gmra.mxu3 %v433_v23 }
  0xe6   : > { %1132 = vmatmul.msk.bf16.gmra.mxu0 %vm331_vm1, %v434_v30 }
  0xf6   : > { %v1329_v5 = vpop.permute.xlu0 %1328 }
  0xf7   : > { %v1309_v38 = vpop.permute.xlu2 %1308  ;;  %v1331_v6 = vunpack.i.h.bf16 %v1329_v5  ;;  %v1330_v18 = vunpack.i.l.bf16 %v1329_v5 }
  0xf8   : > { %v1310_v41 = vunpack.i.l.bf16 %v1309_v38  ;;  %v1311_v43 = vunpack.i.h.bf16 %v1309_v38 }
  0xf9   : > { %v391_v16 = vsel %vm331_vm1, %v1330_v18, %v1331_v6 }
  0xfa   : > { %v413_v50 = vsel %vm331_vm1, %v1634_v48, %v1310_v41  ;;  %v389_v57 = vsel %vm331_vm1, %v1310_v41, %v1311_v43 }
  0xff   : > { %v1324_v39 = vpop.permute.xlu2 %1323 }
 0x100   : > { %v1326_v7 = vunpack.i.h.bf16 %v1324_v39  ;;  %v1325_v11 = vunpack.i.l.bf16 %v1324_v39 }
 0x102   : > { %v390_v17 = vsel %vm331_vm1, %v1325_v11, %v1326_v7  ;;  %v414_v19 = vsel %vm331_vm1, %v1625_v42, %v1325_v11 }
 0x103   : > { %v427_v21 = vpack.c.bf16 %v391_v16, %v390_v17 }
 0x108   : > { %v1339_v40 = vpop.permute.xlu2 %1338 }
 0x109   : > { %v1341_v24 = vunpack.i.h.bf16 %v1339_v40  ;;  %v1340_v27 = vunpack.i.l.bf16 %v1339_v40 }
 0x10b   : > { %v393_v29 = vsel %vm331_vm1, %v1340_v27, %v1341_v24  ;;  %v417_v42 = vsel %vm331_vm1, %v1682_v14, %v1340_v27 }
 0x10f   : > { %v1304_v45 = vpop.permute.xlu1 %1303 }
 0x110   : > { %v1306_v46 = vunpack.i.h.bf16 %v1304_v45  ;;  %v1305_v47 = vunpack.i.l.bf16 %v1304_v45  ;;  %v1354_v49 = vpop.permute.xlu2 %1353 }
 0x111   : > { %v1356_v51 = vunpack.i.h.bf16 %v1354_v49  ;;  %v1355_v52 = vunpack.i.l.bf16 %v1354_v49 }
 0x112   : > { %v1128_v55 = vpack.c.bf16 %v413_v50, %v1305_v47  ;;  %v388_v56 = vsel %vm331_vm1, %v1305_v47, %v1306_v46 }
 0x113   : > { %v439_v59 = vpack.c.bf16 %v1356_v51, %v1676_v12  ;;  %v282_v60 = vsel %vm266_vm0, 0.0, %v1355_v52  ;;  %v422_v61 = vpack.c.bf16 %v389_v57, %v388_v56 }
 0x114   : > { %1129 = vmatmul.msk.bf16.vlgmr.msrb.gmra.mxu1 %vm1127_vm4, %v1128_v55  ;;  %v347_v62 = vsel %vm331_vm1, %v282_v60, %v1356_v51 }
 0x115   : > { %810 = vmatmul.bf16.vlgmr.msrb.gmra.mxu2 %v422_v61  ;;  %1133 = vmatmul.msk.bf16.gmra.mxu0 %vm331_vm1, %v439_v59  ;;  %v438_v48 = vpack.c.bf16 %v347_v62, %v1698_v20  ;;  %v415_v20 = vsel %vm331_vm1, %v1645_v53, %v1330_v18 }
 0x116   : > { %v426_v22 = vpack.c.bf16 %v415_v20, %v414_v19 }
 0x117   : > { %854 = vmatmul.bf16.gmra.mxu3 %v438_v48  ;;  %v1319_v1 = vpop.permute.xlu1 %1318 }
 0x118   : > { %v1321_v3 = vunpack.i.h.bf16 %v1319_v1  ;;  %v1320_v4 = vunpack.i.l.bf16 %v1319_v1 }
 0x11a   : > { %v346_v8 = vsel %vm331_vm1, %v281_v63, %v1321_v3  ;;  %v344_v10 = vsel %vm331_vm1, %v279_v0, %v1320_v4 }
 0x11b   : > { %v1347_v15 = vpack.i.bf16 %v1321_v3, %v346_v8  ;;  %v1342_v9 = vpack.i.bf16 %v1320_v4, %v344_v10 }
 0x11d   : > { %1348 = vrot.lane.b32.xlu1 %v1347_v15, %s1422_s29  ;;  %1343 = vrot.lane.b32.xlu0 %v1342_v9, %s1422_s29 }
 0x120   : > { %v1334_v23 = vpop.permute.xlu1 %1333 }
 0x121   : > { %v1336_v25 = vunpack.i.h.bf16 %v1334_v23  ;;  %v1335_v26 = vunpack.i.l.bf16 %v1334_v23 }
 0x123   : > { %v392_v28 = vsel %vm331_vm1, %v1335_v26, %v1336_v25  ;;  %v416_v30 = vsel %vm331_vm1, %v1662_v2, %v1335_v26  ;;  %v758_v2 = vpop.f32.mrf.mxu1 }
 0x124   : > { %786 = vmatmul.bf16.gmra.mxu1 %v426_v22  ;;  %v432_v53 = vpack.c.bf16 %v393_v29, %v392_v28  ;;  %v431_v31 = vpack.c.bf16 %v417_v42, %v416_v30  ;;  %v759_v10 = vadd.f32 %v1773_v32, %v758_v2 }
 0x125   : > { %815 = vmatmul.bf16.gmra.mxu2 %v427_v21 }
 0x12b   : > { %v768_v33 = vpop.f32.mrf.mxu2  ;;  %v760_v37 = vpop.f32.mrf.mxu1 }
 0x12c   : > { %v1776_v34 = vadd.f32 %v1773_v32, %v768_v33  ;;  %v761_v20 = vadd.f32 %v1773_v32, %v760_v37 }
 0x133   : > { %v770_v35 = vpop.f32.mrf.mxu2  ;;  %v753_v14 = vpop.f32.mrf.mxu0 }
 0x134   : > { %791 = vmatmul.bf16.gmra.mxu1 %v431_v31  ;;  %v1779_v36 = vadd.f32 %v1773_v32, %v770_v35  ;;  %v763_v38 = vpop.f32.mrf.mxu1  ;;  %v754_v56 = vadd.f32 %v1773_v32, %v753_v14 }
 0x135   : > { %820 = vmatmul.bf16.gmra.mxu2 %v432_v53  ;;  %v764_v29 = vadd.f32 %v1773_v32, %v763_v38 }
 0x13a   : > { %v840_v44 = vpop.f32.mrf.mxu3 }
 0x13b   : > { %v755_v39 = vpop.f32.mrf.mxu0 }
 0x13c   : > { %v1781_v40 = vpop.f32.mrf.mxu1  ;;  %v756_v0 = vadd.f32 %v1773_v32, %v755_v39 }
 0x13d   : > { %v766_v14 = vadd.f32 %v1773_v32, %v1781_v40 }
 0x142   : > { %v842_v48 = vpop.f32.mrf.mxu3 }
 0x143   : > { %v869_v51 = vpop.f32.mrf.mxu0 }
 0x14a   : > { %v845_v8 = vpop.f32.mrf.mxu3 }
 0x152   : > { %v847_v22 = vpop.f32.mrf.mxu3 }
 0x15a   : > { %v850_v53 = vpop.f32.mrf.mxu3 }
 0x18f   : > { %v1349_v41 = vpop.permute.xlu1 %1348  ;;  %v1344_v43 = vpop.permute.xlu0 %1343 }
 0x190   : > { %v1351_v45 = vunpack.i.h.bf16 %v1349_v41  ;;  %v1350_v46 = vunpack.i.l.bf16 %v1349_v41  ;;  %v1346_v47 = vunpack.i.h.bf16 %v1344_v43  ;;  %v1345_v49 = vunpack.i.l.bf16 %v1344_v43 }
 0x191   : > { %v782_v50 = vpop.f32.mrf.mxu1 }
 0x192   : > { %v418_v52 = vsel %vm331_vm1, %v1679_v13, %v1345_v49  ;;  %v419_v54 = vsel %vm331_vm1, %v1676_v12, %v1350_v46  ;;  %v394_v55 = vsel %vm331_vm1, %v1345_v49, %v1346_v47  ;;  %v395_v58 = vsel %vm331_vm1, %v1350_v46, %v1351_v45  ;;  %v871_v12 = vpop.f32.mrf.mxu0 }
 0x193   : > { %v436_v57 = vpack.c.bf16 %v419_v54, %v418_v52  ;;  %v437_v59 = vpack.c.bf16 %v395_v58, %v394_v55  ;;  %v783_v60 = vadd.f32 %v782_v50, %v754_v56 }
 0x195   : > { %796 = vmatmul.bf16.gmra.mxu1 %v436_v57  ;;  %825 = vmatmul.bf16.gmra.mxu2 %v437_v59 }
 0x198   : > { %v811_v61 = vpop.f32.mrf.mxu2 }
 0x199   : > { %v812_v62 = vadd.f32 %v811_v61, %v783_v60  ;;  %v784_v13 = vpop.f32.mrf.mxu1 }
 0x19a   : > { %v785_v3 = vadd.f32 %v784_v13, %v756_v0  ;;  %v874_v15 = vpop.f32.mrf.mxu0 }
 0x19b   : > { %v841_v63 = vadd.f32 %v840_v44, %v812_v62  ;;  %v852_v44 = vpop.f32.mrf.mxu3 }
 0x19d   : > { %v870_v1 = vadd.f32 %v869_v51, %v841_v63 }
 0x19f   : > { %889 = vst.msk [vmem:[%s1794_s11] sm:$0xff] %vm331_vm1, %v870_v1 }
 0x1a0   : > { %v813_v4 = vpop.f32.mrf.mxu2 }
 0x1a1   : > { %v814_v5 = vadd.f32 %v813_v4, %v785_v3  ;;  %v787_v6 = vpop.f32.mrf.mxu1 }
 0x1a2   : > { %v788_v9 = vadd.f32 %v787_v6, %v759_v10  ;;  %v876_v24 = vpop.f32.mrf.mxu0 }
 0x1a3   : > { %v843_v7 = vadd.f32 %v842_v48, %v814_v5  ;;  %v855_v51 = vpop.f32.mrf.mxu3 }
 0x1a5   : > { %v872_v11 = vadd.f32 %v871_v12, %v843_v7 }
 0x1a7   : > { %890 = vst.msk [vmem:[%s1794_s11 + $0x8] sm:$0xff] %vm331_vm1, %v872_v11 }
 0x1a8   : > { %v816_v18 = vpop.f32.mrf.mxu2 }
 0x1a9   : > { %v817_v17 = vadd.f32 %v816_v18, %v788_v9  ;;  %v789_v16 = vpop.f32.mrf.mxu1 }
 0x1aa   : > { %v790_v23 = vadd.f32 %v789_v16, %v761_v20  ;;  %v879_v35 = vpop.f32.mrf.mxu0 }
 0x1ab   : > { %v846_v19 = vadd.f32 %v845_v8, %v817_v17  ;;  %v857_v59 = vpop.f32.mrf.mxu3 }
 0x1ad   : > { %v875_v21 = vadd.f32 %v874_v15, %v846_v19 }
 0x1af   : > { %891 = vst.msk [vmem:[%s1794_s11 + $0x10] sm:$0xff] %vm331_vm1, %v875_v21 }
 0x1b0   : > { %v818_v25 = vpop.f32.mrf.mxu2 }
 0x1b1   : > { %v819_v26 = vadd.f32 %v818_v25, %v790_v23  ;;  %v792_v27 = vpop.f32.mrf.mxu1 }
 0x1b2   : > { %v793_v42 = vadd.f32 %v792_v27, %v764_v29  ;;  %v881_v46 = vpop.f32.mrf.mxu0 }
 0x1b3   : > { %v848_v28 = vadd.f32 %v847_v22, %v819_v26 }
 0x1b5   : > { %v877_v30 = vadd.f32 %v876_v24, %v848_v28 }
 0x1b7   : > { %892 = vst.msk [vmem:[%s1794_s11 + $0x18] sm:$0xff] %vm331_vm1, %v877_v30 }
 0x1b8   : > { %v821_v31 = vpop.f32.mrf.mxu2 }
 0x1b9   : > { %v822_v33 = vadd.f32 %v821_v31, %v793_v42  ;;  %v794_v37 = vpop.f32.mrf.mxu1 }
 0x1ba   : > { %v795_v41 = vadd.f32 %v794_v37, %v766_v14  ;;  %v884_v52 = vpop.f32.mrf.mxu0 }
 0x1bb   : > { %v851_v2 = vadd.f32 %v850_v53, %v822_v33 }
 0x1bd   : > { %v880_v39 = vadd.f32 %v879_v35, %v851_v2 }
 0x1bf   : > { %893 = vst.msk [vmem:[%s1794_s11 + $0x20] sm:$0xff] %vm331_vm1, %v880_v39 }
 0x1c0   : > { %v823_v38 = vpop.f32.mrf.mxu2 }
 0x1c1   : > { %v824_v43 = vadd.f32 %v823_v38, %v795_v41 }
 0x1c2   : > { %v886_v61 = vpop.f32.mrf.mxu0 }
 0x1c3   : > { %v853_v45 = vadd.f32 %v852_v44, %v824_v43 }
 0x1c5   : > { %v882_v47 = vadd.f32 %v881_v46, %v853_v45 }
 0x1c7   : > { %894 = vst.msk [vmem:[%s1794_s11 + $0x28] sm:$0xff] %vm331_vm1, %v882_v47 }
 0x212   : > { %v797_v49 = vpop.f32.mrf.mxu1 }
 0x213   : > { %v798_v50 = vadd.f32 %v797_v49, %v1776_v34 }
 0x218   : > { %v826_v32 = vpop.f32.mrf.mxu2 }
 0x219   : > { %v827_v40 = vadd.f32 %v826_v32, %v798_v50 }
 0x21a   : > { %v799_v55 = vpop.f32.mrf.mxu1 }
 0x21b   : > { %v856_v54 = vadd.f32 %v855_v51, %v827_v40  ;;  %v800_v57 = vadd.f32 %v799_v55, %v1779_v36 }
 0x21d   : > { %v885_v56 = vadd.f32 %v884_v52, %v856_v54 }
 0x21f   : > { %895 = vst.msk [vmem:[%s1794_s11 + $0x30] sm:$0xff] %vm331_vm1, %v885_v56 }
 0x220   : > { %v828_v58 = vpop.f32.mrf.mxu2 }
 0x221   : > { %v829_v34 = vadd.f32 %v828_v58, %v800_v57 }
 0x223   : > { %v858_v60 = vadd.f32 %v857_v59, %v829_v34 }
 0x225   : > { %v887_v62 = vadd.f32 %v886_v61, %v858_v60 }
 0x227   : > { %896 = vst.msk [vmem:[%s1794_s11 + $0x38] sm:$0xff] %vm331_vm1, %v887_v62 }
 0x228   : > { %1385 = shalt.err (!%p1382_p3)
}
 0x229   : > { %s1425_s29 = smov 128   ;;  %s1426_s8 = smov 8  }
 0x22a   : > { %1193 = dma.vmem_to_hbm [thread:$0]  (%p1485_p5), %s911_s25, 1024, %s913_s26, %s898_s16, %s1425_s29, %s1425_s29, %s1426_s8  }
 0x22b PF: > { %p1199_p4 = scmp.ge.s32.totalorder %s1420_s15, 2  ;;  %s927_s9 = sand.u32 1, %s1408_s12  }
 0x22c   : > { %s928_s10 = scalar_lea.sflag [#allocation3], %s927_s9 }
 0x22d   : > { %p1196_p7 = pnand %p1199_p4, %p1489_p6 }
 0x22f   : > { %p1197_p8 = pneg %p1196_p7 }
 0x231   : > { %1403 = dma.done.wait (%p1197_p8), %s928_s10, 1024  }
 0x232   : > { %1405 = vsyncadd (%p1197_p8), %s928_s10, 4294966272  ;;  %p13_p9 = scmp.ge.s32.totalorder %s1472_s18, 4   ;;  %s1859_s12 = smov %s1412_s13 }
 0x233   : > { %s1860_s13 = smov %s1416_s14  ;;  %s1861_s14 = smov %s1483_s21 }
 0x234   : > { %s1862_s15 = smov %s1472_s18  ;;  %15 = sbr.rel (!%p13_p9) target bundleno = 3 (0x3), region = 67 }
 0x239   :  { %934 = vsyncpa [#allocation3], 1 }
 0x23a   :  { %936 = vsyncpa [#allocation3 + $0x1], 1 }

// kernel: simple_down_encoder_block2d.2
= control target key start
LH: loop header
LB: loop body
LE: loop exit
PB: predicated region body
PF: predicated region fallthrough
CT: control target
= control target key end

     0   :  { %s4621_s30 = smov 0   ;;  %s8822_s0 = inlined_call_operand.vmem [shape: f32[2,16,16,32], index: 0, kind: input, shape index: {}]   ;;  %s8823_s1 = inlined_call_operand.vmem [shape: f32[1,32], index: 1, kind: input, shape index: {}]   ;;  %s8824_s2 = inlined_call_operand.vmem [shape: f32[1,32], index: 2, kind: input, shape index: {}]   ;;  %s8825_s3 = inlined_call_operand.vmem [shape: f32[32,32], index: 3, kind: input, shape index: {}]   ;;  %s8826_s4 = inlined_call_operand.vmem [shape: bf16[288,64], index: 4, kind: input, shape index: {}]   ;;  %s8827_s5 = inlined_call_operand.vmem [shape: f32[1,64], index: 5, kind: input, shape index: {}]   ;;  %s8828_s6 = inlined_call_operand.vmem [shape: f32[1,64], index: 6, kind: input, shape index: {}]   ;;  %s8829_s7 = inlined_call_operand.vmem [shape: f32[1,64], index: 7, kind: input, shape index: {}]   ;;  %s8830_s8 = inlined_call_operand.vmem [shape: f32[64,64], index: 8, kind: input, shape index: {}]   ;;  %s8831_s9 = inlined_call_operand.vmem [shape: f32[2,16,16,64], index: 9, kind: output, shape index: {}]  }
   0x1 LB: > { %s3755_s10 = sadd.s32 4294967295, %s4565_s30   ;;  %p3759_p0 = scmp.ge.s32.totalorder %s4565_s30, 1  ;;  %s4565_s30 = sphi %s4621_s30, %s19_s30  }
   0x2   : > { %p287_p1 = scmp.lt.s32.totalorder %s4565_s30, 3 }
   0x4   : > { %p288_p2 = pnand %p3759_p0, %p287_p1 }
   0x6   : > { %291 = sbr.rel (%p288_p2) target bundleno = 1864 (0x748), region = 56 }
   0xb   : > { %v369_v0 = vld [vmem:[%s8825_s3 + $0x18] sm:$0xff]  ;;  %v368_v1 = vld [vmem:[%s8825_s3 + $0x10] sm:$0xff]  ;;  %p323_p3 = scmp.lt.s32.totalorder %s3755_s10, 1  ;;  %v367_v2 = vld [vmem:[%s8825_s3 + $0x8] sm:$0xff]  ;;  %vm8841_vm0 = vcmask 261120   ;;  %s4567_s27 = smov 32  }
   0xc   : > { %457 = vmatpush.msra.mxu1 %v369_v0  ;;  %v366_v3 = vld [vmem:[%s8825_s3] sm:$0xff]  ;;  %s4568_s28 = smov 64   ;;  %s4569_s14 = smov 96  }
   0xd   : > { %s9358_s10 = smov (!%p323_p3, %s3755_s10), 1 }
   0xe   : > { %458 = vmatpush.msra.mxu1 %v368_v1  ;;  %s3927_s19 = sshll.u32 %s9358_s10, 8 }
   0xf   : > { %s4649_s22 = scalar_lea.vmem %s8822_s0, %s3927_s19  ;;  %s8479_s25 = scalar_lea.vmem %s8831_s9, %s3927_s19 }
  0x10   : > { %459 = vmatpush.msra.mxu1 %v367_v2  ;;  %v4652_v4 = vld [vmem:[%s4649_s22] sm:$0xff]  ;;  %v4655_v5 = vld [vmem:[%s4649_s22 + $0x8] sm:$0xff]  ;;  %v4658_v6 = vld [vmem:[%s4649_s22 + $0x10] sm:$0xff] }
  0x11   : > { %v4661_v7 = vld [vmem:[%s4649_s22 + $0x18] sm:$0xff]  ;;  %v373_v8 = vsel %vm8841_vm0, %v4652_v4, 0.0  ;;  %v374_v9 = vsel %vm8841_vm0, %v4655_v5, 0.0  ;;  %v376_v10 = vsel %vm8841_vm0, %v4658_v6, 0.0  ;;  %v4670_v11 = vld [vmem:[%s4649_s22 + $0x20] sm:$0xff]  ;;  %v4675_v14 = vld [vmem:[%s4649_s22 + $0x28] sm:$0xff] }
  0x12   : > { %460 = vmatpush.msra.mxu1 %v366_v3  ;;  %v375_v12 = vadd.f32 %v374_v9, %v373_v8  ;;  %v378_v13 = vsel %vm8841_vm0, %v4661_v7, 0.0  ;;  %v380_v16 = vsel %vm8841_vm0, %v4670_v11, 0.0  ;;  %v4680_v17 = vld [vmem:[%s4649_s22 + $0x30] sm:$0xff]  ;;  %v382_v19 = vsel %vm8841_vm0, %v4675_v14, 0.0  ;;  %v4685_v20 = vld [vmem:[%s4649_s22 + $0x38] sm:$0xff]  ;;  %v4690_v23 = vld [vmem:[%s4649_s22 + $0x40] sm:$0xff] }
  0x13   : > { %v384_v22 = vsel %vm8841_vm0, %v4680_v17, 0.0  ;;  %v386_v25 = vsel %vm8841_vm0, %v4685_v20, 0.0  ;;  %v4695_v26 = vld [vmem:[%s4649_s22 + $0x48] sm:$0xff]  ;;  %v388_v28 = vsel %vm8841_vm0, %v4690_v23, 0.0  ;;  %v4700_v29 = vld [vmem:[%s4649_s22 + $0x50] sm:$0xff]  ;;  %v4705_v32 = vld [vmem:[%s4649_s22 + $0x58] sm:$0xff] }
  0x14   : > { %614 = vmatpush.msrb.mxu1 %v369_v0  ;;  %v377_v15 = vadd.f32 %v376_v10, %v375_v12  ;;  %v390_v31 = vsel %vm8841_vm0, %v4695_v26, 0.0  ;;  %v392_v34 = vsel %vm8841_vm0, %v4700_v29, 0.0  ;;  %v4710_v35 = vld [vmem:[%s4649_s22 + $0x60] sm:$0xff]  ;;  %v394_v37 = vsel %vm8841_vm0, %v4705_v32, 0.0  ;;  %v4715_v38 = vld [vmem:[%s4649_s22 + $0x68] sm:$0xff]  ;;  %v4720_v41 = vld [vmem:[%s4649_s22 + $0x70] sm:$0xff] }
  0x15   : > { %v396_v40 = vsel %vm8841_vm0, %v4710_v35, 0.0  ;;  %v398_v43 = vsel %vm8841_vm0, %v4715_v38, 0.0  ;;  %v4725_v44 = vld [vmem:[%s4649_s22 + $0x78] sm:$0xff]  ;;  %v400_v46 = vsel %vm8841_vm0, %v4720_v41, 0.0  ;;  %v4730_v47 = vld [vmem:[%s4649_s22 + $0x80] sm:$0xff]  ;;  %v4735_v50 = vld [vmem:[%s4649_s22 + $0x88] sm:$0xff] }
  0x16   : > { %615 = vmatpush.msrb.mxu1 %v368_v1  ;;  %v379_v18 = vadd.f32 %v378_v13, %v377_v15  ;;  %v402_v49 = vsel %vm8841_vm0, %v4725_v44, 0.0  ;;  %v404_v52 = vsel %vm8841_vm0, %v4730_v47, 0.0  ;;  %v4740_v53 = vld [vmem:[%s4649_s22 + $0x90] sm:$0xff]  ;;  %v406_v55 = vsel %vm8841_vm0, %v4735_v50, 0.0  ;;  %v4745_v56 = vld [vmem:[%s4649_s22 + $0x98] sm:$0xff]  ;;  %v4750_v59 = vld [vmem:[%s4649_s22 + $0xa0] sm:$0xff] }
  0x17   : > { %v408_v58 = vsel %vm8841_vm0, %v4740_v53, 0.0  ;;  %v410_v61 = vsel %vm8841_vm0, %v4745_v56, 0.0  ;;  %v4755_v62 = vld [vmem:[%s4649_s22 + $0xa8] sm:$0xff]  ;;  %v412_v0 = vsel %vm8841_vm0, %v4750_v59, 0.0  ;;  %v4760_v1 = vld [vmem:[%s4649_s22 + $0xb0] sm:$0xff]  ;;  %v4765_v8 = vld [vmem:[%s4649_s22 + $0xb8] sm:$0xff] }
  0x18   : > { %616 = vmatpush.msrb.mxu1 %v367_v2  ;;  %v381_v21 = vadd.f32 %v380_v16, %v379_v18  ;;  %v416_v10 = vsel %vm8841_vm0, %v4760_v1, 0.0  ;;  %v4770_v12 = vld [vmem:[%s4649_s22 + $0xc0] sm:$0xff]  ;;  %v418_v15 = vsel %vm8841_vm0, %v4765_v8, 0.0  ;;  %v4775_v16 = vld [vmem:[%s4649_s22 + $0xc8] sm:$0xff] }
  0x1a   : > { %617 = vmatpush.msrb.mxu1 %v366_v3  ;;  %v383_v24 = vadd.f32 %v382_v19, %v381_v21  ;;  %v414_v3 = vsel %vm8841_vm0, %v4755_v62, 0.0  ;;  %v420_v19 = vsel %vm8841_vm0, %v4770_v12, 0.0  ;;  %v4780_v21 = vld [vmem:[%s4649_s22 + $0xd0] sm:$0xff] }
  0x1c   : > { %v385_v27 = vadd.f32 %v384_v22, %v383_v24  ;;  %v422_v24 = vsel %vm8841_vm0, %v4775_v16, 0.0 }
  0x1e   : > { %v387_v30 = vadd.f32 %v386_v25, %v385_v27  ;;  %v4785_v25 = vld [vmem:[%s4649_s22 + $0xd8] sm:$0xff] }
  0x20   : > { %v389_v33 = vadd.f32 %v388_v28, %v387_v30  ;;  %v424_v28 = vsel %vm8841_vm0, %v4780_v21, 0.0  ;;  %v4790_v30 = vld [vmem:[%s4649_s22 + $0xe0] sm:$0xff] }
  0x22   : > { %v391_v36 = vadd.f32 %v390_v31, %v389_v33  ;;  %v426_v33 = vsel %vm8841_vm0, %v4785_v25, 0.0 }
  0x24   : > { %v393_v39 = vadd.f32 %v392_v34, %v391_v36  ;;  %v4795_v34 = vld [vmem:[%s4649_s22 + $0xe8] sm:$0xff] }
  0x26   : > { %v395_v42 = vadd.f32 %v394_v37, %v393_v39  ;;  %v428_v37 = vsel %vm8841_vm0, %v4790_v30, 0.0  ;;  %v4800_v39 = vld [vmem:[%s4649_s22 + $0xf0] sm:$0xff] }
  0x28   : > { %v397_v45 = vadd.f32 %v396_v40, %v395_v42  ;;  %v430_v42 = vsel %vm8841_vm0, %v4795_v34, 0.0 }
  0x2a   : > { %v399_v48 = vadd.f32 %v398_v43, %v397_v45  ;;  %v4805_v43 = vld [vmem:[%s4649_s22 + $0xf8] sm:$0xff] }
  0x2c   : > { %v401_v51 = vadd.f32 %v400_v46, %v399_v48  ;;  %v432_v46 = vsel %vm8841_vm0, %v4800_v39, 0.0 }
  0x2e   : > { %v403_v54 = vadd.f32 %v402_v49, %v401_v51  ;;  %v434_v49 = vsel %vm8841_vm0, %v4805_v43, 0.0 }
  0x30   : > { %v405_v57 = vadd.f32 %v404_v52, %v403_v54 }
  0x32   : > { %v407_v60 = vadd.f32 %v406_v55, %v405_v57 }
  0x34   : > { %v409_v63 = vadd.f32 %v408_v58, %v407_v60 }
  0x36   : > { %v411_v2 = vadd.f32 %v410_v61, %v409_v63 }
  0x38   : > { %v413_v9 = vadd.f32 %v412_v0, %v411_v2 }
  0x3a   : > { %v415_v13 = vadd.f32 %v414_v3, %v413_v9 }
  0x3c   : > { %v417_v18 = vadd.f32 %v416_v10, %v415_v13 }
  0x3e   : > { %v419_v22 = vadd.f32 %v418_v15, %v417_v18 }
  0x40   : > { %v421_v27 = vadd.f32 %v420_v19, %v419_v22 }
  0x42   : > { %v423_v31 = vadd.f32 %v422_v24, %v421_v27 }
  0x44   : > { %v425_v36 = vadd.f32 %v424_v28, %v423_v31 }
  0x46   : > { %v427_v40 = vadd.f32 %v426_v33, %v425_v36 }
  0x48   : > { %v429_v45 = vadd.f32 %v428_v37, %v427_v40 }
  0x4a   : > { %v431_v48 = vadd.f32 %v430_v42, %v429_v45 }
  0x4c   : > { %v433_v51 = vadd.f32 %v432_v46, %v431_v48 }
  0x4e   : > { %v435_v52 = vadd.f32 %v434_v49, %v433_v51 }
  0x50   : > { %v436_v54 = vrot.slane %v435_v52, 4 }
  0x52   : > { %v437_v55 = vadd.f32 %v436_v54, %v435_v52 }
  0x54   : > { %v438_v57 = vrot.slane %v437_v55, 2 }
  0x56   : > { %v439_v58 = vadd.f32 %v438_v57, %v437_v55 }
  0x58   : > { %v440_v60 = vrot.slane %v439_v58, 1 }
  0x5a   : > { %v441_v61 = vadd.f32 %v440_v60, %v439_v58 }
  0x5c   : > { %3764 = vmatmul.msk.f32.vlgmr.msra.gmra.mxu1 %vm8841_vm0, %v441_v61 }
  0xd9   : > { %v462_v63 = vpop.f32.mrf.mxu1 }
  0xda   : > { %v4812_v0 = vperm.slane %v462_v63, 0 }
  0xdc   : > { %v4816_v2 = vsub.f32 %v4652_v4, %v4812_v0  ;;  %v4820_v3 = vsub.f32 %v4655_v5, %v4812_v0  ;;  %v4824_v9 = vsub.f32 %v4658_v6, %v4812_v0  ;;  %v4828_v10 = vsub.f32 %v4661_v7, %v4812_v0 }
  0xdd   : > { %v4836_v4 = vsub.f32 %v4670_v11, %v4812_v0  ;;  %v4842_v6 = vsub.f32 %v4675_v14, %v4812_v0  ;;  %v4850_v24 = vsub.f32 %v4680_v17, %v4812_v0  ;;  %v4857_v14 = vsub.f32 %v4685_v20, %v4812_v0 }
  0xde   : > { %v498_v13 = vmul.f32 %v4816_v2, %v4816_v2  ;;  %v499_v15 = vmul.f32 %v4820_v3, %v4820_v3  ;;  %v500_v5 = vmul.f32 %v4824_v9, %v4824_v9  ;;  %v501_v7 = vmul.f32 %v4828_v10, %v4828_v10 }
  0xdf   : > { %v502_v11 = vmul.f32 %v4836_v4, %v4836_v4  ;;  %v503_v31 = vmul.f32 %v4842_v6, %v4842_v6  ;;  %v4864_v17 = vsub.f32 %v4690_v23, %v4812_v0  ;;  %v504_v37 = vmul.f32 %v4850_v24, %v4850_v24 }
  0xe0   : > { %v530_v18 = vsel %vm8841_vm0, %v498_v13, 0.0  ;;  %v531_v19 = vsel %vm8841_vm0, %v499_v15, 0.0  ;;  %v533_v27 = vsel %vm8841_vm0, %v500_v5, 0.0  ;;  %v535_v33 = vsel %vm8841_vm0, %v501_v7, 0.0 }
  0xe1   : > { %v532_v22 = vadd.f32 %v531_v19, %v530_v18  ;;  %v537_v40 = vsel %vm8841_vm0, %v502_v11, 0.0  ;;  %v4871_v20 = vsub.f32 %v4695_v26, %v4812_v0  ;;  %v505_v45 = vmul.f32 %v4857_v14, %v4857_v14 }
  0xe2   : > { %v539_v46 = vsel %vm8841_vm0, %v503_v31, 0.0  ;;  %v4878_v23 = vsub.f32 %v4700_v29, %v4812_v0  ;;  %v506_v49 = vmul.f32 %v4864_v17, %v4864_v17  ;;  %v541_v51 = vsel %vm8841_vm0, %v504_v37, 0.0 }
  0xe3   : > { %v534_v28 = vadd.f32 %v533_v27, %v532_v22  ;;  %v4885_v26 = vsub.f32 %v4705_v32, %v4812_v0  ;;  %v507_v54 = vmul.f32 %v4871_v20, %v4871_v20  ;;  %v543_v55 = vsel %vm8841_vm0, %v505_v45, 0.0 }
  0xe4   : > { %v4892_v29 = vsub.f32 %v4710_v35, %v4812_v0  ;;  %v508_v58 = vmul.f32 %v4878_v23, %v4878_v23  ;;  %v545_v60 = vsel %vm8841_vm0, %v506_v49, 0.0  ;;  %v4899_v32 = vsub.f32 %v4715_v38, %v4812_v0 }
  0xe5   : > { %v536_v36 = vadd.f32 %v535_v33, %v534_v28  ;;  %v509_v63 = vmul.f32 %v4885_v26, %v4885_v26  ;;  %v547_v13 = vsel %vm8841_vm0, %v507_v54, 0.0  ;;  %v4906_v35 = vsub.f32 %v4720_v41, %v4812_v0 }
  0xe6   : > { %v510_v5 = vmul.f32 %v4892_v29, %v4892_v29  ;;  %v549_v7 = vsel %vm8841_vm0, %v508_v58, 0.0  ;;  %v4913_v38 = vsub.f32 %v4725_v44, %v4812_v0  ;;  %v511_v19 = vmul.f32 %v4899_v32, %v4899_v32 }
  0xe7   : > { %v538_v42 = vadd.f32 %v537_v40, %v536_v36  ;;  %v551_v22 = vsel %vm8841_vm0, %v509_v63, 0.0  ;;  %v4920_v41 = vsub.f32 %v4730_v47, %v4812_v0  ;;  %v512_v27 = vmul.f32 %v4906_v35, %v4906_v35 }
  0xe8   : > { %v553_v28 = vsel %vm8841_vm0, %v510_v5, 0.0  ;;  %v4927_v44 = vsub.f32 %v4735_v50, %v4812_v0  ;;  %v513_v33 = vmul.f32 %v4913_v38, %v4913_v38  ;;  %v555_v36 = vsel %vm8841_vm0, %v511_v19, 0.0 }
  0xe9   : > { %v540_v48 = vadd.f32 %v539_v46, %v538_v42  ;;  %v4934_v47 = vsub.f32 %v4740_v53, %v4812_v0  ;;  %v514_v40 = vmul.f32 %v4920_v41, %v4920_v41  ;;  %v557_v42 = vsel %vm8841_vm0, %v512_v27, 0.0 }
  0xea   : > { %v4941_v50 = vsub.f32 %v4745_v56, %v4812_v0  ;;  %v515_v46 = vmul.f32 %v4927_v44, %v4927_v44  ;;  %v4948_v53 = vsub.f32 %v4750_v59, %v4812_v0  ;;  %v4955_v56 = vsub.f32 %v4755_v62, %v4812_v0 }
  0xeb   : > { %v542_v52 = vadd.f32 %v541_v51, %v540_v48  ;;  %v559_v48 = vsel %vm8841_vm0, %v513_v33, 0.0  ;;  %v516_v51 = vmul.f32 %v4934_v47, %v4934_v47  ;;  %v4962_v59 = vsub.f32 %v4760_v1, %v4812_v0 }
  0xec   : > { %8917 = vst [vmem:[#allocation2_spill] sm:$0xff] %v4955_v56  ;;  %v4969_v62 = vsub.f32 %v4765_v8, %v4812_v0  ;;  %v4976_v1 = vsub.f32 %v4770_v12, %v4812_v0  ;;  %v4983_v8 = vsub.f32 %v4775_v16, %v4812_v0  ;;  %v4990_v12 = vsub.f32 %v4780_v21, %v4812_v0 }
  0xed   : > { %v544_v57 = vadd.f32 %v543_v55, %v542_v52  ;;  %v561_v52 = vsel %vm8841_vm0, %v514_v40, 0.0  ;;  %v517_v55 = vmul.f32 %v4941_v50, %v4941_v50  ;;  %8918 = vst [vmem:[#allocation3_spill] sm:$0xff] %v4962_v59  ;;  %v4997_v16 = vsub.f32 %v4785_v25, %v4812_v0 }
  0xee   : > { %8919 = vst [vmem:[#allocation4_spill] sm:$0xff] %v4969_v62  ;;  %v5004_v21 = vsub.f32 %v4790_v30, %v4812_v0  ;;  %v5011_v25 = vsub.f32 %v4795_v34, %v4812_v0  ;;  %v5018_v30 = vsub.f32 %v4800_v39, %v4812_v0  ;;  %v5025_v34 = vsub.f32 %v4805_v43, %v4812_v0 }
  0xef   : > { %v546_v61 = vadd.f32 %v545_v60, %v544_v57  ;;  %v563_v57 = vsel %vm8841_vm0, %v515_v46, 0.0  ;;  %v518_v60 = vmul.f32 %v4948_v53, %v4948_v53  ;;  %8920 = vst [vmem:[#allocation5_spill] sm:$0xff] %v4976_v1 }
  0xf0   : > { %8921 = vst [vmem:[#allocation6_spill] sm:$0xff] %v4983_v8  ;;  %v528_v39 = vmul.f32 %v5018_v30, %v5018_v30 }
  0xf1   : > { %v548_v15 = vadd.f32 %v547_v13, %v546_v61  ;;  %v565_v61 = vsel %vm8841_vm0, %v516_v51, 0.0  ;;  %v519_v13 = vmul.f32 %v4955_v56, %v4955_v56  ;;  %8922 = vst [vmem:[#allocation7_spill] sm:$0xff] %v4990_v12 }
  0xf2   : > { %8923 = vst [vmem:[#allocation8_spill] sm:$0xff] %v4997_v16  ;;  %v589_v43 = vsel %vm8841_vm0, %v528_v39, 0.0 }
  0xf3   : > { %v550_v18 = vadd.f32 %v549_v7, %v548_v15  ;;  %v567_v15 = vsel %vm8841_vm0, %v517_v55, 0.0  ;;  %v520_v7 = vmul.f32 %v4962_v59, %v4962_v59  ;;  %8924 = vst [vmem:[#allocation9_spill] sm:$0xff] %v5004_v21 }
  0xf4   : > { %8925 = vst [vmem:[#allocation10_spill] sm:$0xff] %v5011_v25 }
  0xf5   : > { %v552_v11 = vadd.f32 %v551_v22, %v550_v18  ;;  %v569_v18 = vsel %vm8841_vm0, %v518_v60, 0.0  ;;  %v521_v22 = vmul.f32 %v4969_v62, %v4969_v62  ;;  %8926 = vst [vmem:[#allocation11_spill] sm:$0xff] %v5018_v30 }
  0xf6   : > { %8927 = vst [vmem:[#allocation12_spill] sm:$0xff] %v5025_v34 }
  0xf7   : > { %v554_v31 = vadd.f32 %v553_v28, %v552_v11  ;;  %v571_v11 = vsel %vm8841_vm0, %v519_v13, 0.0  ;;  %v522_v28 = vmul.f32 %v4976_v1, %v4976_v1  ;;  %v529_v13 = vmul.f32 %v5025_v34, %v5025_v34 }
  0xf9   : > { %v556_v37 = vadd.f32 %v555_v36, %v554_v31  ;;  %v573_v31 = vsel %vm8841_vm0, %v520_v7, 0.0  ;;  %v523_v36 = vmul.f32 %v4983_v8, %v4983_v8  ;;  %v591_v7 = vsel %vm8841_vm0, %v529_v13, 0.0 }
  0xfb   : > { %v558_v45 = vadd.f32 %v557_v42, %v556_v37  ;;  %v575_v37 = vsel %vm8841_vm0, %v521_v22, 0.0  ;;  %v524_v42 = vmul.f32 %v4990_v12, %v4990_v12 }
  0xfd   : > { %v560_v49 = vadd.f32 %v559_v48, %v558_v45  ;;  %v577_v45 = vsel %vm8841_vm0, %v522_v28, 0.0  ;;  %v525_v48 = vmul.f32 %v4997_v16, %v4997_v16 }
  0xff   : > { %v562_v54 = vadd.f32 %v561_v52, %v560_v49  ;;  %v579_v49 = vsel %vm8841_vm0, %v523_v36, 0.0  ;;  %v526_v52 = vmul.f32 %v5004_v21, %v5004_v21 }
 0x101   : > { %v564_v58 = vadd.f32 %v563_v57, %v562_v54  ;;  %v581_v54 = vsel %vm8841_vm0, %v524_v42, 0.0  ;;  %v527_v57 = vmul.f32 %v5011_v25, %v5011_v25 }
 0x103   : > { %v566_v63 = vadd.f32 %v565_v61, %v564_v58  ;;  %v583_v58 = vsel %vm8841_vm0, %v525_v48, 0.0  ;;  %v585_v61 = vsel %vm8841_vm0, %v526_v52, 0.0  ;;  %v5044_v52 = vld [vmem:[%s8823_s1] ss:$0 sm:$0xff] }
 0x105   : > { %v568_v5 = vadd.f32 %v567_v15, %v566_v63  ;;  %v587_v15 = vsel %vm8841_vm0, %v527_v57, 0.0  ;;  %v5053_v57 = vld [vmem:[%s8824_s2] ss:$0 sm:$0xff] }
 0x107   : > { %v570_v19 = vadd.f32 %v569_v18, %v568_v5 }
 0x109   : > { %v572_v27 = vadd.f32 %v571_v11, %v570_v19 }
 0x10b   : > { %v574_v33 = vadd.f32 %v573_v31, %v572_v27 }
 0x10d   : > { %v576_v40 = vadd.f32 %v575_v37, %v574_v33 }
 0x10f   : > { %v578_v46 = vadd.f32 %v577_v45, %v576_v40 }
 0x111   : > { %v580_v51 = vadd.f32 %v579_v49, %v578_v46 }
 0x113   : > { %v582_v55 = vadd.f32 %v581_v54, %v580_v51 }
 0x115   : > { %v584_v60 = vadd.f32 %v583_v58, %v582_v55 }
 0x117   : > { %v586_v63 = vadd.f32 %v585_v61, %v584_v60 }
 0x119   : > { %v588_v5 = vadd.f32 %v587_v15, %v586_v63 }
 0x11b   : > { %v590_v0 = vadd.f32 %v589_v43, %v588_v5 }
 0x11d   : > { %v592_v18 = vadd.f32 %v591_v7, %v590_v0 }
 0x11f   : > { %v593_v19 = vrot.slane %v592_v18, 4 }
 0x121   : > { %v594_v22 = vadd.f32 %v593_v19, %v592_v18 }
 0x123   : > { %v595_v11 = vrot.slane %v594_v22, 2 }
 0x125   : > { %v596_v27 = vadd.f32 %v595_v11, %v594_v22 }
 0x127   : > { %v597_v28 = vrot.slane %v596_v27, 1 }
 0x129   : > { %v598_v31 = vadd.f32 %v597_v28, %v596_v27 }
 0x12b   : > { %3765 = vmatmul.msk.f32.vlgmr.msrb.gmra.mxu1 %vm8841_vm0, %v598_v31 }
 0x1a8   : > { %v619_v33 = vpop.f32.mrf.mxu1 }
 0x1a9   : > { %v620_v36 = vadd.f32 1e-06, %v619_v33 }
 0x1ab   : > { %4297 = vrsqrt.f32 %v620_v36  ;;  %vm628_vm2 = vweird.f32 %v620_v36 }
 0x1b1   : > { %v4298_v37 = vpop.eup %4297 }
 0x1b2   : > { %v623_v40 = vmul.f32 %v4298_v37, %v620_v36  ;;  %vm629_vm1 = vweird.f32 %v4298_v37 }
 0x1b3   : > { %vm630_vm3 = vmor %vm628_vm2, %vm629_vm1 }
 0x1b4   : > { %v624_v42 = vmul.f32 %v4298_v37, %v623_v40 }
 0x1b6   : > { %v625_v45 = vmul.f32 0.5, %v624_v42 }
 0x1b8   : > { %v626_v46 = vsub.f32 1.5, %v625_v45 }
 0x1ba   : > { %v627_v48 = vmul.f32 %v4298_v37, %v626_v46 }
 0x1bc   : > { %v631_v49 = vsel %vm630_vm3, %v4298_v37, %v627_v48 }
 0x1bd   : > { %v5039_v51 = vperm.slane %v631_v49, 0 }
 0x1bf   : > { %v641_v54 = vmul.f32 %v5039_v51, %v4864_v17  ;;  %v642_v55 = vmul.f32 %v5039_v51, %v4871_v20  ;;  %v639_v58 = vmul.f32 %v5039_v51, %v4850_v24  ;;  %v640_v60 = vmul.f32 %v5039_v51, %v4857_v14 }
 0x1c0   : > { %v635_v39 = vmul.f32 %v5039_v51, %v4824_v9  ;;  %v636_v17 = vmul.f32 %v5039_v51, %v4828_v10  ;;  %v637_v20 = vmul.f32 %v5039_v51, %v4836_v4  ;;  %v638_v9 = vmul.f32 %v5039_v51, %v4842_v6 }
 0x1c1   : > { %v676_v61 = vmul.f32 %v5044_v52, %v641_v54  ;;  %v677_v63 = vmul.f32 %v5044_v52, %v642_v55  ;;  %v674_v13 = vmul.f32 %v5044_v52, %v639_v58  ;;  %v675_v24 = vmul.f32 %v5044_v52, %v640_v60 }
 0x1c2   : > { %v670_v15 = vmul.f32 %v5044_v52, %v635_v39  ;;  %v671_v14 = vmul.f32 %v5044_v52, %v636_v17  ;;  %v672_v10 = vmul.f32 %v5044_v52, %v637_v20  ;;  %v643_v11 = vmul.f32 %v5039_v51, %v4878_v23 }
 0x1c3   : > { %v5075_v5 = vadd.f32 %v5053_v57, %v676_v61  ;;  %v5078_v4 = vadd.f32 %v5053_v57, %v677_v63  ;;  %v5081_v43 = vadd.f32 %v5053_v57, %v674_v13  ;;  %v5084_v0 = vadd.f32 %v5053_v57, %v675_v24 }
 0x1c4   : > { %v5087_v7 = vadd.f32 %v5053_v57, %v670_v15  ;;  %v5090_v18 = vadd.f32 %v5053_v57, %v671_v14  ;;  %v673_v28 = vmul.f32 %v5044_v52, %v638_v9  ;;  %v5101_v33 = vadd.f32 %v5053_v57, %v672_v10 }
 0x1c5   : > { %v3774_v6 = vmul.f32 -1.442695, %v5075_v5  ;;  %v3775_v19 = vmul.f32 -1.442695, %v5078_v4  ;;  %v3772_v22 = vmul.f32 -1.442695, %v5081_v43  ;;  %v678_v36 = vmul.f32 %v5044_v52, %v643_v11 }
 0x1c6   : > { %v3773_v27 = vmul.f32 -1.442695, %v5084_v0  ;;  %v3768_v31 = vmul.f32 -1.442695, %v5087_v7  ;;  %v3769_v37 = vmul.f32 -1.442695, %v5090_v18  ;;  %v644_v40 = vmul.f32 %v5039_v51, %v4885_v26 }
 0x1c7   : > { %4299 = vpow2.f32 %v3774_v6  ;;  %v5108_v23 = vadd.f32 %v5053_v57, %v673_v28  ;;  %v3770_v42 = vmul.f32 -1.442695, %v5101_v33  ;;  %v5112_v45 = vadd.f32 %v5053_v57, %v678_v36 }
 0x1c8   : > { %4301 = vpow2.f32 %v3775_v19  ;;  %v679_v46 = vmul.f32 %v5044_v52, %v644_v40  ;;  %v645_v49 = vmul.f32 %v5039_v51, %v4892_v29  ;;  %v646_v58 = vmul.f32 %v5039_v51, %v4899_v32 }
 0x1c9   : > { %4303 = vpow2.f32 %v3772_v22  ;;  %v3771_v55 = vmul.f32 -1.442695, %v5108_v23  ;;  %v3776_v17 = vmul.f32 -1.442695, %v5112_v45 }
 0x1ca   : > { %4305 = vpow2.f32 %v3773_v27  ;;  %v5127_v61 = vadd.f32 %v5053_v57, %v679_v46  ;;  %v680_v63 = vmul.f32 %v5044_v52, %v645_v49  ;;  %v5136_v15 = vmul.f32 %v5044_v52, %v646_v58 }
 0x1cb   : > { %4307 = vpow2.f32 %v3768_v31 }
 0x1cc   : > { %4309 = vpow2.f32 %v3769_v37  ;;  %v5146_v22 = vmul.f32 -1.442695, %v5127_v61  ;;  %v5153_v28 = vadd.f32 %v5053_v57, %v680_v63 }
 0x1cd   : > { %v4300_v48 = vpop.eup %4299  ;;  %4311 = vpow2.f32 %v3770_v42 }
 0x1ce   : > { %v4302_v54 = vpop.eup %4301  ;;  %v5117_v26 = vadd.f32 1.0, %v4300_v48 }
 0x1cf   : > { %v4304_v60 = vpop.eup %4303  ;;  %v5122_v39 = vadd.f32 1.0, %v4302_v54 }
 0x1d0   : > { %v4306_v20 = vpop.eup %4305  ;;  %4313 = vrcp.f32 %v5117_v26  ;;  %v5131_v24 = vadd.f32 1.0, %v4304_v60  ;;  %v992_v14 = vand.u32 2147483647, %v5117_v26  ;;  %v994_v9 = vand.u32 2147483648, %v5117_v26 }
 0x1d1   : > { %v4308_v29 = vpop.eup %4307  ;;  %4315 = vrcp.f32 %v5122_v39  ;;  %v5133_v32 = vadd.f32 1.0, %v4306_v20  ;;  %v1007_v6 = vand.u32 2147483647, %v5122_v39  ;;  %v1009_v19 = vand.u32 2147483648, %v5122_v39 }
 0x1d2   : > { %v4310_v13 = vpop.eup %4309  ;;  %4317 = vpow2.f32 %v3771_v55  ;;  %v5140_v10 = vadd.f32 1.0, %v4308_v29  ;;  %vm988_vm4 = vweird.f32 %v5117_v26  ;;  %vm1003_vm5 = vweird.f32 %v5122_v39 }
 0x1d3   : > { %4319 = vpow2.f32 %v3776_v17  ;;  %v4312_v11 = vpop.eup %4311  ;;  %v5150_v27 = vadd.f32 1.0, %v4310_v13  ;;  %v964_v36 = vand.u32 2147483648, %v5131_v24  ;;  %v979_v37 = vand.u32 2147483648, %v5133_v32 }
 0x1d4   : > { %4321 = vrcp.f32 %v5131_v24  ;;  %vm5160_vm6 = vcmp.eq.f32.partialorder %v992_v14, 8.507059e+37  ;;  %v995_v48 = vor.u32 1.1754944e-38, %v994_v9  ;;  %v962_v49 = vand.u32 2147483647, %v5131_v24 }
 0x1d5   : > { %4323 = vrcp.f32 %v5133_v32  ;;  %vm5166_vm7 = vcmp.eq.f32.partialorder %v1007_v6, 8.507059e+37  ;;  %v1010_v60 = vor.u32 1.1754944e-38, %v1009_v19  ;;  %v977_v17 = vand.u32 2147483647, %v5133_v32 }
 0x1d6   : > { %v4314_v31 = vpop.eup %4313  ;;  %4325 = vrcp.f32 %v5140_v10  ;;  %v904_v20 = vand.u32 2147483648, %v5140_v10  ;;  %vm958_vm8 = vweird.f32 %v5131_v24  ;;  %v902_v13 = vand.u32 2147483647, %v5140_v10 }
 0x1d7   : > { %v4316_v40 = vpop.eup %4315  ;;  %v984_v42 = vmul.f32 %v4314_v31, %v5117_v26  ;;  %4327 = vrcp.f32 %v5150_v27  ;;  %vm989_vm9 = vweird.f32 %v4314_v31  ;;  %v965_v6 = vor.u32 1.1754944e-38, %v964_v36 }
 0x1d8   : > { %v4318_v54 = vpop.eup %4317  ;;  %v999_v55 = vmul.f32 %v4316_v40, %v5122_v39  ;;  %vm973_vm10 = vweird.f32 %v5133_v32  ;;  %v980_v19 = vor.u32 1.1754944e-38, %v979_v37  ;;  %vm1004_vm11 = vweird.f32 %v4316_v40  ;;  %vm990_vm2 = vmor %vm988_vm4, %vm989_vm9 }
 0x1d9   : > { %v5172_v29 = vpop.eup %4319  ;;  %v985_v63 = vsub.f32 1.0, %v984_v42  ;;  %vm5179_vm12 = vcmp.eq.f32.partialorder %v962_v49, 8.507059e+37  ;;  %vm5186_vm14 = vcmp.eq.f32.partialorder %v977_v17, 8.507059e+37  ;;  %v905_v37 = vor.u32 1.1754944e-38, %v904_v20  ;;  %vm1005_vm13 = vmor %vm1003_vm5, %vm1004_vm11 }
 0x1da   : > { %v4322_v14 = vpop.eup %4321  ;;  %v1000_v9 = vsub.f32 1.0, %v999_v55  ;;  %vm5192_vm1 = vcmp.eq.f32.partialorder %v902_v13, 8.507059e+37  ;;  %v5202_v13 = vadd.f32 1.0, %v4312_v11  ;;  %4329 = vpow2.f32 %v5146_v22 }
 0x1db   : > { %v4324_v34 = vpop.eup %4323  ;;  %v986_v30 = vmul.f32 %v4314_v31, %v985_v63  ;;  %v954_v25 = vmul.f32 %v4322_v14, %v5131_v24  ;;  %v919_v63 = vand.u32 2147483648, %v5150_v27  ;;  %vm959_vm15 = vweird.f32 %v4322_v14 }
 0x1dc   : > { %v4326_v16 = vpop.eup %4325  ;;  %v1001_v12 = vmul.f32 %v4316_v40, %v1000_v9  ;;  %v969_v36 = vmul.f32 %v4324_v34, %v5133_v32  ;;  %vm974_vm3 = vweird.f32 %v4324_v34  ;;  %vm960_vm4 = vmor %vm958_vm8, %vm959_vm15  ;;  %4331 = vrcp.f32 %v5202_v13 }
 0x1dd   : > { %v987_v8 = vadd.f32 %v4314_v31, %v986_v30  ;;  %v955_v49 = vsub.f32 1.0, %v954_v25  ;;  %v894_v1 = vmul.f32 %v4326_v16, %v5140_v10  ;;  %vm899_vm0 = vweird.f32 %v4326_v16  ;;  %v4328_v20 = vpop.eup %4327  ;;  %vm975_vm5 = vmor %vm973_vm10, %vm974_vm3 }
 0x1de   : > { %v1002_v17 = vadd.f32 %v4316_v40, %v1001_v12  ;;  %v970_v9 = vsub.f32 1.0, %v969_v36  ;;  %v909_v12 = vmul.f32 %v4328_v20, %v5150_v27  ;;  %vm914_vm8 = vweird.f32 %v4328_v20 }
 0x1df   : > { %v991_v21 = vsel %vm990_vm2, %v4314_v31, %v987_v8  ;;  %v956_v25 = vmul.f32 %v4322_v14, %v955_v49  ;;  %v895_v30 = vsub.f32 1.0, %v894_v1  ;;  %vm1504_vm9 = vcmask 1046528  }
 0x1e0   : > { %v996_v59 = vsel %vm5160_vm6, %v995_v48, %v991_v21  ;;  %v1006_v56 = vsel %vm1005_vm13, %v4316_v40, %v1002_v17  ;;  %v971_v26 = vmul.f32 %v4324_v34, %v970_v9  ;;  %v910_v21 = vsub.f32 1.0, %v909_v12 }
 0x1e1   : > { %v1011_v36 = vsel %vm5166_vm7, %v1010_v60, %v1006_v56  ;;  %v5210_v8 = vmul.f32 %v996_v59, %v5075_v5  ;;  %v957_v31 = vadd.f32 %v4322_v14, %v956_v25  ;;  %v896_v39 = vmul.f32 %v4326_v16, %v895_v30 }
 0x1e2   : > { %v5213_v49 = vmul.f32 %v1011_v36, %v5078_v4  ;;  %v972_v1 = vadd.f32 %v4324_v34, %v971_v26  ;;  %v5222_v59 = vadd.f32 1.0, %v4318_v54  ;;  %vm8938_vm6 = vweird.f32 %v5140_v10 }
 0x1e3   : > { %v961_v11 = vsel %vm960_vm4, %v4322_v14, %v957_v31  ;;  %v897_v56 = vadd.f32 %v4326_v16, %v896_v39  ;;  %vm900_vm7 = vmor %vm8938_vm6, %vm899_vm0  ;;  %v911_v46 = vmul.f32 %v4328_v20, %v910_v21  ;;  %v5245_v10 = vadd.f32 %v5053_v57, %v5136_v15 }
 0x1e4   : > { %v3992_v5 = vpack.i.bf16 %v5213_v49, %v5210_v8  ;;  %v966_v4 = vsel %vm5179_vm12, %v965_v6, %v961_v11  ;;  %v976_v24 = vsel %vm975_vm5, %v4324_v34, %v972_v1  ;;  %v5248_v54 = vmul.f32 -1.442695, %v5153_v28 }
 0x1e5   : > { %v981_v32 = vsel %vm5186_vm14, %v980_v19, %v976_v24  ;;  %v5235_v22 = vmul.f32 %v966_v4, %v5081_v43  ;;  %v901_v40 = vsel %vm900_vm7, %v4326_v16, %v897_v56  ;;  %v912_v43 = vadd.f32 %v4328_v20, %v911_v46  ;;  %v4330_v16 = vpop.eup %4329 }
 0x1e6   : > { %3993 = vrot.lane.b32.xlu2 %v3992_v5, %s4567_s27  ;;  %v5239_v48 = vmul.f32 %v981_v32, %v5084_v0  ;;  %v906_v34 = vsel %vm5192_vm1, %v905_v37, %v901_v40  ;;  %vm913_vm0 = vweird.f32 %v5150_v27  ;;  %4333 = vrcp.f32 %v5222_v59  ;;  %v4332_v60 = vpop.eup %4331 }
 0x1e7   : > { %vm915_vm10 = vmor %vm913_vm0, %vm914_vm8  ;;  %v920_v62 = vor.u32 1.1754944e-38, %v919_v63  ;;  %v1514_v58 = vrot.slane %v5235_v22, 1  ;;  %v8939_v6 = vand.u32 2147483647, %v5150_v27  ;;  %v5260_v19 = vmul.f32 %v906_v34, %v5087_v7 }
 0x1e8   : > { %v3987_v0 = vpack.i.bf16 %v5239_v48, %v5235_v22  ;;  %v1515_v15 = vrot.slane %v5239_v48, 1  ;;  %v916_v14 = vsel %vm915_vm10, %v4328_v20, %v912_v43  ;;  %vm928_vm12 = vweird.f32 %v5202_v13 }
 0x1e9   : > { %vm918_vm11 = vcmp.eq.f32.partialorder %v8939_v6, 8.507059e+37  ;;  %v1421_v42 = vrot.slane %v5213_v49, 7  ;;  %v924_v37 = vmul.f32 %v4332_v60, %v5202_v13  ;;  %v932_v63 = vand.u32 2147483647, %v5202_v13 }
 0x1ea   : > { %3988 = vrot.lane.b32.xlu1 %v3987_v0, %s4567_s27  ;;  %v921_v55 = vsel %vm918_vm11, %v920_v62, %v916_v14  ;;  %v1418_v17 = vrot.slane %v5239_v48, 7  ;;  %v934_v27 = vand.u32 2147483648, %v5202_v13  ;;  %v947_v7 = vand.u32 2147483647, %v5222_v59 }
 0x1eb   : > { %v5269_v9 = vmul.f32 %v921_v55, %v5090_v18  ;;  %v1516_v20 = vsel %vm1504_vm9, %v1514_v58, %v1515_v15  ;;  %v1572_v25 = vsel %vm1504_vm9, %v1515_v15, 0.0  ;;  %v925_v30 = vsub.f32 1.0, %v924_v37 }
 0x1ec   : > { %v5276_v26 = vadd.f32 1.0, %v5172_v29  ;;  %v4334_v12 = vpop.eup %4333  ;;  %v1508_v31 = vrot.slane %v5260_v19, 1  ;;  %v5282_v39 = vadd.f32 1.0, %v4330_v16  ;;  %vm929_vm13 = vweird.f32 %v4332_v60 }
 0x1ed   : > { %v3977_v36 = vpack.i.bf16 %v5269_v9, %v5260_v19  ;;  %v1509_v18 = vrot.slane %v5269_v9, 1  ;;  %v926_v1 = vmul.f32 %v4332_v60, %v925_v30  ;;  %vm5284_vm14 = vcmp.eq.f32.partialorder %v932_v63, 8.507059e+37  ;;  %vm930_vm2 = vmor %vm928_vm12, %vm929_vm13 }
 0x1ee   : > { %v939_v11 = vmul.f32 %v4334_v12, %v5222_v59  ;;  %v935_v29 = vor.u32 1.1754944e-38, %v934_v27  ;;  %vm943_vm15 = vweird.f32 %v5222_v59  ;;  %v949_v56 = vand.u32 2147483648, %v5222_v59 }
 0x1ef   : > { %3978 = vrot.lane.b32.xlu0 %v3977_v36, %s4567_s27  ;;  %4335 = vrcp.f32 %v5276_v26  ;;  %v4002_v5 = vpack.i.bf16 %v1572_v25, %v1516_v20  ;;  %v927_v4 = vadd.f32 %v4332_v60, %v926_v1  ;;  %vm5293_vm1 = vcmp.eq.f32.partialorder %v947_v7, 8.507059e+37 }
 0x1f0   : > { %v940_v24 = vsub.f32 1.0, %v939_v11  ;;  %vm944_vm3 = vweird.f32 %v4334_v12  ;;  %v1510_v40 = vsel %vm1504_vm9, %v1508_v31, %v1509_v18  ;;  %v1570_v46 = vsel %vm1504_vm9, %v1509_v18, 0.0 }
 0x1f1   : > { %4337 = vrcp.f32 %v5282_v39  ;;  %v931_v34 = vsel %vm930_vm2, %v4332_v60, %v927_v4  ;;  %v1022_v16 = vand.u32 2147483647, %v5276_v26  ;;  %v1024_v0 = vand.u32 2147483648, %v5276_v26  ;;  %vm945_vm5 = vmor %vm943_vm15, %vm944_vm3 }
 0x1f2   : > { %4003 = vrot.lane.b32.xlu1 %v4002_v5, %s4568_s28  ;;  %v941_v43 = vmul.f32 %v4334_v12, %v940_v24  ;;  %v1412_v62 = vrot.slane %v5269_v9, 7  ;;  %v936_v13 = vsel %vm5284_vm14, %v935_v29, %v931_v34  ;;  %v950_v58 = vor.u32 1.1754944e-38, %v949_v56 }
 0x1f3   : > { %v1517_v15 = vrot.slane %v5210_v8, 1  ;;  %v5310_v6 = vmul.f32 %v936_v13, %v5101_v33  ;;  %v3982_v55 = vpack.i.bf16 %v1570_v46, %v1510_v40  ;;  %vm1018_vm4 = vweird.f32 %v5276_v26 }
 0x1f4   : > { %v942_v14 = vadd.f32 %v4334_v12, %v941_v43  ;;  %v1518_v60 = vrot.slane %v5213_v49, 1  ;;  %v1037_v63 = vand.u32 2147483647, %v5282_v39  ;;  %v1039_v27 = vand.u32 2147483648, %v5282_v39 }
 0x1f5   : > { %v4336_v37 = vpop.eup %4335  ;;  %4339 = vpow2.f32 %v5248_v54  ;;  %v3779_v7 = vmul.f32 -1.442695, %v5245_v10  ;;  %vm5322_vm6 = vcmp.eq.f32.partialorder %v1022_v16, 8.507059e+37  ;;  %v1025_v30 = vor.u32 1.1754944e-38, %v1024_v0 }
 0x1f6   : > { %v946_v33 = vsel %vm945_vm5, %v4334_v12, %v942_v14  ;;  %v1014_v20 = vmul.f32 %v4336_v37, %v5276_v26  ;;  %vm1033_vm7 = vweird.f32 %v5282_v39  ;;  %v1420_v59 = vrot.slane %v5210_v8, 7 }
 0x1f7   : > { %v4338_v36 = vpop.eup %4337  ;;  %v951_v31 = vsel %vm5293_vm1, %v950_v58, %v946_v33  ;;  %3983 = vrot.lane.b32.xlu0 %v3982_v55, %s4568_s28  ;;  %v1511_v54 = vrot.slane %v5310_v6, 1  ;;  %v1519_v12 = vsel %vm1504_vm9, %v1517_v15, %v1518_v60  ;;  %4341 = vpow2.f32 %v3779_v7 }
 0x1f8   : > { %v1348_v18 = vmul.f32 %v951_v31, %v5108_v23  ;;  %v1015_v1 = vsub.f32 1.0, %v1014_v20  ;;  %v1029_v21 = vmul.f32 %v4338_v36, %v5282_v39  ;;  %v1573_v11 = vsel %vm1504_vm9, %v1518_v60, 0.0 }
 0x1f9   : > { %vm1019_vm8 = vweird.f32 %v4336_v37  ;;  %vm1407_vm0 = vcmask 1040384   ;;  %v1414_v29 = vrot.slane %v5310_v6, 7  ;;  %v1417_v56 = vrot.slane %v5235_v22, 7 }
 0x1fa   : > { %v3997_v5 = vpack.i.bf16 %v1348_v18, %v5310_v6  ;;  %v1016_v4 = vmul.f32 %v4336_v37, %v1015_v1  ;;  %v1030_v24 = vsub.f32 1.0, %v1029_v21  ;;  %v1512_v32 = vrot.slane %v1348_v18, 1  ;;  %vm1020_vm11 = vmor %vm1018_vm4, %vm1019_vm8 }
 0x1fb   : > { %v4340_v40 = vpop.eup %4339  ;;  %vm1034_vm10 = vweird.f32 %v4338_v36  ;;  %v4007_v46 = vpack.i.bf16 %v1573_v11, %v1519_v12  ;;  %v5344_v23 = vsel %vm1407_vm0, %v1420_v59, %v1421_v42  ;;  %v1415_v34 = vrot.slane %v1348_v18, 7 }
 0x1fc   : > { %3998 = vrot.lane.b32.xlu2 %v3997_v5, %s4567_s27  ;;  %v1017_v43 = vadd.f32 %v4336_v37, %v1016_v4  ;;  %v1031_v16 = vmul.f32 %v4338_v36, %v1030_v24  ;;  %v1513_v0 = vsel %vm1504_vm9, %v1511_v54, %v1512_v32  ;;  %v1571_v13 = vsel %vm1504_vm9, %v1512_v32, 0.0  ;;  %vm1035_vm13 = vmor %vm1033_vm7, %vm1034_vm10 }
 0x1fd   : > { %v4342_v58 = vpop.eup %4341  ;;  %v4012_v49 = vpack.i.bf16 %v1571_v13, %v1513_v0  ;;  %v5352_v15 = vadd.f32 1.0, %v4340_v40  ;;  %v5357_v42 = vsel %vm1407_vm0, %v1414_v29, %v1415_v34  ;;  %v5364_v14 = vsel %vm1407_vm0, %v1417_v56, %v1418_v17 }
 0x1fe   : > { %v1021_v55 = vsel %vm1020_vm11, %v4336_v37, %v1017_v43  ;;  %v1032_v60 = vadd.f32 %v4338_v36, %v1031_v16  ;;  %vm1038_vm12 = vcmp.eq.f32.partialorder %v1037_v63, 8.507059e+37  ;;  %v5366_v26 = vadd.f32 1.0, %v4342_v58 }
 0x1ff   : > { %v1026_v7 = vsel %vm5322_vm6, %v1025_v30, %v1021_v55  ;;  %v1040_v33 = vor.u32 1.1754944e-38, %v1039_v27  ;;  %4013 = vrot.lane.b32.xlu1 %v4012_v49, %s4568_s28  ;;  %4008 = vrot.lane.b32.xlu0 %v4007_v46, %s4568_s28  ;;  %4343 = vrcp.f32 %v5352_v15  ;;  %v1411_v48 = vrot.slane %v5260_v19, 7 }
 0x200   : > { %v1036_v17 = vsel %vm1035_vm13, %v4338_v36, %v1032_v60  ;;  %v5378_v37 = vmul.f32 %v1026_v7, %v5112_v45  ;;  %v1054_v63 = vand.u32 2147483648, %v5352_v15  ;;  %4345 = vrcp.f32 %v5366_v26 }
 0x201   : > { %v1041_v20 = vsel %vm1038_vm12, %v1040_v33, %v1036_v17  ;;  %v1052_v27 = vand.u32 2147483647, %v5352_v15  ;;  %v1067_v30 = vand.u32 2147483647, %v5366_v26  ;;  %v5392_v45 = vsel %vm1407_vm0, %v1411_v48, %v1412_v62 }
 0x202   : > { %v1354_v39 = vmul.f32 %v1041_v20, %v5127_v61  ;;  %v1520_v25 = vrot.slane %v5378_v37, 1  ;;  %v8845_v31 = vrot.slane %v5378_v37, 7  ;;  %vm1048_vm14 = vweird.f32 %v5352_v15 }
 0x203   : > { %v1055_v61 = vor.u32 1.1754944e-38, %v1054_v63  ;;  %vm1063_vm15 = vweird.f32 %v5366_v26  ;;  %v1069_v1 = vand.u32 2147483648, %v5366_v26  ;;  %v647_v9 = vmul.f32 %v5039_v51, %v4906_v35 }
 0x204   : > { %v4017_v36 = vpack.i.bf16 %v1354_v39, %v5378_v37  ;;  %v1521_v54 = vrot.slane %v1354_v39, 1  ;;  %v1424_v12 = vrot.slane %v1354_v39, 7  ;;  %v648_v21 = vmul.f32 %v5039_v51, %v4913_v38 }
 0x205   : > { %v4344_v18 = vpop.eup %4343  ;;  %v649_v62 = vmul.f32 %v5039_v51, %v4920_v41  ;;  %vm5406_vm2 = vcmp.eq.f32.partialorder %v1052_v27, 8.507059e+37  ;;  %vm5413_vm4 = vcmp.eq.f32.partialorder %v1067_v30, 8.507059e+37  ;;  %v682_v34 = vmul.f32 %v5044_v52, %v647_v9 }
 0x206   : > { %v4346_v11 = vpop.eup %4345  ;;  %4018 = vrot.lane.b32.xlu2 %v4017_v36, %s4567_s27  ;;  %v1044_v5 = vmul.f32 %v4344_v18, %v5352_v15  ;;  %vm1049_vm1 = vweird.f32 %v4344_v18  ;;  %v1522_v24 = vsel %vm1504_vm9, %v1520_v25, %v1521_v54  ;;  %v1574_v35 = vsel %vm1504_vm9, %v1521_v54, 0.0 }
 0x207   : > { %v1059_v32 = vmul.f32 %v4346_v11, %v5366_v26  ;;  %vm1064_vm3 = vweird.f32 %v4346_v11  ;;  %v4022_v41 = vpack.i.bf16 %v1574_v35, %v1522_v24  ;;  %v5420_v40 = vsel %vm1407_vm0, %v8845_v31, %v1424_v12  ;;  %vm1050_vm5 = vmor %vm1048_vm14, %vm1049_vm1 }
 0x208   : > { %v1045_v46 = vsub.f32 1.0, %v1044_v5  ;;  %v683_v43 = vmul.f32 %v5044_v52, %v648_v21  ;;  %v650_v16 = vmul.f32 %v5039_v51, %v4927_v44  ;;  %v684_v13 = vmul.f32 %v5044_v52, %v649_v62  ;;  %vm1065_vm6 = vmor %vm1063_vm15, %vm1064_vm3 }
 0x209   : > { %v1060_v0 = vsub.f32 1.0, %v1059_v32  ;;  %4023 = vrot.lane.b32.xlu0 %v4022_v41, %s4568_s28  ;;  %v633_v58 = vmul.f32 %v5039_v51, %v4816_v2  ;;  %v634_v49 = vmul.f32 %v5039_v51, %v4820_v3  ;;  %v5433_v60 = vadd.f32 %v5053_v57, %v682_v34 }
 0x20a   : > { %v1046_v55 = vmul.f32 %v4344_v18, %v1045_v46  ;;  %v5436_v7 = vadd.f32 %v5053_v57, %v683_v43  ;;  %v685_v44 = vmul.f32 %v5044_v52, %v650_v16  ;;  %v5440_v17 = vadd.f32 %v5053_v57, %v684_v13 }
 0x20b   : > { %v1061_v33 = vmul.f32 %v4346_v11, %v1060_v0  ;;  %v668_v63 = vmul.f32 %v5044_v52, %v633_v58  ;;  %v669_v2 = vmul.f32 %v5044_v52, %v634_v49  ;;  %v3780_v3 = vmul.f32 -1.442695, %v5433_v60 }
 0x20c   : > { %v1047_v20 = vadd.f32 %v4344_v18, %v1046_v55  ;;  %v3781_v39 = vmul.f32 -1.442695, %v5436_v7  ;;  %v5447_v27 = vadd.f32 %v5053_v57, %v685_v44  ;;  %v3782_v30 = vmul.f32 -1.442695, %v5440_v17 }
 0x20d   : > { %v1062_v25 = vadd.f32 %v4346_v11, %v1061_v33  ;;  %v5454_v36 = vadd.f32 %v5053_v57, %v668_v63  ;;  %v5457_v54 = vadd.f32 %v5053_v57, %v669_v2  ;;  %v1070_v9 = vor.u32 1.1754944e-38, %v1069_v1 }
 0x20e   : > { %v1051_v12 = vsel %vm1050_vm5, %v4344_v18, %v1047_v20  ;;  %4347 = vpow2.f32 %v3780_v3  ;;  %v3783_v21 = vmul.f32 -1.442695, %v5447_v27  ;;  %v652_v33 = vmul.f32 %v5039_v51, %v4941_v50 }
 0x20f   : > { %v1056_v15 = vsel %vm5406_vm2, %v1055_v61, %v1051_v12  ;;  %v1066_v62 = vsel %vm1065_vm6, %v4346_v11, %v1062_v25  ;;  %4349 = vpow2.f32 %v3781_v39  ;;  %v3766_v5 = vmul.f32 -1.442695, %v5454_v36 }
 0x210   : > { %v1071_v24 = vsel %vm5413_vm4, %v1070_v9, %v1066_v62  ;;  %v5469_v18 = vmul.f32 %v1056_v15, %v5153_v28  ;;  %4351 = vpow2.f32 %v3782_v30  ;;  %v3767_v26 = vmul.f32 -1.442695, %v5457_v54 }
 0x211   : > { %v1356_v1 = vmul.f32 %v1071_v24, %v5245_v10  ;;  %4353 = vpow2.f32 %v3783_v21  ;;  %v651_v28 = vmul.f32 %v5039_v51, %v4934_v47  ;;  %v687_v39 = vmul.f32 %v5044_v52, %v652_v33 }
 0x212   : > { %8950 = vst [vmem:[#allocation13_spill] sm:$0xff] %v5469_v18  ;;  %v1523_v35 = vrot.slane %v5469_v18, 1  ;;  %v8844_v61 = vrot.slane %v5469_v18, 7  ;;  %4355 = vpow2.f32 %v3766_v5  ;;  %v5524_v62 = vmul.f32 %v5039_v51, %v4948_v53  ;;  %v8952_v5 = vld [vmem:[#allocation2_spill] sm:$0xff] }
 0x213   : > { %v4032_v11 = vpack.i.bf16 %v1356_v1, %v5469_v18  ;;  %v1524_v4 = vrot.slane %v1356_v1, 1  ;;  %v1427_v32 = vrot.slane %v1356_v1, 7  ;;  %4357 = vpow2.f32 %v3767_v26 }
 0x214   : > { %v4348_v38 = vpop.eup %4347  ;;  %v686_v63 = vmul.f32 %v5044_v52, %v651_v28  ;;  %v5528_v24 = vmul.f32 %v5039_v51, %v8952_v5 }
 0x215   : > { %v4350_v41 = vpop.eup %4349  ;;  %4033 = vrot.lane.b32.xlu2 %v4032_v11, %s4567_s27  ;;  %v1525_v10 = vsel %vm1504_vm9, %v1523_v35, %v1524_v4  ;;  %v1575_v46 = vsel %vm1504_vm9, %v1524_v4, 0.0  ;;  %v5484_v34 = vsel %vm1407_vm0, %v8844_v61, %v1427_v32  ;;  %v5486_v43 = vadd.f32 1.0, %v4348_v38 }
 0x216   : > { %8951 = vst [vmem:[#allocation14_spill] sm:$0xff] %v5484_v34  ;;  %v4352_v16 = vpop.eup %4351  ;;  %v4037_v0 = vpack.i.bf16 %v1575_v46, %v1525_v10  ;;  %v5488_v13 = vadd.f32 1.0, %v4350_v41  ;;  %v5511_v25 = vadd.f32 %v5053_v57, %v686_v63  ;;  %v5534_v35 = vadd.f32 %v5053_v57, %v687_v39 }
 0x217   : > { %v4354_v58 = vpop.eup %4353  ;;  %4359 = vrcp.f32 %v5486_v43  ;;  %v5493_v55 = vadd.f32 1.0, %v4352_v16  ;;  %v1084_v12 = vand.u32 2147483648, %v5486_v43  ;;  %vm1078_vm7 = vweird.f32 %v5486_v43 }
 0x218   : > { %v4356_v47 = vpop.eup %4355  ;;  %4038 = vrot.lane.b32.xlu0 %v4037_v0, %s4568_s28  ;;  %4361 = vrcp.f32 %v5488_v13  ;;  %v5495_v44 = vadd.f32 1.0, %v4354_v58  ;;  %v1099_v21 = vand.u32 2147483648, %v5488_v13  ;;  %v3784_v11 = vmul.f32 -1.442695, %v5511_v25 }
 0x219   : > { %v4358_v49 = vpop.eup %4357  ;;  %v5500_v2 = vadd.f32 1.0, %v4356_v47  ;;  %4363 = vrcp.f32 %v5493_v55  ;;  %v1082_v32 = vand.u32 2147483647, %v5486_v43  ;;  %vm1093_vm8 = vweird.f32 %v5488_v13 }
 0x21a   : > { %4365 = vrcp.f32 %v5495_v44  ;;  %v5504_v20 = vadd.f32 1.0, %v4358_v49  ;;  %v1114_v38 = vand.u32 2147483648, %v5493_v55  ;;  %v1085_v41 = vor.u32 1.1754944e-38, %v1084_v12 }
 0x21b   : > { %4367 = vrcp.f32 %v5500_v2  ;;  %v1097_v10 = vand.u32 2147483647, %v5488_v13  ;;  %v5547_v46 = vor.u32 1.1754944e-38, %v1099_v21  ;;  %vm1108_vm10 = vweird.f32 %v5493_v55 }
 0x21c   : > { %4369 = vrcp.f32 %v5504_v20  ;;  %v1112_v47 = vand.u32 2147483647, %v5493_v55  ;;  %vm1123_vm11 = vweird.f32 %v5495_v44  ;;  %v1127_v39 = vand.u32 2147483647, %v5495_v44 }
 0x21d   : > { %v5506_v3 = vpop.eup %4359  ;;  %vm5560_vm12 = vcmp.eq.f32.partialorder %v1082_v32, 8.507059e+37  ;;  %v1115_v21 = vor.u32 1.1754944e-38, %v1114_v38  ;;  %4371 = vpow2.f32 %v3784_v11  ;;  %v3785_v5 = vmul.f32 -1.442695, %v5534_v35 }
 0x21e   : > { %v5513_v50 = vpop.eup %4361  ;;  %v1074_v30 = vmul.f32 %v5506_v3, %v5486_v43  ;;  %vm1079_vm13 = vweird.f32 %v5506_v3  ;;  %vm5567_vm15 = vcmp.eq.f32.partialorder %v1097_v10, 8.507059e+37  ;;  %vm5578_vm1 = vcmp.eq.f32.partialorder %v1112_v47, 8.507059e+37 }
 0x21f   : > { %v1089_v9 = vmul.f32 %v5513_v50, %v5488_v13  ;;  %v5530_v26 = vpop.eup %4363  ;;  %vm1094_vm14 = vweird.f32 %v5513_v50  ;;  %v874_v10 = vand.u32 2147483648, %v5500_v2  ;;  %vm5586_vm3 = vmor %vm1078_vm7, %vm1079_vm13  ;;  %v887_v47 = vand.u32 2147483647, %v5504_v20 }
 0x220   : > { %v1075_v15 = vsub.f32 1.0, %v1074_v30  ;;  %v5537_v4 = vpop.eup %4365  ;;  %v1104_v53 = vmul.f32 %v5530_v26, %v5493_v55  ;;  %v1129_v30 = vand.u32 2147483648, %v5495_v44  ;;  %vm1109_vm4 = vweird.f32 %v5530_v26  ;;  %vm5597_vm5 = vmor %vm1093_vm8, %vm1094_vm14 }
 0x221   : > { %v1090_v1 = vsub.f32 1.0, %v1089_v9  ;;  %v5544_v28 = vpop.eup %4367  ;;  %v1119_v16 = vmul.f32 %v5537_v4, %v5495_v44  ;;  %4373 = vpow2.f32 %v3785_v5  ;;  %vm1124_vm6 = vweird.f32 %v5537_v4  ;;  %vm5622_vm14 = vmor %vm1108_vm10, %vm1109_vm4 }
 0x222   : > { %v1076_v0 = vmul.f32 %v5506_v3, %v1075_v15  ;;  %v1105_v58 = vsub.f32 1.0, %v1104_v53  ;;  %v864_v49 = vmul.f32 %v5544_v28, %v5500_v2  ;;  %v4370_v12 = vpop.eup %4369  ;;  %vm869_vm2 = vweird.f32 %v5544_v28 }
 0x223   : > { %v1091_v33 = vmul.f32 %v5513_v50, %v1090_v1  ;;  %v1120_v63 = vsub.f32 1.0, %v1119_v16  ;;  %v879_v32 = vmul.f32 %v4370_v12, %v5504_v20  ;;  %vm868_vm7 = vweird.f32 %v5500_v2 }
 0x224   : > { %v865_v15 = vsub.f32 1.0, %v864_v49  ;;  %v1106_v53 = vmul.f32 %v5530_v26, %v1105_v58  ;;  %v1077_v16 = vadd.f32 %v5506_v3, %v1076_v0  ;;  %v872_v49 = vand.u32 2147483647, %v5500_v2  ;;  %vm5611_vm8 = vmor %vm868_vm7, %vm869_vm2 }
 0x225   : > { %v1121_v38 = vmul.f32 %v5537_v4, %v1120_v63  ;;  %v1092_v61 = vadd.f32 %v5513_v50, %v1091_v33  ;;  %v880_v58 = vsub.f32 1.0, %v879_v32  ;;  %v4372_v32 = vpop.eup %4371  ;;  %vm884_vm13 = vweird.f32 %v4370_v12 }
 0x226   : > { %v866_v11 = vmul.f32 %v5544_v28, %v865_v15  ;;  %v1107_v43 = vadd.f32 %v5530_v26, %v1106_v53  ;;  %v889_v15 = vand.u32 2147483648, %v5504_v20  ;;  %v1081_v5 = vsel %vm5586_vm3, %v5506_v3, %v1077_v16  ;;  %vm5634_vm3 = vmor %vm1123_vm11, %vm1124_vm6 }
 0x227   : > { %v881_v53 = vmul.f32 %v4370_v12, %v880_v58  ;;  %v1096_v2 = vsel %vm5597_vm5, %v5513_v50, %v1092_v61  ;;  %vm883_vm2 = vweird.f32 %v5504_v20  ;;  %vm873_vm5 = vcmp.eq.f32.partialorder %v872_v49, 8.507059e+37  ;;  %v4374_v0 = vpop.eup %4373 }
 0x228   : > { %v867_v63 = vadd.f32 %v5544_v28, %v866_v11  ;;  %v1122_v11 = vadd.f32 %v5537_v4, %v1121_v38  ;;  %v688_v38 = vmul.f32 %v5044_v52, %v5524_v62  ;;  %v875_v55 = vor.u32 1.1754944e-38, %v874_v10  ;;  %vm885_vm4 = vmor %vm883_vm2, %vm884_vm13 }
 0x229   : > { %v882_v50 = vadd.f32 %v4370_v12, %v881_v53  ;;  %vm888_vm10 = vcmp.eq.f32.partialorder %v887_v47, 8.507059e+37  ;;  %v1086_v58 = vsel %vm5560_vm12, %v1085_v41, %v1081_v5  ;;  %v1111_v20 = vsel %vm5622_vm14, %v5530_v26, %v1107_v43 }
 0x22a   : > { %v871_v16 = vsel %vm5611_vm8, %v5544_v28, %v867_v63  ;;  %v890_v28 = vor.u32 1.1754944e-38, %v889_v15  ;;  %v5643_v62 = vadd.f32 1.0, %v4372_v32  ;;  %v1101_v63 = vsel %vm5567_vm15, %v5547_v46, %v1096_v2  ;;  %v8973_v2 = vld [vmem:[#allocation4_spill] sm:$0xff] }
 0x22b   : > { %v1126_v49 = vsel %vm5634_vm3, %v5537_v4, %v1122_v11  ;;  %v876_v10 = vsel %vm873_vm5, %v875_v55, %v871_v16  ;;  %v886_v9 = vsel %vm885_vm4, %v4370_v12, %v882_v50  ;;  %v5651_v47 = vadd.f32 1.0, %v4374_v0 }
 0x22c   : > { %v891_v41 = vsel %vm888_vm10, %v890_v28, %v886_v9  ;;  %v689_v26 = vmul.f32 %v5044_v52, %v5528_v24  ;;  %v5656_v33 = vadd.f32 %v5053_v57, %v688_v38  ;;  %v1116_v43 = vsel %vm5578_vm1, %v1115_v21, %v1111_v20  ;;  %v8971_v21 = vld [vmem:[#allocation3_spill] sm:$0xff] }
 0x22d   : > { %v1130_v46 = vor.u32 1.1754944e-38, %v1129_v30  ;;  %4375 = vrcp.f32 %v5643_v62  ;;  %v5664_v4 = vmul.f32 %v1086_v58, %v5433_v60  ;;  %vm1128_vm11 = vcmp.eq.f32.partialorder %v1127_v39, 8.507059e+37 }
 0x22e   : > { %4377 = vrcp.f32 %v5651_v47  ;;  %v5670_v52 = vmul.f32 %v1101_v63, %v5436_v7  ;;  %v5673_v31 = vmul.f32 %v876_v10, %v5454_v36  ;;  %v5676_v12 = vmul.f32 %v891_v41, %v5457_v54 }
 0x22f   : > { %v1131_v24 = vsel %vm1128_vm11, %v1130_v46, %v1126_v49  ;;  %v5679_v30 = vmul.f32 %v1116_v43, %v5440_v17  ;;  %v5682_v60 = vadd.f32 %v5053_v57, %v689_v26  ;;  %v3786_v44 = vmul.f32 -1.442695, %v5656_v33  ;;  %v5725_v49 = vld [vmem:[%s8823_s1] ss:$0 sm:$0xff] }
 0x230   : > { %8969 = vst [vmem:[#allocation2_spill] sm:$0xff] %v5673_v31  ;;  %v5686_v39 = vmul.f32 %v1131_v24, %v5447_v27  ;;  %v655_v36 = vmul.f32 %v5039_v51, %v8971_v21  ;;  %v1409_v54 = vrot.slane %v5676_v12, 7  ;;  %v8848_v17 = vrot.slane %v5673_v31, 7 }
 0x231   : > { %8970 = vst [vmem:[#allocation15_spill] sm:$0xff] %v5676_v12  ;;  %4379 = vpow2.f32 %v3786_v44  ;;  %v3787_v7 = vmul.f32 -1.442695, %v5682_v60  ;;  %v8849_v15 = vrot.slane %v5664_v4, 7  ;;  %v1430_v57 = vrot.slane %v5670_v52, 7  ;;  %v8976_v44 = vld [vmem:[#allocation5_spill] sm:$0xff] }
 0x232   : > { %vm1138_vm12 = vweird.f32 %v5643_v62  ;;  %v8847_v27 = vrot.slane %v5679_v30, 7  ;;  %v1142_v11 = vand.u32 2147483647, %v5643_v62  ;;  %v5703_v53 = vsel %vm1407_vm0, %v8848_v17, %v1409_v54 }
 0x233   : > { %v4376_v1 = vpop.eup %4375  ;;  %4381 = vpow2.f32 %v3787_v7  ;;  %8972 = vst [vmem:[#allocation3_spill] sm:$0xff] %v5703_v53  ;;  %v656_v3 = vmul.f32 %v5039_v51, %v8973_v2  ;;  %v1144_v38 = vand.u32 2147483648, %v5643_v62  ;;  %v5711_v61 = vsel %vm1407_vm0, %v8849_v15, %v1430_v57 }
 0x234   : > { %v4378_v32 = vpop.eup %4377  ;;  %v1134_v5 = vmul.f32 %v4376_v1, %v5643_v62  ;;  %8974 = vst [vmem:[#allocation4_spill] sm:$0xff] %v5711_v61  ;;  %v1433_v55 = vrot.slane %v5686_v39, 7  ;;  %vm1153_vm15 = vweird.f32 %v5651_v47  ;;  %v1157_v58 = vand.u32 2147483647, %v5651_v47  ;;  %v8977_v62 = vld [vmem:[#allocation6_spill] sm:$0xff] }
 0x235   : > { %v1149_v13 = vmul.f32 %v4378_v32, %v5651_v47  ;;  %v1159_v20 = vand.u32 2147483648, %v5651_v47  ;;  %vm1139_vm1 = vweird.f32 %v4376_v1  ;;  %v690_v10 = vmul.f32 %v5725_v49, %v655_v36 }
 0x236   : > { %v1135_v16 = vsub.f32 1.0, %v1134_v5  ;;  %v5720_v63 = vsel %vm1407_vm0, %v8847_v27, %v1433_v55  ;;  %vm1154_vm6 = vweird.f32 %v4378_v32  ;;  %v691_v26 = vmul.f32 %v5725_v49, %v656_v3  ;;  %vm1140_vm8 = vmor %vm1138_vm12, %vm1139_vm1  ;;  %v5743_v5 = vld [vmem:[%s8824_s2] ss:$0 sm:$0xff] }
 0x237   : > { %v1150_v50 = vsub.f32 1.0, %v1149_v13  ;;  %v4380_v28 = vpop.eup %4379  ;;  %8975 = vst [vmem:[#allocation16_spill] sm:$0xff] %v5720_v63  ;;  %vm1143_vm7 = vcmp.eq.f32.partialorder %v1142_v11, 8.507059e+37  ;;  %v1145_v24 = vor.u32 1.1754944e-38, %v1144_v38  ;;  %v657_v7 = vmul.f32 %v5039_v51, %v8976_v44  ;;  %vm1155_vm14 = vmor %vm1153_vm15, %vm1154_vm6 }
 0x238   : > { %v1136_v0 = vmul.f32 %v4376_v1, %v1135_v16  ;;  %v5728_v41 = vadd.f32 1.0, %v4380_v28  ;;  %vm1158_vm13 = vcmp.eq.f32.partialorder %v1157_v58, 8.507059e+37  ;;  %v1160_v57 = vor.u32 1.1754944e-38, %v1159_v20 }
 0x239   : > { %v1151_v9 = vmul.f32 %v4378_v32, %v1150_v50  ;;  %v4382_v43 = vpop.eup %4381  ;;  %v5746_v11 = vadd.f32 %v5743_v5, %v690_v10  ;;  %v658_v13 = vmul.f32 %v5039_v51, %v8977_v62  ;;  %v692_v16 = vmul.f32 %v5725_v49, %v657_v7 }
 0x23a   : > { %v1137_v46 = vadd.f32 %v4376_v1, %v1136_v0  ;;  %v5735_v54 = vadd.f32 1.0, %v4382_v43  ;;  %4383 = vrcp.f32 %v5728_v41  ;;  %vm1168_vm5 = vweird.f32 %v5728_v41 }
 0x23b   : > { %v1152_v21 = vadd.f32 %v4378_v32, %v1151_v9  ;;  %v3788_v55 = vmul.f32 -1.442695, %v5746_v11  ;;  %v5766_v0 = vadd.f32 %v5743_v5, %v692_v16  ;;  %v1172_v16 = vand.u32 2147483647, %v5728_v41 }
 0x23c   : > { %v1141_v36 = vsel %vm1140_vm8, %v4376_v1, %v1137_v46  ;;  %4385 = vrcp.f32 %v5735_v54  ;;  %v5752_v1 = vadd.f32 %v5743_v5, %v691_v26  ;;  %vm1183_vm4 = vweird.f32 %v5735_v54 }
 0x23d   : > { %v1146_v2 = vsel %vm1143_vm7, %v1145_v24, %v1141_v36  ;;  %v1156_v3 = vsel %vm1155_vm14, %v4378_v32, %v1152_v21  ;;  %v693_v32 = vmul.f32 %v5725_v49, %v658_v13  ;;  %4387 = vpow2.f32 %v3788_v55 }
 0x23e   : > { %v1161_v47 = vsel %vm1158_vm13, %v1160_v57, %v1156_v3  ;;  %v5756_v38 = vmul.f32 %v1146_v2, %v5511_v25  ;;  %v3789_v20 = vmul.f32 -1.442695, %v5752_v1  ;;  %v3790_v44 = vmul.f32 -1.442695, %v5766_v0 }
 0x23f   : > { %v5760_v58 = vmul.f32 %v1161_v47, %v5534_v35  ;;  %v5772_v43 = vadd.f32 %v5743_v5, %v693_v32  ;;  %v1174_v13 = vand.u32 2147483648, %v5728_v41  ;;  %v1189_v55 = vand.u32 2147483648, %v5735_v54 }
 0x240   : > { %8978 = vst [vmem:[#allocation5_spill] sm:$0xff] %v5756_v38  ;;  %v4384_v50 = vpop.eup %4383  ;;  %v8846_v25 = vrot.slane %v5756_v38, 7  ;;  %4389 = vpow2.f32 %v3789_v20  ;;  %v1187_v32 = vand.u32 2147483647, %v5735_v54  ;;  %vm1173_vm12 = vcmp.eq.f32.partialorder %v1172_v16, 8.507059e+37 }
 0x241   : > { %8979 = vst [vmem:[#allocation6_spill] sm:$0xff] %v5760_v58  ;;  %v1164_v28 = vmul.f32 %v4384_v50, %v5728_v41  ;;  %v1436_v35 = vrot.slane %v5760_v58, 7  ;;  %v3791_v21 = vmul.f32 -1.442695, %v5772_v43  ;;  %4391 = vpow2.f32 %v3790_v44 }
 0x242   : > { %v4386_v10 = vpop.eup %4385  ;;  %vm1169_vm2 = vweird.f32 %v4384_v50  ;;  %vm1188_vm15 = vcmp.eq.f32.partialorder %v1187_v32, 8.507059e+37  ;;  %v5828_v16 = vsel %vm1407_vm0, 0.0, %v1411_v48  ;;  %v8988_v48 = vrot.slane %v5378_v37, 7 }
 0x243   : > { %v1165_v9 = vsub.f32 1.0, %v1164_v28  ;;  %v1179_v26 = vmul.f32 %v4386_v10, %v5735_v54  ;;  %v5778_v7 = vsel %vm1407_vm0, %v8846_v25, %v1436_v35  ;;  %v4388_v57 = vpop.eup %4387  ;;  %vm1184_vm3 = vweird.f32 %v4386_v10  ;;  %vm5787_vm10 = vmor %vm1168_vm5, %vm1169_vm2  ;;  %v8983_v28 = vld [vmem:[#allocation7_spill] sm:$0xff]  ;;  %v8993_v35 = vld [vmem:[#allocation10_spill] sm:$0xff] }
 0x244   : > { %8980 = vst [vmem:[#allocation17_spill] sm:$0xff] %v5778_v7  ;;  %v5782_v3 = vadd.f32 1.0, %v4388_v57  ;;  %4393 = vpow2.f32 %v3791_v21  ;;  %vm5797_vm11 = vmor %vm1183_vm4, %vm1184_vm3  ;;  %v1526_v54 = vrot.slane %v5664_v4, 1  ;;  %v1527_v21 = vrot.slane %v5670_v52, 1  ;;  %v3994_v57 = vpop.permute.xlu2 %3993 }
 0x245   : > { %v1166_v46 = vmul.f32 %v4384_v50, %v1165_v9  ;;  %v1180_v24 = vsub.f32 1.0, %v1179_v26  ;;  %v659_v9 = vmul.f32 %v5039_v51, %v8983_v28  ;;  %v1530_v32 = vrot.slane %v5686_v39, 1 }
 0x246   : > { %v4390_v47 = vpop.eup %4389  ;;  %4395 = vrcp.f32 %v5782_v3  ;;  %v5839_v22 = vsel %vm1504_vm9, %v1526_v54, %v1527_v21  ;;  %vm8996_vm1 = vcmask 261120   ;;  %vm8915_vm7 = vcmask 523264  }
 0x247   : > { %v1181_v36 = vmul.f32 %v4386_v10, %v1180_v24  ;;  %v1167_v62 = vadd.f32 %v4384_v50, %v1166_v46  ;;  %v4392_v41 = vpop.eup %4391  ;;  %v1175_v46 = vor.u32 1.1754944e-38, %v1174_v13  ;;  %v5803_v44 = vadd.f32 1.0, %v4390_v47  ;;  %vm8997_vm6 = vmmov %vm8996_vm1 }
 0x248   : > { %v5808_v20 = vadd.f32 1.0, %v4392_v41  ;;  %v694_v13 = vmul.f32 %v5725_v49, %v659_v9  ;;  %v5822_v47 = vsel %vm1407_vm0, 0.0, %v1417_v56  ;;  %v8989_v9 = vld [vmem:[#allocation8_spill] sm:$0xff]  ;;  %v1506_v41 = vrot.slane %v5676_v12, 1  ;;  %vm8999_vm14 = vmmov %vm8996_vm1 }
 0x249   : > { %v1182_v2 = vadd.f32 %v4386_v10, %v1181_v36  ;;  %v1171_v26 = vsel %vm5787_vm10, %v4384_v50, %v1167_v62  ;;  %v1190_v36 = vor.u32 1.1754944e-38, %v1189_v55  ;;  %4397 = vrcp.f32 %v5803_v44  ;;  %vm9000_vm2 = vmmov %vm8996_vm1 }
 0x24a   : > { %v4394_v50 = vpop.eup %4393  ;;  %v1176_v62 = vsel %vm1173_vm12, %v1175_v46, %v1171_v26  ;;  %4399 = vrcp.f32 %v5808_v20  ;;  %v5848_v56 = vadd.f32 %v5743_v5, %v694_v13  ;;  %v1529_v55 = vrot.slane %v5679_v30, 1  ;;  %v8990_v46 = vld [vmem:[#allocation9_spill] sm:$0xff]  ;;  %vm9001_vm4 = vmmov %vm8996_vm1 }
 0x24b   : > { %v1186_v24 = vsel %vm5797_vm11, %v4386_v10, %v1182_v2  ;;  %v1492_v10 = vsel %vm1407_vm0, 0.0, %v1420_v59  ;;  %v5817_v2 = vsel %vm1407_vm0, 0.0, %v1414_v29  ;;  %v5831_v8 = vmul.f32 %v1176_v62, %v5656_v33  ;;  %vm9002_vm11 = vmmov %vm8996_vm1 }
 0x24c   : > { %v1191_v28 = vsel %vm1188_vm15, %v1190_v36, %v1186_v24  ;;  %v5833_v59 = vadd.f32 1.0, %v4394_v50  ;;  %v5836_v6 = vpop.eup %4395  ;;  %v5842_v29 = vsel %vm1504_vm9, %v1527_v21, 0.0  ;;  %v5853_v33 = vsel %vm1407_vm0, 0.0, %v8988_v48 }
 0x24d   : > { %8986 = vst [vmem:[#allocation7_spill] sm:$0xff] %v5831_v8  ;;  %v5845_v19 = vmul.f32 %v1191_v28, %v5682_v60  ;;  %v660_v26 = vmul.f32 %v5039_v51, %v8989_v9  ;;  %v1505_v60 = vrot.slane %v5673_v31, 1  ;;  %v661_v37 = vmul.f32 %v5039_v51, %v8990_v46 }
 0x24e   : > { %v1194_v54 = vmul.f32 %v5836_v6, %v5782_v3  ;;  %4401 = vrcp.f32 %v5833_v59  ;;  %v3995_v50 = vunpack.i.l.bf16 %v3994_v57  ;;  %v3792_v48 = vmul.f32 -1.442695, %v5848_v56 }
 0x24f   : > { %8987 = vst [vmem:[#allocation18_spill] sm:$0xff] %v5845_v19  ;;  %v5871_v36 = vpop.eup %4397  ;;  %v1439_v28 = vrot.slane %v5845_v19, 7  ;;  %v3996_v46 = vunpack.i.h.bf16 %v3994_v57  ;;  %v5882_v25 = vsel %vm1504_vm9, %v1529_v55, %v1530_v32  ;;  %v5885_v27 = vsel %vm1504_vm9, %v1530_v32, 0.0 }
 0x250   : > { %v5879_v9 = vpop.eup %4399  ;;  %v695_v17 = vmul.f32 %v5725_v49, %v660_v26  ;;  %v5889_v24 = vsel %vm1504_vm9, %v1505_v60, %v1506_v41  ;;  %v5892_v13 = vsel %vm1504_vm9, %v1506_v41, 0.0  ;;  %v662_v21 = vmul.f32 %v5039_v51, %v8993_v35 }
 0x251   : > { %8991 = vst [vmem:[#allocation8_spill] sm:$0xff] %v5889_v24  ;;  %v696_v57 = vmul.f32 %v5725_v49, %v661_v37  ;;  %v1195_v7 = vsub.f32 1.0, %v1194_v54  ;;  %v1204_v55 = vand.u32 2147483648, %v5782_v3  ;;  %v1219_v32 = vand.u32 2147483648, %v5803_v44 }
 0x252   : > { %8992 = vst [vmem:[#allocation9_spill] sm:$0xff] %v5892_v13  ;;  %v8994_v63 = vrot.slane %v5831_v8, 7  ;;  %v5905_v60 = vsel %vm8996_vm1, %v1492_v10, %v3995_v50  ;;  %v1209_v53 = vmul.f32 %v5871_v36, %v5803_v44  ;;  %v1224_v35 = vmul.f32 %v5879_v9, %v5808_v20 }
 0x253   : > { %4403 = vpow2.f32 %v3792_v48  ;;  %v5915_v54 = vsel %vm8997_vm6, %v5344_v23, %v3996_v46  ;;  %v1202_v10 = vand.u32 2147483647, %v5782_v3  ;;  %v697_v50 = vmul.f32 %v5725_v49, %v662_v21 }
 0x254   : > { %v5902_v26 = vsel %vm1407_vm0, %v8994_v63, %v1439_v28  ;;  %v5911_v37 = vpop.eup %4401  ;;  %v5918_v28 = vadd.f32 %v5743_v5, %v695_v17  ;;  %v1196_v48 = vmul.f32 %v5836_v6, %v1195_v7  ;;  %v5926_v19 = vor.u32 1.1754944e-38, %v1204_v55 }
 0x255   : > { %8995 = vst [vmem:[#allocation10_spill] sm:$0xff] %v5902_v26  ;;  %v5923_v26 = vadd.f32 %v5743_v5, %v696_v57  ;;  %v1217_v23 = vand.u32 2147483647, %v5803_v44  ;;  %v5929_v46 = vor.u32 1.1754944e-38, %v1219_v32  ;;  %vm1198_vm8 = vweird.f32 %v5782_v3 }
 0x256   : > { %v3999_v15 = vpop.permute.xlu2 %3998  ;;  %8998 = vst [vmem:[#allocation19_spill] sm:$0xff] %v5918_v28  ;;  %vm1199_vm13 = vweird.f32 %v5836_v6  ;;  %v1210_v17 = vsub.f32 1.0, %v1209_v53  ;;  %v1239_v21 = vmul.f32 %v5911_v37, %v5833_v59  ;;  %v1232_v55 = vand.u32 2147483647, %v5808_v20 }
 0x257   : > { %v4001_v61 = vunpack.i.h.bf16 %v3999_v15  ;;  %v4000_v63 = vunpack.i.l.bf16 %v3999_v15  ;;  %v1225_v15 = vsub.f32 1.0, %v1224_v35  ;;  %v3793_v32 = vmul.f32 -1.442695, %v5918_v28  ;;  %vm5993_vm6 = vmor %vm1198_vm8, %vm1199_vm13 }
 0x258   : > { %vm1213_vm3 = vweird.f32 %v5803_v44  ;;  %vm1214_vm5 = vweird.f32 %v5871_v36  ;;  %v1234_v35 = vand.u32 2147483648, %v5808_v20  ;;  %v1211_v18 = vmul.f32 %v5871_v36, %v1210_v17 }
 0x259   : > { %v5937_v57 = vsel %vm8999_vm14, %v5817_v2, %v4000_v63  ;;  %v5941_v7 = vsel %vm9000_vm2, %v5357_v42, %v4001_v61  ;;  %v4404_v8 = vpop.eup %4403  ;;  %v5951_v42 = vadd.f32 %v5836_v6, %v1196_v48  ;;  %vm1228_vm10 = vweird.f32 %v5808_v20  ;;  %vm9009_vm2 = vmmov %vm8996_vm1 }
 0x25a   : > { %v1240_v28 = vsub.f32 1.0, %v1239_v21  ;;  %4405 = vpow2.f32 %v3793_v32  ;;  %v5957_v12 = vadd.f32 1.0, %v4404_v8  ;;  %vm1243_vm12 = vweird.f32 %v5833_v59 }
 0x25b   : > { %vm5979_vm15 = vcmp.eq.f32.partialorder %v1202_v10, 8.507059e+37  ;;  %v1249_v8 = vand.u32 2147483648, %v5833_v59  ;;  %vm5997_vm14 = vcmp.eq.f32.partialorder %v1217_v23, 8.507059e+37  ;;  %v1201_v3 = vsel %vm5993_vm6, %v5836_v6, %v5951_v42 }
 0x25c   : > { %v5873_v62 = vpop.permute.xlu1 %3988  ;;  %4407 = vrcp.f32 %v5957_v12  ;;  %vm1229_vm8 = vweird.f32 %v5879_v9  ;;  %vm6013_vm13 = vcmp.eq.f32.partialorder %v1232_v55, 8.507059e+37 }
 0x25d   : > { %v3991_v2 = vunpack.i.h.bf16 %v5873_v62  ;;  %v3990_v63 = vunpack.i.l.bf16 %v5873_v62  ;;  %v5960_v62 = vadd.f32 %v5743_v5, %v697_v50 }
 0x25f   : > { %v3795_v32 = vmul.f32 -1.442695, %v5960_v62 }
 0x261   : > { %v3979_v41 = vpop.permute.xlu0 %3978 }
 0x262   : > { %v3981_v58 = vunpack.i.h.bf16 %v3979_v41  ;;  %v3980_v34 = vunpack.i.l.bf16 %v3979_v41  ;;  %v1226_v41 = vmul.f32 %v5879_v9, %v1225_v15  ;;  %v3794_v15 = vmul.f32 -1.442695, %v5923_v26 }
 0x264   : > { %v4004_v53 = vpop.permute.xlu1 %4003  ;;  %v1795_v48 = vsel %vm9001_vm4, %v5828_v16, %v3980_v34  ;;  %v1796_v61 = vsel %vm9002_vm11, %v5392_v45, %v3981_v58  ;;  %v1212_v58 = vadd.f32 %v5871_v36, %v1211_v18  ;;  %v1235_v16 = vor.u32 1.1754944e-38, %v1234_v35  ;;  %vm6027_vm4 = vmor %vm1213_vm3, %vm1214_vm5 }
 0x265   : > { %v4006_v17 = vunpack.i.h.bf16 %v4004_v53  ;;  %v4005_v31 = vunpack.i.l.bf16 %v4004_v53  ;;  %v1241_v18 = vmul.f32 %v5911_v37, %v1240_v28  ;;  %4409 = vpow2.f32 %v3794_v15  ;;  %v4406_v53 = vpop.eup %4405  ;;  %vm6045_vm3 = vmor %vm1228_vm10, %vm1229_vm8 }
 0x266   : > { %v1227_v23 = vadd.f32 %v5879_v9, %v1226_v41  ;;  %4411 = vpow2.f32 %v3795_v32  ;;  %v1216_v41 = vsel %vm6027_vm4, %v5871_v36, %v1212_v58  ;;  %vm1244_vm11 = vweird.f32 %v5911_v37  ;;  %v6039_v44 = vpop.eup %4407 }
 0x267   : > { %vm6086_vm5 = vmor %vm1243_vm12, %vm1244_vm11  ;;  %vm1259_vm6 = vweird.f32 %v6039_v44 }
 0x268   : > { %v1231_v32 = vsel %vm6045_vm3, %v5879_v9, %v1227_v23  ;;  %v9019_v23 = vld [vmem:[#allocation12_spill] sm:$0xff]  ;;  %vm9021_vm12 = vmmov %vm8996_vm1 }
 0x269   : > { %v3984_v38 = vpop.permute.xlu0 %3983 }
 0x26a   : > { %v3986_v13 = vunpack.i.h.bf16 %v3984_v38  ;;  %v3985_v24 = vunpack.i.l.bf16 %v3984_v38 }
 0x26c   : > { %v5968_v21 = vsel %vm8915_vm7, %v1795_v48, %v3985_v24  ;;  %v5971_v38 = vsel %vm8915_vm7, %v1796_v61, %v3986_v13  ;;  %v5985_v24 = vpop.permute.xlu2 %4018  ;;  %v1799_v13 = vsel %vm8996_vm1, %v5822_v47, %v3990_v63  ;;  %v1800_v47 = vsel %vm9009_vm2, %v5364_v14, %v3991_v2  ;;  %v9014_v2 = vld [vmem:[#allocation11_spill] sm:$0xff] }
 0x26d   : > { %v5977_v34 = vpack.i.bf16 %v5971_v38, %v5968_v21  ;;  %v6018_v35 = vsel %vm8915_vm7, %v1799_v13, %v4005_v31  ;;  %v6021_v14 = vsel %vm8915_vm7, %v1800_v47, %v4006_v17  ;;  %v663_v55 = vmul.f32 %v5039_v51, %v9014_v2  ;;  %v4410_v47 = vpop.eup %4409 }
 0x26e   : > { %v4021_v63 = vunpack.i.h.bf16 %v5985_v24  ;;  %v4020_v31 = vunpack.i.l.bf16 %v5985_v24  ;;  %v1242_v24 = vadd.f32 %v5911_v37, %v1241_v18  ;;  %v6050_v13 = vadd.f32 1.0, %v4406_v53 }
 0x26f   : > { %4028 = vrot.lane.b32.xlu1 %v5977_v34, %s4568_s28  ;;  %v6054_v58 = vpack.i.bf16 %v6021_v14, %v6018_v35  ;;  %v1254_v53 = vmul.f32 %v6039_v44, %v5957_v12  ;;  %v698_v6 = vmul.f32 %v5725_v49, %v663_v55  ;;  %v664_v55 = vmul.f32 %v5039_v51, %v9019_v23 }
 0x270   : > { %4413 = vrcp.f32 %v6050_v13  ;;  %v1221_v51 = vsel %vm5997_vm14, %v5929_v46, %v1216_v41  ;;  %v1804_v28 = vsel %vm9021_vm12, %v5420_v40, %v4021_v63  ;;  %vm1273_vm14 = vweird.f32 %v6050_v13 }
 0x271   : > { %v4014_v42 = vpop.permute.xlu1 %4013  ;;  %v4009_v61 = vpop.permute.xlu0 %4008  ;;  %v1255_v45 = vsub.f32 1.0, %v1254_v53  ;;  %v6118_v15 = vadd.f32 %v5743_v5, %v698_v6  ;;  %v9023_v53 = vpack.i.bf16 %v5670_v52, %v5664_v4 }
 0x272   : > { %v4016_v48 = vunpack.i.h.bf16 %v4014_v42  ;;  %v4015_v17 = vunpack.i.l.bf16 %v4014_v42  ;;  %v4011_v50 = vunpack.i.h.bf16 %v4009_v61  ;;  %v4010_v36 = vunpack.i.l.bf16 %v4009_v61  ;;  %v4412_v42 = vpop.eup %4411 }
 0x273   : > { %v1246_v61 = vsel %vm6086_vm5, %v5911_v37, %v1242_v24  ;;  %v1236_v37 = vsel %vm6013_vm13, %v1235_v16, %v1231_v32  ;;  %v6130_v16 = vmul.f32 %v1221_v51, %v5752_v1  ;;  %v1256_v24 = vmul.f32 %v6039_v44, %v1255_v45 }
 0x274   : > { %v6061_v20 = vsel %vm8915_vm7, %v5937_v57, %v4015_v17  ;;  %v6065_v18 = vsel %vm8915_vm7, %v5941_v7, %v4016_v48  ;;  %v6076_v9 = vsel %vm8915_vm7, %v5905_v60, %v4010_v36  ;;  %v6080_v57 = vsel %vm8915_vm7, %v5915_v54, %v4011_v50 }
 0x275   : > { %v6072_v2 = vpack.i.bf16 %v6065_v18, %v6061_v20  ;;  %v4047_v60 = vpack.i.bf16 %v6080_v57, %v6076_v9  ;;  %v1206_v54 = vsel %vm5979_vm15, %v5926_v19, %v1201_v3  ;;  %v1250_v48 = vor.u32 1.1754944e-38, %v1249_v8  ;;  %vm9022_vm15 = vmmov %vm8996_vm1 }
 0x276   : > { %v6108_v19 = vadd.f32 1.0, %v4410_v47  ;;  %v9020_v3 = vand.u32 2147483647, %v5833_v59  ;;  %v6115_v17 = vadd.f32 1.0, %v4412_v42  ;;  %v6121_v10 = vmul.f32 %v1206_v54, %v5746_v11 }
 0x277   : > { %4053 = vrot.lane.b32.xlu0 %v6072_v2, %s4568_s28  ;;  %4043 = vrot.lane.b32.xlu1 %v6054_v58, %s4569_s14  ;;  %v699_v8 = vmul.f32 %v5725_v49, %v664_v55  ;;  %v1803_v59 = vsel %vm9022_vm15, %v5853_v33, %v4020_v31  ;;  %v6134_v11 = vmul.f32 %v1236_v37, %v5766_v0  ;;  %v1262_v50 = vand.u32 2147483647, %v5957_v12  ;;  %v6138_v49 = vpop.eup %4413 }
 0x278   : > { %4048 = vrot.lane.b32.xlu2 %v4047_v60, %s4568_s28  ;;  %vm1248_vm10 = vcmp.eq.f32.partialorder %v9020_v3, 8.507059e+37  ;;  %4415 = vrcp.f32 %v6108_v19  ;;  %vm1258_vm1 = vweird.f32 %v5957_v12  ;;  %v1264_v1 = vand.u32 2147483648, %v5957_v12  ;;  %v9038_v12 = vld [vmem:[#allocation19_spill] sm:$0xff] }
 0x279   : > { %v1251_v46 = vsel %vm1248_vm10, %v1250_v48, %v1246_v61  ;;  %4417 = vrcp.f32 %v6115_v17  ;;  %v3796_v33 = vmul.f32 -1.442695, %v6118_v15  ;;  %v1269_v0 = vmul.f32 %v6138_v49, %v6050_v13  ;;  %vm6205_vm11 = vmor %vm1258_vm1, %vm1259_vm6 }
 0x27a   : > { %v6141_v40 = vmul.f32 %v1251_v46, %v5772_v43  ;;  %v6151_v63 = vadd.f32 %v5743_v5, %v699_v8  ;;  %v1277_v43 = vand.u32 2147483647, %v6050_v13  ;;  %v1279_v32 = vand.u32 2147483648, %v6050_v13  ;;  %v9035_v13 = vld [vmem:[#allocation15_spill] sm:$0xff] }
 0x27b   : > { %v4024_v41 = vpop.permute.xlu0 %4023  ;;  %v1257_v6 = vadd.f32 %v6039_v44, %v1256_v24  ;;  %v1270_v7 = vsub.f32 1.0, %v1269_v0  ;;  %vm1288_vm2 = vweird.f32 %v6108_v19  ;;  %v1292_v5 = vand.u32 2147483647, %v6108_v19 }
 0x27c   : > { %v4026_v31 = vunpack.i.h.bf16 %v4024_v41  ;;  %v4025_v36 = vunpack.i.l.bf16 %v4024_v41  ;;  %v9024_v55 = vpack.i.bf16 %v5842_v29, %v5839_v22  ;;  %vm6171_vm8 = vcmp.eq.f32.partialorder %v1262_v50, 8.507059e+37  ;;  %v9036_v50 = vld [vmem:[#allocation8_spill] sm:$0xff] }
 0x27d   : > { %v1307_v54 = vand.u32 2147483647, %v6115_v17  ;;  %4419 = vpow2.f32 %v3796_v33  ;;  %v1271_v61 = vmul.f32 %v6138_v49, %v1270_v7  ;;  %vm1274_vm13 = vweird.f32 %v6138_v49 }
 0x27e   : > { %v6155_v47 = vpop.eup %4415  ;;  %v3797_v29 = vmul.f32 -1.442695, %v6151_v63  ;;  %v6185_v51 = vsel %vm8915_vm7, %v1803_v59, %v4025_v36  ;;  %v6188_v48 = vsel %vm8915_vm7, %v1804_v28, %v4026_v31  ;;  %v8868_v46 = vrot.slane %v6134_v11, 7  ;;  %vm6219_vm5 = vmor %vm1273_vm14, %vm1274_vm13 }
 0x27f   : > { %4068 = vrot.lane.b32.xlu0 %v4047_v60, %s4569_s14  ;;  %4058 = vrot.lane.b32.xlu1 %v9023_v53, %s4567_s27  ;;  %v6165_v23 = vpop.eup %4417  ;;  %v1284_v52 = vmul.f32 %v6155_v47, %v6108_v19  ;;  %v1294_v60 = vand.u32 2147483648, %v6108_v19  ;;  %vm1289_vm4 = vweird.f32 %v6155_v47  ;;  %v1272_v37 = vadd.f32 %v6138_v49, %v1271_v61  ;;  %v6260_v19 = vld [vmem:[%s8826_s4 + $0x78] sm:$0xff] }
 0x280   : > { %4063 = vrot.lane.b32.xlu2 %v9024_v55, %s4568_s28  ;;  %v1299_v22 = vmul.f32 %v6165_v23, %v6115_v17  ;;  %4421 = vpow2.f32 %v3797_v29  ;;  %v1445_v41 = vrot.slane %v6141_v40, 7  ;;  %v8869_v24 = vrot.slane %v6121_v10, 7  ;;  %vm6244_vm10 = vmor %vm1288_vm2, %vm1289_vm4  ;;  %3955 = vmatpush.bf16.msra.mxu3 %v6260_v19 }
 0x281   : > { %v1285_v45 = vsub.f32 1.0, %v1284_v52  ;;  %v1442_v59 = vrot.slane %v6130_v16, 7  ;;  %v6199_v28 = vpack.i.bf16 %v6188_v48, %v6185_v51  ;;  %vm1304_vm3 = vweird.f32 %v6165_v23 }
 0x282   : > { %v1300_v3 = vsub.f32 1.0, %v1299_v22  ;;  %v1309_v0 = vand.u32 2147483648, %v6115_v17  ;;  %v1261_v36 = vsel %vm6205_vm11, %v6039_v44, %v1257_v6  ;;  %v6227_v7 = vsel %vm1407_vm0, %v8868_v46, %v1445_v41 }
 0x283   : > { %v1286_v8 = vmul.f32 %v6155_v47, %v1285_v45  ;;  %v4420_v31 = vpop.eup %4419  ;;  %v6232_v55 = vsel %vm1407_vm0, %v8869_v24, %v1442_v59  ;;  %v9031_v44 = vpack.i.bf16 %v5686_v39, %v5679_v30  ;;  %v1265_v6 = vor.u32 1.1754944e-38, %v1264_v1  ;;  %v3936_v39 = vld [vmem:[%s8826_s4 + $0x38] sm:$0xff]  ;;  %v9034_v59 = vld [vmem:[#allocation2_spill] sm:$0xff] }
 0x284   : > { %v1301_v33 = vmul.f32 %v6165_v23, %v1300_v3  ;;  %vm1303_vm12 = vweird.f32 %v6115_v17  ;;  %v6250_v22 = vadd.f32 1.0, %v4420_v31  ;;  %v1276_v1 = vsel %vm6219_vm5, %v6138_v49, %v1272_v37  ;;  %3947 = vmatpush.bf16.msra.mxu2 %v3936_v39  ;;  %2389 = vmatpush.bf16.msra.mxu1 %v3936_v39  ;;  %v9041_v39 = vld [vmem:[#allocation5_spill] sm:$0xff] }
 0x285   : > { %v1287_v53 = vadd.f32 %v6155_v47, %v1286_v8  ;;  %v1280_v29 = vor.u32 1.1754944e-38, %v1279_v32  ;;  %v1295_v45 = vor.u32 1.1754944e-38, %v1294_v60  ;;  %vm1305_vm15 = vmor %vm1303_vm12, %vm1304_vm3  ;;  %v1266_v3 = vsel %vm6171_vm8, %v1265_v6, %v1261_v36  ;;  %v4034_v32 = vpop.permute.xlu2 %4033 }
 0x286   : > { %v1302_v61 = vadd.f32 %v6165_v23, %v1301_v33  ;;  %vm1293_vm1 = vcmp.eq.f32.partialorder %v1292_v5, 8.507059e+37  ;;  %v1310_v41 = vor.u32 1.1754944e-38, %v1309_v0  ;;  %vm1278_vm6 = vcmp.eq.f32.partialorder %v1277_v43, 8.507059e+37 }
 0x287   : > { %4073 = vrot.lane.b32.xlu0 %v9031_v44, %s4567_s27  ;;  %4078 = vrot.lane.b32.xlu1 %v6199_v28, %s4568_s28  ;;  %v1291_v17 = vsel %vm6244_vm10, %v6155_v47, %v1287_v53  ;;  %vm1308_vm14 = vcmp.eq.f32.partialorder %v1307_v54, 8.507059e+37  ;;  %4423 = vrcp.f32 %v6250_v22  ;;  %v1281_v47 = vsel %vm1278_vm6, %v1280_v29, %v1276_v1  ;;  %v9037_v54 = vld [vmem:[#allocation9_spill] sm:$0xff] }
 0x288   : > { %4088 = vrot.lane.b32.xlu2 %v6054_v58, %s4568_s28  ;;  %v4422_v58 = vpop.eup %4421  ;;  %v1306_v8 = vsel %vm1305_vm15, %v6165_v23, %v1302_v61  ;;  %v1296_v49 = vsel %vm1293_vm1, %v1295_v45, %v1291_v17  ;;  %v6280_v23 = vmul.f32 %v1266_v3, %v5848_v56  ;;  %v4082_v42 = vpack.i.bf16 %v5885_v27, %v5882_v25  ;;  %v9042_v17 = vld [vmem:[#allocation14_spill] sm:$0xff] }
 0x289   : > { %v1311_v60 = vsel %vm1308_vm14, %v1310_v41, %v1306_v8  ;;  %v6277_v37 = vadd.f32 1.0, %v4422_v58  ;;  %v4092_v43 = vpack.i.bf16 %v9035_v13, %v9034_v59  ;;  %v4097_v33 = vpack.i.bf16 %v9037_v54, %v9036_v50 }
 0x28a   : > { %v4039_v5 = vpop.permute.xlu0 %4038  ;;  %v6289_v0 = vmul.f32 %v1296_v49, %v5923_v26  ;;  %v4036_v31 = vunpack.i.h.bf16 %v4034_v32  ;;  %v4035_v36 = vunpack.i.l.bf16 %v4034_v32  ;;  %v6292_v53 = vmul.f32 %v1281_v47, %v9038_v12  ;;  %v9039_v26 = vld [vmem:[#allocation13_spill] sm:$0xff]  ;;  %v9045_v32 = vld [vmem:[#allocation6_spill] sm:$0xff] }
 0x28b   : > { %v6295_v56 = vmul.f32 %v1311_v60, %v5960_v62  ;;  %v4041_v44 = vunpack.i.h.bf16 %v4039_v5  ;;  %v4040_v6 = vunpack.i.l.bf16 %v4039_v5  ;;  %4425 = vrcp.f32 %v6277_v37 }
 0x28c   : > { %v8867_v25 = vrot.slane %v6280_v23, 7  ;;  %v9040_v52 = vrot.slane %v9039_v26, 7  ;;  %v1532_v62 = vrot.slane %v9041_v39, 1  ;;  %v8864_v29 = vrot.slane %v6289_v0, 7 }
 0x28d   : > { %v4424_v27 = vpop.eup %4423  ;;  %vm9043_vm2 = vcmask 261120   ;;  %v1451_v3 = vrot.slane %v6295_v56, 7  ;;  %v1448_v8 = vrot.slane %v6292_v53, 7  ;;  %v4112_v47 = vpack.i.bf16 %v9045_v32, %v9041_v39 }
 0x28e   : > { %v1494_v61 = vsel %vm1407_vm0, 0.0, %v9040_v52  ;;  %v1314_v1 = vmul.f32 %v4424_v27, %v6250_v22  ;;  %v1806_v45 = vsel %vm9043_vm2, %v9042_v17, %v4036_v31  ;;  %vm9044_vm8 = vmmov %vm9043_vm2  ;;  %v1533_v5 = vrot.slane %v9045_v32, 1 }
 0x28f   : > { %4083 = vrot.lane.b32.xlu1 %v4082_v42, %s4568_s28  ;;  %4098 = vrot.lane.b32.xlu0 %v4097_v33, %s4568_s28  ;;  %v1805_v58 = vsel %vm9044_vm8, %v1494_v61, %v4035_v36  ;;  %v6317_v49 = vsel %vm8915_vm7, %v1806_v45, %v4041_v44  ;;  %v1324_v42 = vand.u32 2147483648, %v6250_v22  ;;  %v6326_v13 = vsel %vm1407_vm0, %v8864_v29, %v1451_v3  ;;  %vm9048_vm1 = vmmov %vm9043_vm2 }
 0x290   : > { %4093 = vrot.lane.b32.xlu2 %v4092_v43, %s4567_s27  ;;  %v6314_v41 = vsel %vm8915_vm7, %v1805_v58, %v4040_v6  ;;  %v1315_v60 = vsub.f32 1.0, %v1314_v1  ;;  %v6331_v43 = vsel %vm1407_vm0, %v8867_v25, %v1448_v8  ;;  %vm1319_vm13 = vweird.f32 %v4424_v27  ;;  %vm9051_vm14 = vmmov %vm9048_vm1 }
 0x291   : > { %v4426_v50 = vpop.eup %4425  ;;  %v1322_v33 = vand.u32 2147483647, %v6250_v22  ;;  %v4107_v31 = vpack.i.bf16 %v6317_v49, %v6314_v41  ;;  %vm1318_vm4 = vweird.f32 %v6250_v22  ;;  %v1534_v44 = vsel %vm1504_vm9, %v1532_v62, %v1533_v5  ;;  %vm9052_vm2 = vmmov %vm9048_vm1 }
 0x292   : > { %v1316_v54 = vmul.f32 %v4424_v27, %v1315_v60  ;;  %v1329_v36 = vmul.f32 %v4426_v50, %v6277_v37  ;;  %vm1320_vm11 = vmor %vm1318_vm4, %vm1319_vm13  ;;  %v1325_v6 = vor.u32 1.1754944e-38, %v1324_v42  ;;  %v1578_v52 = vsel %vm1504_vm9, %v1533_v5, 0.0 }
 0x293   : > { %vm1323_vm3 = vcmp.eq.f32.partialorder %v1322_v33, 8.507059e+37  ;;  %v1339_v1 = vand.u32 2147483648, %v6277_v37  ;;  %vm1334_vm5 = vweird.f32 %v4426_v50  ;;  %v1337_v45 = vand.u32 2147483647, %v6277_v37  ;;  %vm9053_vm8 = vmmov %vm9048_vm1 }
 0x294   : > { %v1317_v12 = vadd.f32 %v4424_v27, %v1316_v54  ;;  %v1330_v26 = vsub.f32 1.0, %v1329_v36  ;;  %vm1333_vm10 = vweird.f32 %v6277_v37  ;;  %v4117_v62 = vpack.i.bf16 %v1578_v52, %v1534_v44  ;;  %v3935_v52 = vld [vmem:[%s8826_s4 + $0x30] sm:$0xff]  ;;  %vm9056_vm13 = vmmov %vm9048_vm1 }
 0x295   : > { %vm1335_vm12 = vmor %vm1333_vm10, %vm1334_vm5  ;;  %v1340_v3 = vor.u32 1.1754944e-38, %v1339_v1  ;;  %vm1338_vm15 = vcmp.eq.f32.partialorder %v1337_v45, 8.507059e+37  ;;  %3948 = vmatpush.bf16.msra.mxu2 %v3935_v52  ;;  %v3934_v1 = vld [vmem:[%s8826_s4 + $0x28] sm:$0xff]  ;;  %2390 = vmatpush.bf16.msra.mxu1 %v3935_v52  ;;  %v3941_v45 = vld [vmem:[%s8826_s4 + $0x60] sm:$0xff]  ;;  %vm2080_vm6 = vcmask 785408  }
 0x296   : > { %v1321_v61 = vsel %vm1320_vm11, %v4424_v27, %v1317_v12  ;;  %v9046_v27 = vld [vmem:[#allocation7_spill] sm:$0xff]  ;;  %vm9058_vm4 = vmmov %vm9048_vm1 }
 0x297   : > { %4103 = vrot.lane.b32.xlu1 %v6199_v28, %s4569_s14  ;;  %4113 = vrot.lane.b32.xlu0 %v4112_v47, %s4567_s27  ;;  %v1326_v17 = vsel %vm1323_vm3, %v1325_v6, %v1321_v61  ;;  %v1331_v28 = vmul.f32 %v4426_v50, %v1330_v26  ;;  %v1535_v32 = vrot.slane %v9046_v27, 1  ;;  %v9047_v47 = vld [vmem:[#allocation18_spill] sm:$0xff]  ;;  %v3943_v61 = vld [vmem:[%s8826_s4 + $0x70] sm:$0xff]  ;;  %vm9060_vm11 = vmmov %vm9048_vm1 }
 0x298   : > { %4108 = vrot.lane.b32.xlu2 %v4107_v31, %s4568_s28  ;;  %v6348_v22 = vmul.f32 %v1326_v17, %v6118_v15  ;;  %v1536_v60 = vrot.slane %v9047_v47, 1  ;;  %v4132_v44 = vpack.i.bf16 %v9047_v47, %v9046_v27  ;;  %3956 = vmatpush.bf16.msra.mxu3 %v3943_v61  ;;  %v3942_v17 = vld [vmem:[%s8826_s4 + $0x68] sm:$0xff]  ;;  %v3939_v47 = vld [vmem:[%s8826_s4 + $0x50] sm:$0xff]  ;;  %vm9061_vm3 = vmmov %vm9048_vm1 }
 0x299   : > { %v1332_v58 = vadd.f32 %v4426_v50, %v1331_v28  ;;  %3949 = vmatpush.bf16.msra.mxu2 %v3934_v1  ;;  %v3933_v28 = vld [vmem:[%s8826_s4 + $0x20] sm:$0xff]  ;;  %2391 = vmatpush.bf16.msra.mxu1 %v3934_v1  ;;  %vm9062_vm5 = vmmov %vm9048_vm1 }
 0x29a   : > { %v1550_v15 = vrot.slane %v6348_v22, 1  ;;  %v8863_v37 = vrot.slane %v6348_v22, 7  ;;  %v1537_v33 = vsel %vm1504_vm9, %v1535_v32, %v1536_v60  ;;  %v1579_v36 = vsel %vm1504_vm9, %v1536_v60, 0.0  ;;  %v3931_v32 = vld [vmem:[%s8826_s4 + $0x10] sm:$0xff]  ;;  %v3930_v60 = vld [vmem:[%s8826_s4 + $0x8] sm:$0xff]  ;;  %vm9065_vm10 = vmmov %vm9048_vm1 }
 0x29b   : > { %v1336_v8 = vsel %vm1335_vm12, %v4426_v50, %v1332_v58  ;;  %v4137_v26 = vpack.i.bf16 %v1579_v36, %v1537_v33  ;;  %v6401_v58 = vld [vmem:[%s8826_s4 + $0x88] sm:$0xff]  ;;  %vm9066_vm12 = vmmov %vm9048_vm1 }
 0x29c   : > { %v1341_v5 = vsel %vm1338_vm15, %v1340_v3, %v1336_v8  ;;  %3957 = vmatpush.bf16.msra.mxu3 %v3942_v17  ;;  %2573 = vmatpush.bf16.msra.mxu0 %v6401_v58  ;;  %v3940_v3 = vld [vmem:[%s8826_s4 + $0x58] sm:$0xff]  ;;  %v6413_v8 = vld [vmem:[%s8826_s4 + $0x80] sm:$0xff]  ;;  %vm9067_vm15 = vmmov %vm9048_vm1 }
 0x29d   : > { %v6355_v42 = vmul.f32 %v1341_v5, %v6151_v63  ;;  %3950 = vmatpush.bf16.msra.mxu2 %v3933_v28  ;;  %2392 = vmatpush.bf16.msra.mxu1 %v3933_v28  ;;  %v3938_v5 = vld [vmem:[%s8826_s4 + $0x48] sm:$0xff] }
 0x29f   : > { %4118 = vrot.lane.b32.xlu1 %v4117_v62, %s4568_s28  ;;  %v1551_v54 = vrot.slane %v6355_v42, 1  ;;  %v1454_v50 = vrot.slane %v6355_v42, 7  ;;  %v3932_v62 = vld [vmem:[%s8826_s4 + $0x18] sm:$0xff] }
 0x2a0   : > { %4123 = vrot.lane.b32.xlu2 %v4107_v31, %s4569_s14  ;;  %3958 = vmatpush.bf16.msra.mxu3 %v3941_v45 }
 0x2a1   : > { %v6364_v12 = vsel %vm1504_vm9, %v1550_v15, %v1551_v54  ;;  %v6367_v31 = vsel %vm1504_vm9, %v1551_v54, 0.0  ;;  %v6372_v63 = vsel %vm1407_vm0, %v8863_v37, %v1454_v50  ;;  %3951 = vmatpush.bf16.msra.mxu2 %v3932_v62  ;;  %2393 = vmatpush.bf16.msra.mxu1 %v3932_v62  ;;  %v3929_v15 = vld [vmem:[%s8826_s4] sm:$0xff] }
 0x2a2   : > { %2574 = vmatpush.bf16.msra.mxu0 %v6413_v8  ;;  %v3937_v54 = vld [vmem:[%s8826_s4 + $0x40] sm:$0xff] }
 0x2a4   : > { %3959 = vmatpush.bf16.msra.mxu3 %v3940_v3 }
 0x2a5   : > { %3952 = vmatpush.bf16.msra.mxu2 %v3931_v32  ;;  %2394 = vmatpush.bf16.msra.mxu1 %v3931_v32 }
 0x2a7   : > { %4133 = vrot.lane.b32.xlu1 %v4132_v44, %s4567_s27 }
 0x2a8   : > { %4138 = vrot.lane.b32.xlu2 %v4137_v26, %s4568_s28  ;;  %3960 = vmatpush.bf16.msra.mxu3 %v3939_v47 }
 0x2a9   : > { %3953 = vmatpush.bf16.msra.mxu2 %v3930_v60  ;;  %2395 = vmatpush.bf16.msra.mxu1 %v3930_v60 }
 0x2ac   : > { %3961 = vmatpush.bf16.msra.mxu3 %v3938_v5 }
 0x2ad   : > { %3954 = vmatpush.bf16.msra.mxu2 %v3929_v15  ;;  %2396 = vmatpush.bf16.msra.mxu1 %v3929_v15 }
 0x2b0   : > { %3962 = vmatpush.bf16.msra.mxu3 %v3937_v54 }
 0x2b1   : > { %2478 = vmatpush.bf16.msrb.mxu1 %v6260_v19 }
 0x2b5   : > { %2479 = vmatpush.bf16.msrb.mxu1 %v3943_v61 }
 0x2b9   : > { %2480 = vmatpush.bf16.msrb.mxu1 %v3942_v17 }
 0x2bd   : > { %2481 = vmatpush.bf16.msrb.mxu1 %v3941_v45 }
 0x2c1   : > { %2482 = vmatpush.bf16.msrb.mxu1 %v3940_v3 }
 0x2c5   : > { %2483 = vmatpush.bf16.msrb.mxu1 %v3939_v47 }
 0x2c9   : > { %2484 = vmatpush.bf16.msrb.mxu1 %v3938_v5 }
 0x2cd   : > { %2485 = vmatpush.bf16.msrb.mxu1 %v3937_v54 }
 0x2d2   : > { %v6435_v50 = vpop.permute.xlu2 %4048 }
 0x2d3   : > { %v4050_v1 = vunpack.i.l.bf16 %v6435_v50  ;;  %v4051_v45 = vunpack.i.h.bf16 %v6435_v50  ;;  %v1541_v50 = vrot.slane %v6134_v11, 1 }
 0x2da   : > { %v4064_v52 = vpop.permute.xlu2 %4063 }
 0x2e1   : > { %v6437_v33 = vpop.permute.xlu1 %4028 }
 0x2e2   : > { %v8871_v36 = vunpack.i.h.bf16 %v6437_v33  ;;  %v8870_v44 = vunpack.i.l.bf16 %v6437_v33  ;;  %v6460_v15 = vpop.permute.xlu2 %4088 }
 0x2e4   : > { %v2147_v26 = vpack.c.bf16 %v8871_v36, %v8870_v44  ;;  %v9057_v44 = vld [vmem:[#allocation3_spill] sm:$0xff] }
 0x2e6   : > { %3875 = vmatmul.msk.bf16.vlgmr.msra.gmra.mxu0 %vm9048_vm1, %v2147_v26 }
 0x2e9   : > { %v6446_v19 = vpop.permute.xlu0 %4053  ;;  %v4044_v61 = vpop.permute.xlu1 %4043 }
 0x2ea   : > { %v4046_v17 = vunpack.i.h.bf16 %v4044_v61  ;;  %v4045_v28 = vunpack.i.l.bf16 %v4044_v61  ;;  %v8865_v26 = vunpack.i.h.bf16 %v6446_v19 }
 0x2ec   : > { %v2087_v62 = vsel %vm2080_vm6, %v6061_v20, %v4045_v28  ;;  %v2088_v3 = vsel %vm2080_vm6, %v6065_v18, %v4046_v17  ;;  %v2119_v32 = vsel %vm8915_vm7, %v4045_v28, %v4050_v1  ;;  %v2120_v60 = vsel %vm8915_vm7, %v4046_v17, %v4051_v45 }
 0x2ed   : > { %v2154_v47 = vpack.c.bf16 %v2088_v3, %v2087_v62  ;;  %v2155_v5 = vpack.c.bf16 %v2120_v60, %v2119_v32  ;;  %v8866_v20 = vunpack.i.l.bf16 %v6446_v19  ;;  %v4066_v28 = vunpack.i.h.bf16 %v4064_v52  ;;  %v9050_v32 = vld [vmem:[#allocation4_spill] sm:$0xff] }
 0x2ee   : > { %v4065_v62 = vunpack.i.l.bf16 %v4064_v52  ;;  %v9049_v3 = vrot.slane %v5664_v4, 7 }
 0x2ef   : > { %2412 = vmatmul.bf16.vlgmr.msra.gmra.mxu2 %v2154_v47  ;;  %2501 = vmatmul.bf16.vlgmr.msra.gmra.mxu3 %v2155_v5  ;;  %v2150_v54 = vpack.c.bf16 %v8865_v26, %v8866_v20 }
 0x2f0   : > { %v1495_v17 = vsel %vm1407_vm0, 0.0, %v9049_v3 }
 0x2f1   : > { %v4069_v18 = vpop.permute.xlu0 %4068  ;;  %v4059_v61 = vpop.permute.xlu1 %4058 }
 0x2f2   : > { %v4061_v37 = vunpack.i.h.bf16 %v4059_v61  ;;  %v4060_v29 = vunpack.i.l.bf16 %v4059_v61  ;;  %v4071_v52 = vunpack.i.h.bf16 %v4069_v18  ;;  %v4070_v4 = vunpack.i.l.bf16 %v4069_v18 }
 0x2f4   : > { %v1808_v47 = vsel %vm9051_vm14, %v9050_v32, %v4061_v37  ;;  %v1807_v60 = vsel %vm9052_vm2, %v1495_v17, %v4060_v29  ;;  %v4094_v37 = vpop.permute.xlu2 %4093  ;;  %v2090_v18 = vsel %vm2080_vm6, %v6021_v14, %v4071_v52  ;;  %v8873_v32 = vunpack.i.l.bf16 %v6460_v15  ;;  %vm9070_vm14 = vmmov %vm9048_vm1 }
 0x2f5   : > { %v6475_v5 = vsel %vm8915_vm7, %v1807_v60, %v4065_v62  ;;  %v6478_v61 = vsel %vm8915_vm7, %v1808_v47, %v4066_v28  ;;  %v2089_v28 = vsel %vm2080_vm6, %v6018_v35, %v4070_v4  ;;  %v4096_v6 = vunpack.i.h.bf16 %v4094_v37  ;;  %vm9071_vm2 = vmmov %vm9048_vm1 }
 0x2f6   : > { %3876 = vmatmul.msk.bf16.gmra.mxu0 %vm9053_vm8, %v2150_v54  ;;  %v4127_v3 = vpack.i.bf16 %v6478_v61, %v6475_v5  ;;  %v8872_v54 = vunpack.i.h.bf16 %v6460_v15  ;;  %v2157_v47 = vpack.c.bf16 %v2090_v18, %v2089_v28  ;;  %v4095_v46 = vunpack.i.l.bf16 %v4094_v37  ;;  %vm9072_vm8 = vmmov %vm9048_vm1 }
 0x2f7   : > { %v1794_v36 = vsel %vm9058_vm4, %v9057_v44, %v4096_v6  ;;  %v4157_v44 = vpack.i.bf16 %v6130_v16, %v6121_v10  ;;  %vm9075_vm4 = vmmov %vm9048_vm1 }
 0x2f8   : > { %4128 = vrot.lane.b32.xlu0 %v4127_v3, %s4568_s28  ;;  %v2153_v14 = vpack.c.bf16 %v8872_v54, %v8873_v32  ;;  %v9059_v54 = vld [vmem:[#allocation16_spill] sm:$0xff] }
 0x2f9   : > { %v4074_v26 = vpop.permute.xlu0 %4073  ;;  %v6484_v20 = vpop.permute.xlu1 %4078 }
 0x2fa   : > { %v4081_v29 = vunpack.i.h.bf16 %v6484_v20  ;;  %v4080_v62 = vunpack.i.l.bf16 %v6484_v20  ;;  %v4076_v35 = vunpack.i.h.bf16 %v4074_v26  ;;  %v4075_v24 = vunpack.i.l.bf16 %v4074_v26 }
 0x2fb   : > { %v1548_v20 = vrot.slane %v6295_v56, 1 }
 0x2fc   : > { %v2121_v17 = vsel %vm8915_vm7, %v4070_v4, %v4080_v62  ;;  %v2122_v60 = vsel %vm8915_vm7, %v4071_v52, %v4081_v29  ;;  %v9054_v4 = vrot.slane %v9034_v59, 7  ;;  %v9055_v52 = vrot.slane %v5679_v30, 7  ;;  %v6517_v32 = vpop.permute.xlu2 %4108 }
 0x2fd   : > { %v2158_v25 = vpack.c.bf16 %v2122_v60, %v2121_v17  ;;  %v1810_v59 = vsel %vm9060_vm11, %v9059_v54, %v4076_v35  ;;  %v1538_v54 = vrot.slane %v6121_v10, 1  ;;  %v1539_v35 = vrot.slane %v6130_v16, 1  ;;  %vm9076_vm11 = vmmov %vm9048_vm1 }
 0x2fe   : > { %v1488_v28 = vsel %vm1407_vm0, 0.0, %v9054_v4  ;;  %v1496_v18 = vsel %vm1407_vm0, 0.0, %v9055_v52 }
 0x2ff   : > { %2417 = vmatmul.bf16.gmra.mxu2 %v2157_v47  ;;  %2506 = vmatmul.bf16.gmra.mxu3 %v2158_v25  ;;  %v1809_v4 = vsel %vm9061_vm3, %v1496_v18, %v4075_v24  ;;  %vm9078_vm3 = vmmov %vm9048_vm1 }
 0x300   : > { %4143 = vrot.lane.b32.xlu0 %v4127_v3, %s4569_s14  ;;  %v1793_v3 = vsel %vm9056_vm13, %v1488_v28, %v4095_v46  ;;  %vm3870_vm13 = vmneg %vm2080_vm6 }
 0x301   : > { %v4084_v37 = vpop.permute.xlu1 %4083  ;;  %v4099_v17 = vpop.permute.xlu0 %4098 }
 0x302   : > { %v4086_v26 = vunpack.i.h.bf16 %v4084_v37  ;;  %v4085_v47 = vunpack.i.l.bf16 %v4084_v37  ;;  %v4101_v25 = vunpack.i.h.bf16 %v4099_v17  ;;  %v4100_v60 = vunpack.i.l.bf16 %v4099_v17 }
 0x303   : > { %v1540_v17 = vsel %vm1504_vm9, %v1538_v54, %v1539_v35 }
 0x304   : > { %v6520_v30 = vsel %vm8915_vm7, %v1809_v4, %v4085_v47  ;;  %v6523_v52 = vsel %vm8915_vm7, %v1810_v59, %v4086_v26  ;;  %v6526_v37 = vsel %vm8915_vm7, %v1793_v3, %v4100_v60  ;;  %v6529_v46 = vsel %vm8915_vm7, %v1794_v36, %v4101_v25 }
 0x305   : > { %v4147_v6 = vpack.i.bf16 %v6523_v52, %v6520_v30  ;;  %v4152_v24 = vpack.i.bf16 %v6529_v46, %v6526_v37  ;;  %v4111_v26 = vunpack.i.h.bf16 %v6517_v32  ;;  %v4110_v47 = vunpack.i.l.bf16 %v6517_v32 }
 0x306   : > { %3877 = vmatmul.msk.bf16.gmra.mxu0 %vm9062_vm5, %v2153_v14  ;;  %v1580_v14 = vsel %vm1504_vm9, %v1539_v35, 0.0  ;;  %v9073_v32 = vunpack.i.h.bf16 %v6437_v33  ;;  %vm9079_vm5 = vmmov %vm9048_vm1 }
 0x307   : > { %4148 = vrot.lane.b32.xlu1 %v4147_v6, %s4568_s28  ;;  %4153 = vrot.lane.b32.xlu2 %v4152_v24, %s4569_s14  ;;  %v4162_v3 = vpack.i.bf16 %v1580_v14, %v1540_v17 }
 0x308   : > { %4158 = vrot.lane.b32.xlu0 %v4157_v44, %s4567_s27  ;;  %v6557_v44 = vpop.permute.xlu2 %4123 }
 0x309   : > { %v4104_v36 = vpop.permute.xlu1 %4103  ;;  %v4114_v25 = vpop.permute.xlu0 %4113 }
 0x30a   : > { %v4106_v28 = vunpack.i.h.bf16 %v4104_v36  ;;  %v4105_v18 = vunpack.i.l.bf16 %v4104_v36  ;;  %v4116_v35 = vunpack.i.h.bf16 %v4114_v25  ;;  %v4115_v36 = vunpack.i.l.bf16 %v4114_v25 }
 0x30b   : > { %v2156_v25 = vpack.c.bf16 %v4051_v45, %v4050_v1  ;;  %v1542_v1 = vrot.slane %v6141_v40, 1 }
 0x30c   : > { %v2091_v16 = vsel %vm2080_vm6, %v6076_v9, %v4105_v18  ;;  %v2092_v60 = vsel %vm2080_vm6, %v6080_v57, %v4106_v28  ;;  %v2123_v4 = vsel %vm8915_vm7, %v4105_v18, %v4110_v47  ;;  %v2124_v24 = vsel %vm8915_vm7, %v4106_v28, %v4111_v26 }
 0x30d   : > { %v2160_v59 = vpack.c.bf16 %v2092_v60, %v2091_v16  ;;  %v2161_v54 = vpack.c.bf16 %v2124_v24, %v2123_v4  ;;  %v9063_v57 = vrot.slane %v9041_v39, 7  ;;  %v9064_v16 = vld [vmem:[#allocation17_spill] sm:$0xff]  ;;  %v4125_v4 = vunpack.i.l.bf16 %v6557_v44 }
 0x30e   : > { %v1812_v28 = vsel %vm9065_vm10, %v9064_v16, %v4116_v35  ;;  %v4182_v24 = vpack.i.bf16 %v6141_v40, %v6134_v11  ;;  %v9069_v16 = vld [vmem:[#allocation10_spill] sm:$0xff]  ;;  %vm9080_vm10 = vmmov %vm9048_vm1 }
 0x30f   : > { %4163 = vrot.lane.b32.xlu1 %v4162_v3, %s4568_s28  ;;  %2422 = vmatmul.bf16.gmra.mxu2 %v2160_v59  ;;  %v1497_v18 = vsel %vm1407_vm0, 0.0, %v9063_v57  ;;  %v4126_v59 = vunpack.i.h.bf16 %v6557_v44 }
 0x310   : > { %2511 = vmatmul.bf16.gmra.mxu3 %v2161_v54  ;;  %4168 = vrot.lane.b32.xlu2 %v4147_v6, %s4569_s14  ;;  %v1811_v60 = vsel %vm9066_vm12, %v1497_v18, %v4115_v36  ;;  %v4139_v45 = vpop.permute.xlu2 %4138  ;;  %v9068_v54 = vrot.slane %v9046_v27, 7  ;;  %v1581_v27 = vsel %vm1504_vm9, %v1542_v1, 0.0  ;;  %vm9082_vm12 = vmmov %vm9048_vm1 }
 0x311   : > { %v4119_v9 = vpop.permute.xlu1 %4118  ;;  %v2094_v40 = vsel %vm2080_vm6, %v6188_v48, %v4126_v59  ;;  %v4141_v18 = vunpack.i.h.bf16 %v4139_v45 }
 0x312   : > { %v4121_v17 = vunpack.i.h.bf16 %v4119_v9  ;;  %v4120_v14 = vunpack.i.l.bf16 %v4119_v9  ;;  %v1498_v35 = vsel %vm1407_vm0, 0.0, %v9068_v54 }
 0x314   : > { %v6572_v3 = vsel %vm8915_vm7, %v1811_v60, %v4120_v14  ;;  %v6575_v6 = vsel %vm8915_vm7, %v1812_v28, %v4121_v17  ;;  %v4140_v17 = vunpack.i.l.bf16 %v4139_v45  ;;  %v1543_v14 = vsel %vm1504_vm9, %v1541_v50, %v1542_v1 }
 0x315   : > { %v4172_v39 = vpack.i.bf16 %v6575_v6, %v6572_v3  ;;  %v4187_v54 = vpack.i.bf16 %v1581_v27, %v1543_v14  ;;  %v1544_v50 = vrot.slane %v6280_v23, 1  ;;  %v1545_v1 = vrot.slane %v6292_v53, 1 }
 0x316   : > { %3878 = vmatmul.msk.bf16.gmra.mxu0 %vm9067_vm15, %v2156_v25  ;;  %vm9083_vm15 = vmmov %vm9048_vm1 }
 0x317   : > { %4178 = vrot.lane.b32.xlu1 %v5977_v34, %s4569_s14  ;;  %4173 = vrot.lane.b32.xlu0 %v4172_v39, %s4568_s28  ;;  %v2093_v34 = vsel %vm2080_vm6, %v6185_v51, %v4125_v4  ;;  %v1546_v45 = vsel %vm1504_vm9, %v1544_v50, %v1545_v1 }
 0x318   : > { %4183 = vrot.lane.b32.xlu2 %v4182_v24, %s4567_s27  ;;  %v2163_v25 = vpack.c.bf16 %v2094_v40, %v2093_v34  ;;  %v1547_v34 = vrot.slane %v6289_v0, 1 }
 0x319   : > { %v4134_v36 = vpop.permute.xlu1 %4133 }
 0x31a   : > { %v4136_v9 = vunpack.i.h.bf16 %v4134_v36  ;;  %v4135_v57 = vunpack.i.l.bf16 %v4134_v36  ;;  %v2159_v36 = vpack.c.bf16 %v4081_v29, %v4080_v62  ;;  %v1583_v29 = vsel %vm1504_vm9, %v1548_v20, 0.0 }
 0x31c   : > { %v1814_v28 = vsel %vm9048_vm1, %v9069_v16, %v4136_v9  ;;  %v1813_v60 = vsel %vm9070_vm14, %v1498_v35, %v4135_v57  ;;  %v1582_v35 = vsel %vm1504_vm9, %v1545_v1, 0.0  ;;  %v4227_v57 = vpack.i.bf16 %v6295_v56, %v6289_v0  ;;  %vm9086_vm14 = vmmov %vm9048_vm1 }
 0x31d   : > { %v6607_v24 = vsel %vm8915_vm7, %v1813_v60, %v4140_v17  ;;  %v6610_v51 = vsel %vm8915_vm7, %v1814_v28, %v4141_v18  ;;  %v4212_v9 = vpack.i.bf16 %v1582_v35, %v1546_v45  ;;  %v4247_v56 = vpack.i.bf16 %v6355_v42, %v6348_v22 }
 0x31e   : > { %v4197_v48 = vpack.i.bf16 %v6610_v51, %v6607_v24 }
 0x31f   : > { %2427 = vmatmul.bf16.gmra.mxu2 %v2163_v25  ;;  %4193 = vrot.lane.b32.xlu1 %v4172_v39, %s4569_s14  ;;  %v4207_v39 = vpack.i.bf16 %v6292_v53, %v6280_v23  ;;  %v1549_v53 = vsel %vm1504_vm9, %v1547_v34, %v1548_v20  ;;  %vm3872_vm9 = vmpackc.low %vm3870_vm13, %vm3870_vm13 }
 0x320   : > { %4188 = vrot.lane.b32.xlu0 %v4187_v54, %s4568_s28  ;;  %4198 = vrot.lane.b32.xlu2 %v4197_v48, %s4568_s28  ;;  %v4232_v62 = vpack.i.bf16 %v1583_v29, %v1549_v53  ;;  %vm9090_vm13 = vmmov %vm9048_vm1 }
 0x326   : > { %3879 = vmatmul.msk.bf16.gmra.mxu0 %vm9071_vm2, %v2159_v36  ;;  %vm9087_vm2 = vmmov %vm9048_vm1 }
 0x327   : > { %4208 = vrot.lane.b32.xlu1 %v4207_v39, %s4567_s27 }
 0x328   : > { %4203 = vrot.lane.b32.xlu0 %v6072_v2, %s4569_s14  ;;  %4213 = vrot.lane.b32.xlu2 %v4212_v9, %s4568_s28  ;;  %v2162_v2 = vpack.c.bf16 %v4111_v26, %v4110_v47  ;;  %v9074_v47 = vunpack.i.l.bf16 %v6437_v33 }
 0x330   : > { %4218 = vrot.lane.b32.xlu0 %v4197_v48, %s4569_s14  ;;  %4228 = vrot.lane.b32.xlu2 %v4227_v57, %s4567_s27 }
 0x336   : > { %3880 = vmatmul.msk.bf16.gmra.mxu0 %vm9072_vm8, %v2162_v2  ;;  %vm9089_vm8 = vmmov %vm9048_vm1 }
 0x338   : > { %4233 = vrot.lane.b32.xlu0 %v4232_v62, %s4568_s28 }
 0x340   : > { %4248 = vrot.lane.b32.xlu0 %v4247_v56, %s4567_s27 }
 0x361   : > { %v4154_v40 = vpop.permute.xlu2 %4153 }
 0x362   : > { %v4156_v18 = vunpack.i.h.bf16 %v4154_v40  ;;  %v4155_v17 = vunpack.i.l.bf16 %v4154_v40 }
 0x363   : > { %v6650_v14 = vpop.f32.mrf.mxu0 }
 0x364   : > { %v6655_v26 = vsel %vm8915_vm7, %v4156_v18, %v9073_v32  ;;  %v6660_v27 = vsel %vm8915_vm7, %v4155_v17, %v9074_v47  ;;  %v3873_v42 = vpack.c.bf16 %v4156_v18, %v4155_v17 }
 0x365   : > { %v2146_v16 = vpack.c.bf16 %v6655_v26, %v6660_v27 }
 0x366   : > { %3874 = vmatmul.msk.bf16.vlgmr.msra.gmra.mxu1 %vm3872_vm9, %v3873_v42  ;;  %vm9095_vm9 = vmmov %vm9048_vm1 }
 0x367   : > { %3963 = vmatpush.bf16.msra.mxu1 %v6401_v58  ;;  %v6678_v58 = vld [vmem:[%s8827_s5] ss:$0 sm:$0xff] }
 0x36a   : > { %v4129_v28 = vpop.permute.xlu0 %4128  ;;  %v4169_v62 = vpop.permute.xlu2 %4168 }
 0x36b   : > { %v4131_v60 = vunpack.i.h.bf16 %v4129_v28  ;;  %v4130_v25 = vunpack.i.l.bf16 %v4129_v28  ;;  %v6665_v54 = vpop.f32.mrf.mxu0  ;;  %3964 = vmatpush.bf16.msra.mxu1 %v6413_v8  ;;  %v4171_v28 = vunpack.i.h.bf16 %v4169_v62 }
 0x36d   : > { %v2165_v48 = vpack.c.bf16 %v4131_v60, %v4130_v25  ;;  %v2125_v33 = vsel %vm8915_vm7, %v4125_v4, %v4130_v25  ;;  %v2126_v50 = vsel %vm8915_vm7, %v4126_v59, %v4131_v60  ;;  %v4170_v60 = vunpack.i.l.bf16 %v4169_v62 }
 0x36e   : > { %v2164_v1 = vpack.c.bf16 %v2126_v50, %v2125_v33 }
 0x36f   : > { %3881 = vmatmul.msk.bf16.gmra.mxu0 %vm9075_vm4, %v2165_v48  ;;  %v9077_v48 = vrot.slane %v6121_v10, 7  ;;  %vm9097_vm4 = vmmov %vm9048_vm1 }
 0x370   : > { %2516 = vmatmul.bf16.gmra.mxu3 %v2164_v1 }
 0x371   : > { %v1499_v33 = vsel %vm1407_vm0, 0.0, %v9077_v48 }
 0x372   : > { %v2413_v45 = vpop.f32.mrf.mxu2  ;;  %v2502_v35 = vpop.f32.mrf.mxu3 }
 0x373   : > { %v2414_v8 = vadd.f32 %v6678_v58, %v2413_v45  ;;  %v4144_v36 = vpop.permute.xlu0 %4143  ;;  %v6681_v9 = vpop.f32.mrf.mxu0 }
 0x374   : > { %v4146_v39 = vunpack.i.h.bf16 %v4144_v36  ;;  %v4145_v4 = vunpack.i.l.bf16 %v4144_v36 }
 0x375   : > { %v6683_v44 = vadd.f32 %v2502_v35, %v2414_v8 }
 0x376   : > { %v2095_v59 = vsel %vm2080_vm6, %v6314_v41, %v4145_v4  ;;  %v2096_v57 = vsel %vm2080_vm6, %v6317_v49, %v4146_v39 }
 0x377   : > { %v2166_v34 = vpack.c.bf16 %v2096_v57, %v2095_v59  ;;  %v2097_v57 = vsel %vm2080_vm6, %v6475_v5, %v4170_v60 }
 0x379   : > { %2432 = vmatmul.bf16.gmra.mxu2 %v2166_v34  ;;  %v4149_v20 = vpop.permute.xlu1 %4148  ;;  %v2098_v34 = vsel %vm2080_vm6, %v6478_v61, %v4171_v28 }
 0x37a   : > { %v4151_v53 = vunpack.i.h.bf16 %v4149_v20  ;;  %v4150_v29 = vunpack.i.l.bf16 %v4149_v20  ;;  %v6689_v2 = vpop.f32.mrf.mxu2  ;;  %v6691_v56 = vpop.f32.mrf.mxu3 }
 0x37b   : > { %v4159_v18 = vpop.permute.xlu0 %4158  ;;  %v6693_v17 = vpop.f32.mrf.mxu0 }
 0x37c   : > { %v2168_v40 = vpack.c.bf16 %v4151_v53, %v4150_v29  ;;  %v2127_v32 = vsel %vm8915_vm7, %v4145_v4, %v4150_v29  ;;  %v2128_v41 = vsel %vm8915_vm7, %v4146_v39, %v4151_v53  ;;  %v4161_v49 = vunpack.i.h.bf16 %v4159_v18 }
 0x37d   : > { %v2167_v47 = vpack.c.bf16 %v2128_v41, %v2127_v32  ;;  %v4160_v42 = vunpack.i.l.bf16 %v4159_v18  ;;  %v2169_v29 = vpack.c.bf16 %v2098_v34, %v2097_v57 }
 0x37e   : > { %v1816_v8 = vsel %vm9078_vm3, %v6232_v55, %v4161_v49  ;;  %v4184_v55 = vpop.permute.xlu2 %4183 }
 0x37f   : > { %3882 = vmatmul.msk.bf16.gmra.mxu0 %vm9076_vm11, %v2168_v40  ;;  %v1815_v35 = vsel %vm9079_vm5, %v1499_v33, %v4160_v42  ;;  %v4185_v57 = vunpack.i.l.bf16 %v4184_v55  ;;  %vm9098_vm11 = vmmov %vm9048_vm1 }
 0x380   : > { %2521 = vmatmul.bf16.gmra.mxu3 %v2167_v47 }
 0x381   : > { %v4164_v25 = vpop.permute.xlu1 %4163 }
 0x382   : > { %v4166_v50 = vunpack.i.h.bf16 %v4164_v25  ;;  %v4165_v1 = vunpack.i.l.bf16 %v4164_v25  ;;  %v2418_v45 = vpop.f32.mrf.mxu2  ;;  %v2507_v39 = vpop.f32.mrf.mxu3 }
 0x383   : > { %v2419_v36 = vadd.f32 %v6678_v58, %v2418_v45  ;;  %v6705_v4 = vpop.f32.mrf.mxu0 }
 0x384   : > { %v6708_v59 = vsel %vm8915_vm7, %v1815_v35, %v4165_v1  ;;  %v6711_v10 = vsel %vm8915_vm7, %v1816_v8, %v4166_v50 }
 0x385   : > { %v6717_v20 = vadd.f32 %v2507_v39, %v2419_v36  ;;  %v4222_v53 = vpack.i.bf16 %v6711_v10, %v6708_v59  ;;  %v4186_v39 = vunpack.i.h.bf16 %v4184_v55 }
 0x386   : > { %v4199_v35 = vpop.permute.xlu2 %4198 }
 0x387   : > { %4223 = vrot.lane.b32.xlu1 %v4222_v53, %s4568_s28 }
 0x389   : > { %2437 = vmatmul.bf16.gmra.mxu2 %v2169_v29  ;;  %v6722_v62 = vpop.permute.xlu1 %4178  ;;  %v4174_v40 = vpop.permute.xlu0 %4173 }
 0x38a   : > { %v4181_v18 = vunpack.i.h.bf16 %v6722_v62  ;;  %v4180_v5 = vunpack.i.l.bf16 %v6722_v62  ;;  %v4176_v32 = vunpack.i.h.bf16 %v4174_v40  ;;  %v4175_v41 = vunpack.i.l.bf16 %v4174_v40  ;;  %v2420_v61 = vpop.f32.mrf.mxu2  ;;  %v2509_v49 = vpop.f32.mrf.mxu3 }
 0x38b   : > { %v2421_v47 = vadd.f32 %v6678_v58, %v2420_v61  ;;  %v6727_v25 = vpop.f32.mrf.mxu0  ;;  %v9081_v40 = vrot.slane %v6134_v11, 7  ;;  %v1818_v61 = vsel %vm9082_vm12, %v6227_v7, %v4186_v39 }
 0x38c   : > { %v2171_v42 = vpack.c.bf16 %v4176_v32, %v4175_v41  ;;  %v2083_v48 = vsel %vm2080_vm6, %v6526_v37, %v4180_v5  ;;  %v2084_v33 = vsel %vm2080_vm6, %v6529_v46, %v4181_v18  ;;  %v2129_v50 = vsel %vm8915_vm7, %v4170_v60, %v4175_v41 }
 0x38d   : > { %v6738_v1 = vadd.f32 %v2509_v49, %v2421_v47  ;;  %v2148_v45 = vpack.c.bf16 %v2084_v33, %v2083_v48  ;;  %v2130_v8 = vsel %vm8915_vm7, %v4171_v28, %v4176_v32  ;;  %v1500_v41 = vsel %vm1407_vm0, 0.0, %v9081_v40 }
 0x38e   : > { %v2170_v36 = vpack.c.bf16 %v2130_v8, %v2129_v50  ;;  %v1817_v55 = vsel %vm9083_vm15, %v1500_v41, %v4185_v57  ;;  %v9085_v40 = vrot.slane %v6280_v23, 7 }
 0x38f   : > { %4238 = vrot.lane.b32.xlu1 %v4222_v53, %s4569_s14  ;;  %2402 = vmatmul.bf16.gmra.mxu1 %v2148_v45 }
 0x390   : > { %3883 = vmatmul.msk.bf16.gmra.mxu0 %vm9080_vm10, %v2171_v42  ;;  %2526 = vmatmul.bf16.gmra.mxu3 %v2170_v36  ;;  %v4201_v36 = vunpack.i.h.bf16 %v4199_v35  ;;  %v1501_v41 = vsel %vm1407_vm0, 0.0, %v9085_v40 }
 0x391   : > { %v4194_v37 = vpop.permute.xlu1 %4193 }
 0x392   : > { %v4196_v34 = vunpack.i.h.bf16 %v4194_v37  ;;  %v4195_v46 = vunpack.i.l.bf16 %v4194_v37  ;;  %v4189_v29 = vpop.permute.xlu0 %4188  ;;  %v2423_v60 = vpop.f32.mrf.mxu2 }
 0x393   : > { %v4191_v28 = vunpack.i.h.bf16 %v4189_v29  ;;  %v4190_v32 = vunpack.i.l.bf16 %v4189_v29  ;;  %v2424_v53 = vadd.f32 %v6678_v58, %v2423_v60  ;;  %v2512_v47 = vpop.f32.mrf.mxu3  ;;  %v2591_v49 = vpop.f32.mrf.mxu0 }
 0x394   : > { %v2099_v42 = vsel %vm2080_vm6, %v6520_v30, %v4195_v46  ;;  %v2100_v48 = vsel %vm2080_vm6, %v6523_v52, %v4196_v34  ;;  %v6757_v33 = vadd.f32 %v2591_v49, %v6683_v44  ;;  %v4200_v30 = vunpack.i.l.bf16 %v4199_v35  ;;  %v4214_v44 = vpop.permute.xlu2 %4213 }
 0x395   : > { %v6754_v11 = vadd.f32 %v2512_v47, %v2424_v53  ;;  %v6760_v50 = vsel %vm8915_vm7, %v1817_v55, %v4190_v32  ;;  %v6763_v7 = vsel %vm8915_vm7, %v1818_v61, %v4191_v28  ;;  %v2172_v8 = vpack.c.bf16 %v2100_v48, %v2099_v42 }
 0x396   : > { %v4242_v45 = vpack.i.bf16 %v6763_v7, %v6760_v50  ;;  %v9084_v52 = vpack.i.bf16 %v6367_v31, %v6364_v12  ;;  %v2174_v60 = vpack.c.bf16 %v4201_v36, %v4200_v30  ;;  %v4216_v12 = vunpack.i.h.bf16 %v4214_v44 }
 0x397   : > { %v4215_v31 = vunpack.i.l.bf16 %v4214_v44  ;;  %v2131_v47 = vsel %vm8915_vm7, %v4195_v46, %v4200_v30  ;;  %v2132_v49 = vsel %vm8915_vm7, %v4196_v34, %v4201_v36 }
 0x398   : > { %4253 = vrot.lane.b32.xlu1 %v9084_v52, %s4568_s28  ;;  %4243 = vrot.lane.b32.xlu2 %v4242_v45, %s4568_s28 }
 0x399   : > { %2442 = vmatmul.bf16.gmra.mxu2 %v2172_v8  ;;  %v4209_v39 = vpop.permute.xlu1 %4208 }
 0x39a   : > { %v4211_v57 = vunpack.i.h.bf16 %v4209_v39  ;;  %v4210_v37 = vunpack.i.l.bf16 %v4209_v39  ;;  %v6772_v29 = vpop.permute.xlu0 %4203 }
 0x39b   : > { %v4206_v35 = vunpack.i.h.bf16 %v6772_v29  ;;  %v4205_v28 = vunpack.i.l.bf16 %v6772_v29  ;;  %v6782_v61 = vpop.f32.mrf.mxu0 }
 0x39c   : > { %v1820_v32 = vsel %vm9048_vm1, %v6331_v43, %v4211_v57  ;;  %v1819_v53 = vsel %vm9086_vm14, %v1501_v41, %v4210_v37  ;;  %v4229_v30 = vpop.permute.xlu2 %4228 }
 0x39d   : > { %v2085_v55 = vsel %vm2080_vm6, %v5968_v21, %v4205_v28  ;;  %v2086_v23 = vsel %vm2080_vm6, %v5971_v38, %v4206_v35  ;;  %v6791_v48 = vsel %vm8915_vm7, %v1819_v53, %v4215_v31  ;;  %v6794_v43 = vsel %vm8915_vm7, %v1820_v32, %v4216_v12 }
 0x39e   : > { %v2151_v42 = vpack.c.bf16 %v2086_v23, %v2085_v55  ;;  %v4267_v8 = vpack.i.bf16 %v6794_v43, %v6791_v48  ;;  %v2173_v21 = vpack.c.bf16 %v2132_v49, %v2131_v47  ;;  %v4231_v57 = vunpack.i.h.bf16 %v4229_v30  ;;  %v2514_v47 = vpop.f32.mrf.mxu3 }
 0x39f   : > { %v4230_v37 = vunpack.i.l.bf16 %v4229_v30  ;;  %v9094_v30 = vunpack.i.h.bf16 %v6460_v15 }
 0x3a0   : > { %3884 = vmatmul.msk.bf16.gmra.mxu0 %vm9087_vm2, %v2174_v60  ;;  %4258 = vrot.lane.b32.xlu2 %v4242_v45, %s4569_s14  ;;  %v9088_v60 = vrot.slane %v6289_v0, 7 }
 0x3a1   : > { %2407 = vmatmul.bf16.gmra.mxu1 %v2151_v42  ;;  %4268 = vrot.lane.b32.xlu1 %v4267_v8, %s4569_s14 }
 0x3a2   : > { %4263 = vrot.lane.b32.xlu0 %v4267_v8, %s4568_s28  ;;  %2531 = vmatmul.bf16.gmra.mxu3 %v2173_v21  ;;  %v6802_v38 = vpop.permute.xlu0 %4218  ;;  %v1502_v40 = vsel %vm1407_vm0, 0.0, %v9088_v60  ;;  %v9091_v8 = vunpack.i.l.bf16 %v6446_v19 }
 0x3a3   : > { %v4221_v34 = vunpack.i.h.bf16 %v6802_v38  ;;  %v4220_v46 = vunpack.i.l.bf16 %v6802_v38  ;;  %v2596_v36 = vpop.f32.mrf.mxu0  ;;  %v1821_v31 = vsel %vm9090_vm13, %v1502_v40, %v4230_v37  ;;  %v9092_v38 = vunpack.i.h.bf16 %v6446_v19 }
 0x3a4   : > { %v6807_v52 = vadd.f32 %v2596_v36, %v6717_v20  ;;  %v1822_v20 = vsel %vm9089_vm8, %v6326_v13, %v4231_v57  ;;  %v2425_v13 = vpop.f32.mrf.mxu2  ;;  %v2115_v21 = vsel %vm8915_vm7, %v4180_v5, %v9091_v8  ;;  %v4570_v5 = vmov 0.0  }
 0x3a5   : > { %v2101_v45 = vsel %vm2080_vm6, %v6572_v3, %v4220_v46  ;;  %v2102_v44 = vsel %vm2080_vm6, %v6575_v6, %v4221_v34  ;;  %v2426_v23 = vadd.f32 %v6678_v58, %v2425_v13  ;;  %v2116_v26 = vsel %vm8915_vm7, %v4181_v18, %v9092_v38 }
 0x3a6   : > { %v2175_v39 = vpack.c.bf16 %v2102_v44, %v2101_v45  ;;  %v2118_v45 = vsel %vm8915_vm7, %v4206_v35, %v9094_v30 }
 0x3a7   : > { %v2515_v49 = vadd.f32 %v2514_v47, %v2426_v23 }
 0x3a9   : > { %2447 = vmatmul.bf16.gmra.mxu2 %v2175_v39 }
 0x3aa   : > { %v4234_v29 = vpop.permute.xlu0 %4233 }
 0x3ab   : > { %v4236_v41 = vunpack.i.h.bf16 %v4234_v29  ;;  %v4235_v12 = vunpack.i.l.bf16 %v4234_v29  ;;  %v2598_v3 = vpop.f32.mrf.mxu0 }
 0x3ac   : > { %v6820_v32 = vadd.f32 %v2598_v3, %v6738_v1  ;;  %v2428_v19 = vpop.f32.mrf.mxu2 }
 0x3ad   : > { %v6823_v6 = vsel %vm8915_vm7, %v1821_v31, %v4235_v12  ;;  %v6826_v53 = vsel %vm8915_vm7, %v1822_v20, %v4236_v41  ;;  %v2429_v18 = vadd.f32 %v6678_v58, %v2428_v19 }
 0x3ae   : > { %v4277_v0 = vpack.i.bf16 %v6826_v53, %v6823_v6 }
 0x3b0   : > { %4278 = vrot.lane.b32.xlu0 %v4277_v0, %s4569_s14  ;;  %4273 = vrot.lane.b32.xlu2 %v4277_v0, %s4568_s28 }
 0x3b1   : > { %2486 = vmatmul.bf16.vlgmr.msrb.gmra.mxu1 %v2146_v16  ;;  %v2149_v16 = vpack.c.bf16 %v2116_v26, %v2115_v21 }
 0x3b2   : > { %v4249_v26 = vpop.permute.xlu0 %4248 }
 0x3b3   : > { %v2601_v1 = vpop.f32.mrf.mxu0 }
 0x3b4   : > { %v6836_v55 = vadd.f32 %v2601_v1, %v6754_v11  ;;  %v9093_v11 = vunpack.i.l.bf16 %v6460_v15  ;;  %v2430_v57 = vpop.f32.mrf.mxu2 }
 0x3b5   : > { %v2431_v15 = vadd.f32 %v6678_v58, %v2430_v57 }
 0x3b6   : > { %v2117_v36 = vsel %vm8915_vm7, %v4205_v28, %v9093_v11 }
 0x3b7   : > { %v2152_v44 = vpack.c.bf16 %v2118_v45, %v2117_v36  ;;  %v4251_v45 = vunpack.i.h.bf16 %v4249_v26 }
 0x3b8   : > { %2047 = vrot.lane.b32.xlu0 %v4570_v5, %s4568_s28 }
 0x3bb   : > { %v2603_v42 = vpop.f32.mrf.mxu0 }
 0x3bc   : > { %v6849_v27 = vadd.f32 %v2603_v42, %v2515_v49 }
 0x3c1   : > { %2491 = vmatmul.bf16.gmra.mxu1 %v2149_v16 }
 0x3d1   : > { %2496 = vmatmul.bf16.gmra.mxu1 %v2152_v44  ;;  %v4250_v44 = vunpack.i.l.bf16 %v4249_v26 }
 0x3ec   : > { %v2606_v62 = vpop.f32.mrf.mxu0 }
 0x3f2   : > { %v4244_v23 = vpop.permute.xlu2 %4243 }
 0x3f3   : > { %v2517_v39 = vpop.f32.mrf.mxu3  ;;  %v4245_v5 = vunpack.i.l.bf16 %v4244_v23  ;;  %v4246_v19 = vunpack.i.h.bf16 %v4244_v23 }
 0x3f4   : > { %v2518_v37 = vadd.f32 %v2517_v39, %v2429_v18  ;;  %v2608_v60 = vpop.f32.mrf.mxu0 }
 0x3f6   : > { %v6859_v29 = vadd.f32 %v2606_v62, %v2518_v37  ;;  %v9096_v62 = vrot.slane %v6348_v22, 7 }
 0x3f8   : > { %v1503_v18 = vsel %vm1407_vm0, 0.0, %v9096_v62  ;;  %vm9099_vm0 = vmmov %vm9048_vm1 }
 0x3f9   : > { %v4224_v28 = vpop.permute.xlu1 %4223  ;;  %vm9100_vm3 = vmmov %vm9099_vm0 }
 0x3fa   : > { %v4226_v40 = vunpack.i.h.bf16 %v4224_v28  ;;  %v4225_v35 = vunpack.i.l.bf16 %v4224_v28  ;;  %v1824_v28 = vsel %vm9097_vm4, %v6372_v63, %v4251_v45  ;;  %vm9101_vm5 = vmmov %vm9099_vm0 }
 0x3fb   : > { %v2519_v41 = vpop.f32.mrf.mxu3  ;;  %vm9103_vm10 = vmmov %vm9099_vm0 }
 0x3fc   : > { %v2177_v12 = vpack.c.bf16 %v4226_v40, %v4225_v35  ;;  %v2433_v20 = vpop.f32.mrf.mxu2  ;;  %v2520_v31 = vadd.f32 %v2519_v41, %v2431_v15  ;;  %v2133_v3 = vsel %vm8915_vm7, %v4220_v46, %v4225_v35  ;;  %v2134_v0 = vsel %vm8915_vm7, %v4221_v34, %v4226_v40  ;;  %v2611_v21 = vpop.f32.mrf.mxu0 }
 0x3fd   : > { %v2176_v13 = vpack.c.bf16 %v2134_v0, %v2133_v3  ;;  %v2434_v49 = vadd.f32 %v6678_v58, %v2433_v20  ;;  %v1823_v15 = vsel %vm9098_vm11, %v1503_v18, %v4250_v44  ;;  %v4259_v40 = vpop.permute.xlu2 %4258  ;;  %v2180_v41 = vpack.c.bf16 %v4246_v19, %v4245_v5 }
 0x3fe   : > { %v6864_v1 = vadd.f32 %v2608_v60, %v2520_v31  ;;  %3885 = vmatmul.msk.bf16.gmra.mxu0 %vm9095_vm9, %v2177_v12  ;;  %v4261_v23 = vunpack.i.h.bf16 %v4259_v40 }
 0x3ff   : > { %2536 = vmatmul.bf16.gmra.mxu3 %v2176_v13 }
 0x401   : > { %v4239_v47 = vpop.permute.xlu1 %4238 }
 0x402   : > { %v4241_v42 = vunpack.i.h.bf16 %v4239_v47  ;;  %v4240_v8 = vunpack.i.l.bf16 %v4239_v47  ;;  %v4260_v47 = vunpack.i.l.bf16 %v4259_v40 }
 0x403   : > { %v2522_v38 = vpop.f32.mrf.mxu3 }
 0x404   : > { %v2435_v16 = vpop.f32.mrf.mxu2  ;;  %v2523_v11 = vadd.f32 %v2522_v38, %v2434_v49  ;;  %v2103_v34 = vsel %vm2080_vm6, %v6607_v24, %v4240_v8  ;;  %v2104_v46 = vsel %vm2080_vm6, %v6610_v51, %v4241_v42  ;;  %v2135_v57 = vsel %vm8915_vm7, %v4240_v8, %v4245_v5  ;;  %v2613_v31 = vpop.f32.mrf.mxu0 }
 0x405   : > { %v2178_v36 = vpack.c.bf16 %v2104_v46, %v2103_v34  ;;  %v2436_v24 = vadd.f32 %v6678_v58, %v2435_v16  ;;  %v2136_v51 = vsel %vm8915_vm7, %v4241_v42, %v4246_v19  ;;  %v2105_v63 = vsel %vm2080_vm6, %v6708_v59, %v4260_v47 }
 0x406   : > { %v6872_v30 = vadd.f32 %v2611_v21, %v2523_v11  ;;  %v2179_v13 = vpack.c.bf16 %v2136_v51, %v2135_v57  ;;  %v2106_v42 = vsel %vm2080_vm6, %v6711_v10, %v4261_v23 }
 0x407   : > { %2452 = vmatmul.bf16.gmra.mxu2 %v2178_v36  ;;  %v2181_v26 = vpack.c.bf16 %v2106_v42, %v2105_v63  ;;  %v2398_v42 = vpop.f32.mrf.mxu1 }
 0x40a   : > { %v4254_v39 = vpop.permute.xlu1 %4253 }
 0x40b   : > { %v4256_v37 = vunpack.i.h.bf16 %v4254_v39  ;;  %v4255_v60 = vunpack.i.l.bf16 %v4254_v39  ;;  %v2524_v35 = vpop.f32.mrf.mxu3 }
 0x40c   : > { %v2525_v22 = vadd.f32 %v2524_v35, %v2436_v24  ;;  %v2438_v3 = vpop.f32.mrf.mxu2 }
 0x40d   : > { %v1856_v12 = vsel %vm8915_vm7, %v1823_v15, %v4255_v60  ;;  %v1857_v20 = vsel %vm8915_vm7, %v1824_v28, %v4256_v37  ;;  %v2439_v8 = vadd.f32 %v6678_v58, %v2438_v3  ;;  %v2616_v46 = vpop.f32.mrf.mxu0  ;;  %v4274_v15 = vpop.permute.xlu2 %4273 }
 0x40e   : > { %v4282_v0 = vpack.i.bf16 %v1857_v20, %v1856_v12  ;;  %v6885_v49 = vadd.f32 %v2613_v31, %v2525_v22  ;;  %3886 = vmatmul.msk.bf16.gmra.mxu0 %vm9099_vm0, %v2180_v41  ;;  %v4276_v22 = vunpack.i.h.bf16 %v4274_v15  ;;  %v4275_v12 = vunpack.i.l.bf16 %v4274_v15 }
 0x40f   : > { %2541 = vmatmul.bf16.gmra.mxu3 %v2179_v13 }
 0x410   : > { %4283 = vrot.lane.b32.xlu1 %v4282_v0, %s4568_s28  ;;  %4288 = vrot.lane.b32.xlu2 %v4282_v0, %s4569_s14  ;;  %v2186_v0 = vpack.c.bf16 %v4276_v22, %v4275_v12 }
 0x413   : > { %v2527_v38 = vpop.f32.mrf.mxu3  ;;  %v4269_v5 = vpop.permute.xlu1 %4268 }
 0x414   : > { %v4264_v21 = vpop.permute.xlu0 %4263  ;;  %v2528_v34 = vadd.f32 %v2527_v38, %v2439_v8  ;;  %v2440_v36 = vpop.f32.mrf.mxu2  ;;  %v4271_v39 = vunpack.i.h.bf16 %v4269_v5  ;;  %v4270_v57 = vunpack.i.l.bf16 %v4269_v5 }
 0x415   : > { %v4266_v16 = vunpack.i.h.bf16 %v4264_v21  ;;  %v4265_v11 = vunpack.i.l.bf16 %v4264_v21  ;;  %v2441_v10 = vadd.f32 %v6678_v58, %v2440_v36  ;;  %v2400_v8 = vpop.f32.mrf.mxu1 }
 0x416   : > { %v6895_v45 = vadd.f32 %v2616_v46, %v2528_v34  ;;  %v2107_v60 = vsel %vm2080_vm6, %v6760_v50, %v4270_v57  ;;  %v2108_v51 = vsel %vm2080_vm6, %v6763_v7, %v4271_v39  ;;  %v2139_v20 = vsel %vm8915_vm7, %v4270_v57, %v4275_v12 }
 0x417   : > { %2457 = vmatmul.bf16.gmra.mxu2 %v2181_v26  ;;  %v2137_v44 = vsel %vm8915_vm7, %v4260_v47, %v4265_v11  ;;  %v2138_v59 = vsel %vm8915_vm7, %v4261_v23, %v4266_v16  ;;  %v2183_v19 = vpack.c.bf16 %v4266_v16, %v4265_v11  ;;  %v2184_v35 = vpack.c.bf16 %v2108_v51, %v2107_v60 }
 0x418   : > { %v2182_v18 = vpack.c.bf16 %v2138_v59, %v2137_v44  ;;  %v2140_v31 = vsel %vm8915_vm7, %v4271_v39, %v4276_v22 }
 0x419   : > { %v2185_v50 = vpack.c.bf16 %v2140_v31, %v2139_v20  ;;  %v6934_v31 = vpop.f32.mrf.mxu0 }
 0x41b   : > { %v2529_v62 = vpop.f32.mrf.mxu3 }
 0x41c   : > { %v6900_v24 = vadd.f32 %v2529_v62, %v2441_v10  ;;  %v2443_v37 = vpop.f32.mrf.mxu2 }
 0x41d   : > { %v2444_v28 = vadd.f32 %v6678_v58, %v2443_v37  ;;  %v2403_v46 = vpop.f32.mrf.mxu1 }
 0x41e   : > { %3887 = vmatmul.msk.bf16.gmra.mxu0 %vm9100_vm3, %v2183_v19 }
 0x41f   : > { %2546 = vmatmul.bf16.gmra.mxu3 %v2182_v18 }
 0x422   : > { %v4279_v3 = vpop.permute.xlu0 %4278 }
 0x423   : > { %v4281_v13 = vunpack.i.h.bf16 %v4279_v3  ;;  %v4280_v23 = vunpack.i.l.bf16 %v4279_v3 }
 0x425   : > { %v2532_v40 = vpop.f32.mrf.mxu3  ;;  %v2109_v7 = vsel %vm2080_vm6, %v6791_v48, %v4280_v23  ;;  %v2110_v47 = vsel %vm2080_vm6, %v6794_v43, %v4281_v13  ;;  %v6921_v48 = vpop.f32.mrf.mxu2 }
 0x426   : > { %v6908_v41 = vadd.f32 %v2532_v40, %v2444_v28  ;;  %v2187_v63 = vpack.c.bf16 %v2110_v47, %v2109_v7  ;;  %v2405_v36 = vpop.f32.mrf.mxu1  ;;  %v2399_v7 = vadd.f32 %v6678_v58, %v2398_v42  ;;  %v2404_v47 = vadd.f32 %v6678_v58, %v2403_v46 }
 0x427   : > { %2462 = vmatmul.bf16.gmra.mxu2 %v2184_v35 }
 0x42a   : > { %v2048_v51 = vpop.permute.xlu0 %2047 }
 0x42b   : > { %v2192_v40 = vpack.c.bf16 %v2048_v51, %v2048_v51 }
 0x42d   : > { %v6923_v43 = vpop.f32.mrf.mxu3  ;;  %v2448_v44 = vpop.f32.mrf.mxu2 }
 0x42e   : > { %3888 = vmatmul.msk.bf16.gmra.mxu0 %vm9101_vm5, %v2186_v0  ;;  %v2449_v59 = vadd.f32 %v6678_v58, %v2448_v44 }
 0x42f   : > { %2551 = vmatmul.bf16.gmra.mxu3 %v2185_v50  ;;  %v6938_v50 = vpop.f32.mrf.mxu0 }
 0x435   : > { %v6936_v0 = vpop.f32.mrf.mxu2 }
 0x437   : > { %2467 = vmatmul.bf16.gmra.mxu2 %v2187_v63 }
 0x46a   : > { %v4289_v21 = vpop.permute.xlu2 %4288 }
 0x46b   : > { %v4291_v38 = vunpack.i.h.bf16 %v4289_v21  ;;  %v4290_v26 = vunpack.i.l.bf16 %v4289_v21 }
 0x46d   : > { %v2111_v16 = vsel %vm2080_vm6, %v6823_v6, %v4290_v26  ;;  %v2112_v11 = vsel %vm2080_vm6, %v6826_v53, %v4291_v38  ;;  %v2408_v6 = vpop.f32.mrf.mxu1  ;;  %vm9102_vm6 = vmmov %vm9099_vm0  ;;  %v2143_v28 = vsel %vm8915_vm7, %v4290_v26, %v2048_v51  ;;  %v2144_v15 = vsel %vm8915_vm7, %v4291_v38, %v2048_v51 }
 0x46e   : > { %v2190_v34 = vpack.c.bf16 %v2112_v11, %v2111_v16  ;;  %v2191_v35 = vpack.c.bf16 %v2144_v15, %v2143_v28  ;;  %v2406_v26 = vadd.f32 %v6678_v58, %v2405_v36 }
 0x470   : > { %2472 = vmatmul.bf16.gmra.mxu2 %v2190_v34  ;;  %v2409_v34 = vadd.f32 %v6678_v58, %v2408_v6 }
 0x475   : > { %v2410_v60 = vpop.f32.mrf.mxu1 }
 0x476   : > { %v2411_v46 = vadd.f32 %v6678_v58, %v2410_v60 }
 0x47d   : > { %v2487_v22 = vpop.f32.mrf.mxu1 }
 0x47e   : > { %v2488_v16 = vadd.f32 %v2487_v22, %v2399_v7 }
 0x482   : > { %v4284_v5 = vpop.permute.xlu1 %4283  ;;  %v2537_v62 = vpop.f32.mrf.mxu3 }
 0x483   : > { %v4286_v19 = vunpack.i.h.bf16 %v4284_v5  ;;  %v4285_v10 = vunpack.i.l.bf16 %v4284_v5  ;;  %v6926_v18 = vadd.f32 %v2537_v62, %v2449_v59  ;;  %v6956_v5 = vadd.f32 %v6650_v14, %v2488_v16 }
 0x485   : > { %v2189_v39 = vpack.c.bf16 %v4286_v19, %v4285_v10  ;;  %v2141_v53 = vsel %vm8915_vm7, %v4280_v23, %v4285_v10  ;;  %v2142_v57 = vsel %vm8915_vm7, %v4281_v13, %v4286_v19  ;;  %v2489_v12 = vpop.f32.mrf.mxu1  ;;  %v2401_v23 = vadd.f32 %v6678_v58, %v2400_v8  ;;  %v6952_v8 = vpop.f32.mrf.mxu0 }
 0x486   : > { %v2188_v37 = vpack.c.bf16 %v2142_v57, %v2141_v53  ;;  %v2666_v6 = vsel %vm8915_vm7, %v6956_v5, 0.0 }
 0x487   : > { %3889 = vmatmul.msk.bf16.vlgmr.msra.gmra.mxu1 %vm9102_vm6, %v2189_v39  ;;  %v2490_v63 = vadd.f32 %v2489_v12, %v2401_v23 }
 0x488   : > { %2556 = vmatmul.bf16.gmra.mxu3 %v2188_v37 }
 0x489   : > { %v6950_v44 = vadd.f32 %v6665_v54, %v2490_v63  ;;  %v2681_v63 = vsel %vm8915_vm7, %v6807_v52, 0.0 }
 0x48a   : > { %v6943_v21 = vpop.f32.mrf.mxu2  ;;  %v6945_v38 = vpop.f32.mrf.mxu3 }
 0x48b   : > { %v2667_v10 = vsel %vm8915_vm7, %v6950_v44, 0.0 }
 0x48c   : > { %v2668_v53 = vadd.f32 %v2667_v10, %v2666_v6  ;;  %v2687_v10 = vsel %vm8915_vm7, %v6849_v27, 0.0 }
 0x48d   : > { %v2492_v20 = vpop.f32.mrf.mxu1  ;;  %v6982_v51 = vpop.f32.mrf.mxu0 }
 0x48e   : > { %v2493_v11 = vadd.f32 %v2492_v20, %v2404_v47 }
 0x490   : > { %v6959_v19 = vadd.f32 %v6681_v9, %v2493_v11 }
 0x492   : > { %v2669_v39 = vsel %vm8915_vm7, %v6959_v19, 0.0  ;;  %v6973_v9 = vpop.f32.mrf.mxu2  ;;  %v6975_v57 = vpop.f32.mrf.mxu3 }
 0x493   : > { %v2670_v60 = vadd.f32 %v2669_v39, %v2668_v53  ;;  %v2689_v39 = vsel %vm8915_vm7, %v6859_v29, 0.0 }
 0x495   : > { %v2494_v3 = vpop.f32.mrf.mxu1  ;;  %v2628_v7 = vpop.f32.mrf.mxu0 }
 0x496   : > { %v2495_v59 = vadd.f32 %v2494_v3, %v2406_v26  ;;  %v2677_v3 = vsel %vm8915_vm7, %v6757_v33, 0.0 }
 0x497   : > { %3890 = vmatmul.msk.bf16.gmra.mxu1 %vm9103_vm10, %v2192_v40 }
 0x498   : > { %2561 = vmatmul.bf16.gmra.mxu3 %v2191_v35  ;;  %v6964_v62 = vadd.f32 %v6693_v17, %v2495_v59 }
 0x49a   : > { %v2671_v37 = vsel %vm8915_vm7, %v6964_v62, 0.0  ;;  %v6991_v20 = vpop.f32.mrf.mxu2 }
 0x49b   : > { %v2672_v15 = vadd.f32 %v2671_v37, %v2670_v60  ;;  %v2691_v37 = vsel %vm8915_vm7, %v6864_v1, 0.0 }
 0x49d   : > { %v2497_v13 = vpop.f32.mrf.mxu1  ;;  %v2631_v11 = vpop.f32.mrf.mxu0 }
 0x49e   : > { %v2498_v36 = vadd.f32 %v2497_v13, %v2409_v34  ;;  %v2683_v34 = vsel %vm8915_vm7, %v6820_v32, 0.0 }
 0x4a0   : > { %v6971_v14 = vadd.f32 %v6705_v4, %v2498_v36  ;;  %v2416_v4 = vadd.f32 %v6678_v58, %v6689_v2 }
 0x4a2   : > { %v2673_v28 = vsel %vm8915_vm7, %v6971_v14, 0.0  ;;  %v2505_v12 = vadd.f32 %v6691_v56, %v2416_v4  ;;  %v2460_v26 = vpop.f32.mrf.mxu2  ;;  %v7017_v4 = vld [vmem:[%s8830_s8 + $0x38] sm:$0xff] }
 0x4a3   : > { %v2674_v35 = vadd.f32 %v2673_v28, %v2672_v15  ;;  %2746 = vmatpush.msrb.mxu1 %v7017_v4 }
 0x4a4   : > { %v6998_v13 = vadd.f32 %v6782_v61, %v2505_v12  ;;  %v2685_v61 = vsel %vm8915_vm7, %v6836_v55, 0.0  ;;  %v2695_v12 = vsel %vm8915_vm7, %v6885_v49, 0.0 }
 0x4a5   : > { %v2499_v42 = vpop.f32.mrf.mxu1  ;;  %v2633_v6 = vpop.f32.mrf.mxu0 }
 0x4a6   : > { %v2500_v54 = vadd.f32 %v2499_v42, %v2411_v46  ;;  %v2679_v2 = vsel %vm8915_vm7, %v6998_v13, 0.0 }
 0x4a8   : > { %v6980_v17 = vadd.f32 %v6727_v25, %v2500_v54  ;;  %v6993_v25 = vpop.f32.mrf.mxu3 }
 0x4aa   : > { %v2675_v40 = vsel %vm8915_vm7, %v6980_v17, 0.0  ;;  %v2463_v46 = vpop.f32.mrf.mxu2 }
 0x4ab   : > { %v2676_v22 = vadd.f32 %v2675_v40, %v2674_v35  ;;  %v2693_v35 = vsel %vm8915_vm7, %v6872_v30, 0.0 }
 0x4ad   : > { %v2678_v23 = vadd.f32 %v2677_v3, %v2676_v22  ;;  %v2636_v40 = vpop.f32.mrf.mxu0 }
 0x4af   : > { %v2680_v47 = vadd.f32 %v2679_v2, %v2678_v23  ;;  %v7027_v23 = vld [vmem:[%s8830_s8 + $0x30] sm:$0xff]  ;;  %v7032_v2 = vld [vmem:[%s8830_s8 + $0x28] sm:$0xff] }
 0x4b0   : > { %v2547_v16 = vpop.f32.mrf.mxu3  ;;  %2747 = vmatpush.msrb.mxu1 %v7027_v23 }
 0x4b1   : > { %v2682_v56 = vadd.f32 %v2681_v63, %v2680_v47 }
 0x4b2   : > { %v2465_v28 = vpop.f32.mrf.mxu2  ;;  %2748 = vmatpush.msrb.mxu1 %v7032_v2 }
 0x4b3   : > { %v2684_v59 = vadd.f32 %v2683_v34, %v2682_v56  ;;  %v2697_v56 = vsel %vm8915_vm7, %v6895_v45, 0.0  ;;  %v7039_v34 = vadd.f32 %v6934_v31, %v6900_v24  ;;  %v2451_v24 = vadd.f32 %v6678_v58, %v6936_v0 }
 0x4b4   : > { %v2456_v0 = vadd.f32 %v6678_v58, %v6973_v9  ;;  %v2461_v9 = vadd.f32 %v6678_v58, %v2460_v26  ;;  %v2466_v26 = vadd.f32 %v6678_v58, %v2465_v28 }
 0x4b5   : > { %v2686_v42 = vadd.f32 %v2685_v61, %v2684_v59  ;;  %v2446_v59 = vadd.f32 %v6678_v58, %v6921_v48  ;;  %v2454_v48 = vadd.f32 %v6678_v58, %v6943_v21 }
 0x4b7   : > { %v2688_v54 = vadd.f32 %v2687_v10, %v2686_v42  ;;  %v2638_v42 = vpop.f32.mrf.mxu0  ;;  %v2535_v10 = vadd.f32 %v6923_v43, %v2446_v59 }
 0x4b8   : > { %v2549_v36 = vpop.f32.mrf.mxu3 }
 0x4b9   : > { %v2690_v53 = vadd.f32 %v2689_v39, %v2688_v54  ;;  %v2699_v39 = vsel %vm8915_vm7, %v7039_v34, 0.0  ;;  %v7059_v43 = vadd.f32 %v6952_v8, %v2535_v10  ;;  %v2545_v8 = vadd.f32 %v6993_v25, %v2456_v0 }
 0x4ba   : > { %v2468_v47 = vpop.f32.mrf.mxu2  ;;  %v2464_v25 = vadd.f32 %v6678_v58, %v2463_v46  ;;  %v2550_v10 = vadd.f32 %v2549_v36, %v2461_v9  ;;  %v2659_v46 = vld [vmem:[%s8830_s8 + $0x18] sm:$0xff] }
 0x4bb   : > { %v2692_v60 = vadd.f32 %v2691_v37, %v2690_v53  ;;  %v7051_v53 = vadd.f32 %v6938_v50, %v6908_v41  ;;  %v2540_v37 = vadd.f32 %v6945_v38, %v2451_v24  ;;  %v7065_v41 = vadd.f32 %v6982_v51, %v6926_v18 }
 0x4bc   : > { %v2543_v50 = vadd.f32 %v6975_v57, %v2454_v48  ;;  %v2459_v38 = vadd.f32 %v6678_v58, %v6991_v20  ;;  %v7084_v20 = vadd.f32 %v2633_v6, %v2545_v8  ;;  %v2660_v6 = vld [vmem:[%s8830_s8 + $0x20] sm:$0xff] }
 0x4bd   : > { %v2694_v22 = vadd.f32 %v2693_v35, %v2692_v60  ;;  %v2701_v35 = vsel %vm8915_vm7, %v7051_v53, 0.0  ;;  %v2705_v18 = vsel %vm8915_vm7, %v7065_v41, 0.0  ;;  %2749 = vmatpush.msrb.mxu1 %v2660_v6 }
 0x4be   : > { %v7079_v51 = vadd.f32 %v2631_v11, %v2543_v50  ;;  %v2548_v57 = vadd.f32 %v2547_v16, %v2459_v38  ;;  %v2711_v36 = vsel %vm8915_vm7, %v7084_v20, 0.0 }
 0x4bf   : > { %v2696_v3 = vadd.f32 %v2695_v12, %v2694_v22  ;;  %v7070_v12 = vadd.f32 %v2628_v7, %v2540_v37  ;;  %2750 = vmatpush.msrb.mxu1 %v2659_v46 }
 0x4c0   : > { %v2552_v15 = vpop.f32.mrf.mxu3  ;;  %v7089_v11 = vadd.f32 %v2636_v40, %v2548_v57  ;;  %v2469_v40 = vadd.f32 %v6678_v58, %v2468_v47  ;;  %v2657_v47 = vld [vmem:[%s8830_s8 + $0x8] sm:$0xff] }
 0x4c1   : > { %v2698_v61 = vadd.f32 %v2697_v56, %v2696_v3  ;;  %v2703_v3 = vsel %vm8915_vm7, %v7059_v43, 0.0  ;;  %v2641_v56 = vpop.f32.mrf.mxu0  ;;  %v2553_v16 = vadd.f32 %v2552_v15, %v2464_v25  ;;  %v2658_v15 = vld [vmem:[%s8830_s8 + $0x10] sm:$0xff] }
 0x4c2   : > { %v2470_v21 = vpop.f32.mrf.mxu2  ;;  %v2713_v50 = vsel %vm8915_vm7, %v7089_v11, 0.0  ;;  %2751 = vmatpush.msrb.mxu1 %v2658_v15 }
 0x4c3   : > { %v2700_v31 = vadd.f32 %v2699_v39, %v2698_v61  ;;  %v2707_v61 = vsel %vm8915_vm7, %v7070_v12, 0.0  ;;  %v2471_v38 = vadd.f32 %v6678_v58, %v2470_v21 }
 0x4c4   : > { %2752 = vmatpush.msrb.mxu1 %v2657_v47 }
 0x4c5   : > { %v2702_v22 = vadd.f32 %v2701_v35, %v2700_v31  ;;  %v2709_v31 = vsel %vm8915_vm7, %v7079_v51, 0.0  ;;  %v7100_v35 = vadd.f32 %v2638_v42, %v2550_v10 }
 0x4c7   : > { %v2704_v59 = vadd.f32 %v2703_v3, %v2702_v22  ;;  %v7108_v22 = vadd.f32 %v2641_v56, %v2553_v16 }
 0x4c8   : > { %v2554_v63 = vpop.f32.mrf.mxu3 }
 0x4c9   : > { %v2706_v39 = vadd.f32 %v2705_v18, %v2704_v59  ;;  %v2555_v0 = vadd.f32 %v2554_v63, %v2466_v26  ;;  %v2643_v3 = vpop.f32.mrf.mxu0  ;;  %v2715_v63 = vsel %vm8915_vm7, %v7100_v35, 0.0 }
 0x4cb   : > { %v2708_v48 = vadd.f32 %v2707_v61, %v2706_v39  ;;  %v7116_v18 = vadd.f32 %v2643_v3, %v2555_v0  ;;  %v2717_v61 = vsel %vm8915_vm7, %v7108_v22, 0.0 }
 0x4cd   : > { %v2710_v28 = vadd.f32 %v2709_v31, %v2708_v48 }
 0x4cf   : > { %v2712_v42 = vadd.f32 %v2711_v36, %v2710_v28 }
 0x4d1   : > { %v2714_v56 = vadd.f32 %v2713_v50, %v2712_v42 }
 0x4d3   : > { %v2716_v39 = vadd.f32 %v2715_v63, %v2714_v56 }
 0x4d5   : > { %v2718_v26 = vadd.f32 %v2717_v61, %v2716_v39 }
 0x4f3   : > { %v2473_v37 = vpop.f32.mrf.mxu2 }
 0x4f4   : > { %v2474_v9 = vadd.f32 %v6678_v58, %v2473_v37 }
 0x4fb   : > { %v2475_v16 = vpop.f32.mrf.mxu2 }
 0x4fc   : > { %v2476_v36 = vadd.f32 %v6678_v58, %v2475_v16 }
 0x504   : > { %v7045_v54 = vpop.f32.mrf.mxu1 }
 0x50b   : > { %v2557_v60 = vpop.f32.mrf.mxu3 }
 0x50c   : > { %v2648_v7 = vpop.f32.mrf.mxu1  ;;  %v2558_v8 = vadd.f32 %v2557_v60, %v2469_v40  ;;  %v2656_v60 = vld [vmem:[%s8830_s8] sm:$0xff] }
 0x50d   : > { %2753 = vmatpush.msrb.mxu1 %v2656_v60 }
 0x50e   : > { %v7125_v25 = vadd.f32 %v7045_v54, %v2558_v8 }
 0x50f   : > { %2903 = vmatpush.msra.mxu1 %v7017_v4 }
 0x510   : > { %v2721_v48 = vsel %vm8915_vm7, %v7125_v25, 0.0 }
 0x511   : > { %2904 = vmatpush.msra.mxu1 %v7027_v23 }
 0x513   : > { %v2559_v24 = vpop.f32.mrf.mxu3  ;;  %2905 = vmatpush.msra.mxu1 %v7032_v2 }
 0x514   : > { %v2560_v57 = vadd.f32 %v2559_v24, %v2471_v38  ;;  %v2651_v59 = vpop.f32.mrf.mxu1  ;;  %v2719_v24 = vsel %vm8915_vm7, %v7116_v18, 0.0 }
 0x515   : > { %v2720_v54 = vadd.f32 %v2719_v24, %v2718_v26  ;;  %2906 = vmatpush.msra.mxu1 %v2660_v6 }
 0x516   : > { %v7129_v31 = vadd.f32 %v2648_v7, %v2560_v57 }
 0x517   : > { %v2722_v7 = vadd.f32 %v2721_v48, %v2720_v54  ;;  %2907 = vmatpush.msra.mxu1 %v2659_v46 }
 0x518   : > { %v2723_v40 = vsel %vm8915_vm7, %v7129_v31, 0.0 }
 0x519   : > { %v2724_v50 = vadd.f32 %v2723_v40, %v2722_v7  ;;  %2908 = vmatpush.msra.mxu1 %v2658_v15 }
 0x51b   : > { %v2562_v21 = vpop.f32.mrf.mxu3  ;;  %2909 = vmatpush.msra.mxu1 %v2657_v47 }
 0x51c   : > { %v2563_v10 = vadd.f32 %v2562_v21, %v2474_v9  ;;  %v2653_v38 = vpop.f32.mrf.mxu1 }
 0x51d   : > { %2910 = vmatpush.msra.mxu1 %v2656_v60 }
 0x51e   : > { %v7134_v37 = vadd.f32 %v2651_v59, %v2563_v10 }
 0x520   : > { %v2725_v4 = vsel %vm8915_vm7, %v7134_v37, 0.0 }
 0x521   : > { %v2726_v42 = vadd.f32 %v2725_v4, %v2724_v50 }
 0x523   : > { %v2564_v0 = vpop.f32.mrf.mxu3 }
 0x524   : > { %v2565_v28 = vadd.f32 %v2564_v0, %v2476_v36 }
 0x526   : > { %v7143_v8 = vadd.f32 %v2653_v38, %v2565_v28 }
 0x528   : > { %v2727_v58 = vsel %vm8915_vm7, %v7143_v8, 0.0 }
 0x529   : > { %v2728_v23 = vadd.f32 %v2727_v58, %v2726_v42 }
 0x52b   : > { %v2729_v3 = vrot.slane %v2728_v23, 4 }
 0x52d   : > { %v2730_v63 = vadd.f32 %v2729_v3, %v2728_v23 }
 0x52f   : > { %v2731_v2 = vrot.slane %v2730_v63, 2 }
 0x531   : > { %v2732_v9 = vadd.f32 %v2731_v2, %v2730_v63 }
 0x533   : > { %v2733_v57 = vrot.slane %v2732_v9, 1 }
 0x535   : > { %v2734_v56 = vadd.f32 %v2733_v57, %v2732_v9 }
 0x537   : > { %3891 = vmatmul.msk.f32.vlgmr.msrb.gmra.mxu1 %vm8915_vm7, %v2734_v56 }
 0x5b4   : > { %v2755_v6 = vpop.f32.mrf.mxu1 }
 0x5b5   : > { %v7148_v59 = vperm.slane %v2755_v6, 0 }
 0x5b7   : > { %v7152_v46 = vsub.f32 %v6956_v5, %v7148_v59  ;;  %v7156_v15 = vsub.f32 %v6950_v44, %v7148_v59  ;;  %v7160_v47 = vsub.f32 %v6959_v19, %v7148_v59  ;;  %v7164_v21 = vsub.f32 %v6964_v62, %v7148_v59 }
 0x5b8   : > { %v7172_v5 = vsub.f32 %v6971_v14, %v7148_v59  ;;  %v7178_v19 = vsub.f32 %v6980_v17, %v7148_v59  ;;  %v7186_v26 = vsub.f32 %v6757_v33, %v7148_v59  ;;  %v7193_v17 = vsub.f32 %v6998_v13, %v7148_v59 }
 0x5b9   : > { %v2791_v60 = vmul.f32 %v7152_v46, %v7152_v46  ;;  %v2792_v61 = vmul.f32 %v7156_v15, %v7156_v15  ;;  %v2793_v44 = vmul.f32 %v7160_v47, %v7160_v47  ;;  %v2794_v62 = vmul.f32 %v7164_v21, %v7164_v21 }
 0x5ba   : > { %v2795_v14 = vmul.f32 %v7172_v5, %v7172_v5  ;;  %v2796_v54 = vmul.f32 %v7178_v19, %v7178_v19  ;;  %v7200_v33 = vsub.f32 %v6807_v52, %v7148_v59  ;;  %v2797_v7 = vmul.f32 %v7186_v26, %v7186_v26 }
 0x5bb   : > { %v2823_v10 = vsel %vm8915_vm7, %v2791_v60, 0.0  ;;  %v2824_v39 = vsel %vm8915_vm7, %v2792_v61, 0.0  ;;  %v2826_v16 = vsel %vm8915_vm7, %v2793_v44, 0.0  ;;  %v2828_v36 = vsel %vm8915_vm7, %v2794_v62, 0.0 }
 0x5bc   : > { %v2825_v24 = vadd.f32 %v2824_v39, %v2823_v10  ;;  %v2830_v0 = vsel %vm8915_vm7, %v2795_v14, 0.0  ;;  %v7207_v13 = vsub.f32 %v6820_v32, %v7148_v59  ;;  %v2798_v28 = vmul.f32 %v7193_v17, %v7193_v17 }
 0x5bd   : > { %v2832_v50 = vsel %vm8915_vm7, %v2796_v54, 0.0  ;;  %v7214_v52 = vsub.f32 %v6836_v55, %v7148_v59  ;;  %v2799_v42 = vmul.f32 %v7200_v33, %v7200_v33  ;;  %v2834_v58 = vsel %vm8915_vm7, %v2797_v7, 0.0 }
 0x5be   : > { %v2827_v48 = vadd.f32 %v2826_v16, %v2825_v24  ;;  %v7221_v32 = vsub.f32 %v6849_v27, %v7148_v59  ;;  %v2800_v3 = vmul.f32 %v7207_v13, %v7207_v13  ;;  %v2836_v63 = vsel %vm8915_vm7, %v2798_v28, 0.0 }
 0x5bf   : > { %v7228_v55 = vsub.f32 %v6859_v29, %v7148_v59  ;;  %v2801_v9 = vmul.f32 %v7214_v52, %v7214_v52  ;;  %v2838_v57 = vsel %vm8915_vm7, %v2799_v42, 0.0  ;;  %v7235_v27 = vsub.f32 %v6864_v1, %v7148_v59 }
 0x5c0   : > { %v2829_v40 = vadd.f32 %v2828_v36, %v2827_v48  ;;  %v2802_v6 = vmul.f32 %v7221_v32, %v7221_v32  ;;  %v2840_v60 = vsel %vm8915_vm7, %v2800_v3, 0.0  ;;  %v7242_v29 = vsub.f32 %v6872_v30, %v7148_v59 }
 0x5c1   : > { %v2803_v44 = vmul.f32 %v7228_v55, %v7228_v55  ;;  %v2842_v62 = vsel %vm8915_vm7, %v2801_v9, 0.0  ;;  %v7249_v1 = vsub.f32 %v6885_v49, %v7148_v59  ;;  %v2804_v39 = vmul.f32 %v7235_v27, %v7235_v27 }
 0x5c2   : > { %v2831_v4 = vadd.f32 %v2830_v0, %v2829_v40  ;;  %v2844_v24 = vsel %vm8915_vm7, %v2802_v6, 0.0  ;;  %v7256_v30 = vsub.f32 %v6895_v45, %v7148_v59  ;;  %v2805_v16 = vmul.f32 %v7242_v29, %v7242_v29 }
 0x5c3   : > { %v2846_v48 = vsel %vm8915_vm7, %v2803_v44, 0.0  ;;  %v7263_v49 = vsub.f32 %v7039_v34, %v7148_v59  ;;  %v2806_v36 = vmul.f32 %v7249_v1, %v7249_v1  ;;  %v2848_v40 = vsel %vm8915_vm7, %v2804_v39, 0.0 }
 0x5c4   : > { %v2833_v38 = vadd.f32 %v2832_v50, %v2831_v4  ;;  %v7270_v45 = vsub.f32 %v7051_v53, %v7148_v59  ;;  %v2807_v0 = vmul.f32 %v7256_v30, %v7256_v30  ;;  %v2850_v4 = vsel %vm8915_vm7, %v2805_v16, 0.0 }
 0x5c5   : > { %v7277_v34 = vsub.f32 %v7059_v43, %v7148_v59  ;;  %v2808_v50 = vmul.f32 %v7263_v49, %v7263_v49  ;;  %v7284_v53 = vsub.f32 %v7065_v41, %v7148_v59  ;;  %v7291_v43 = vsub.f32 %v7070_v12, %v7148_v59 }
 0x5c6   : > { %v2835_v23 = vadd.f32 %v2834_v58, %v2833_v38  ;;  %v2852_v38 = vsel %vm8915_vm7, %v2806_v36, 0.0  ;;  %v2809_v58 = vmul.f32 %v7270_v45, %v7270_v45  ;;  %v7298_v41 = vsub.f32 %v7079_v51, %v7148_v59 }
 0x5c7   : > { %v7305_v12 = vsub.f32 %v7084_v20, %v7148_v59  ;;  %v7312_v51 = vsub.f32 %v7089_v11, %v7148_v59  ;;  %v7319_v20 = vsub.f32 %v7100_v35, %v7148_v59  ;;  %v7326_v11 = vsub.f32 %v7108_v22, %v7148_v59 }
 0x5c8   : > { %v2837_v2 = vadd.f32 %v2836_v63, %v2835_v23  ;;  %v2854_v23 = vsel %vm8915_vm7, %v2807_v0, 0.0  ;;  %v2810_v63 = vmul.f32 %v7277_v34, %v7277_v34  ;;  %v7333_v35 = vsub.f32 %v7116_v18, %v7148_v59 }
 0x5c9   : > { %v7340_v22 = vsub.f32 %v7125_v25, %v7148_v59  ;;  %v7347_v18 = vsub.f32 %v7129_v31, %v7148_v59  ;;  %v7354_v25 = vsub.f32 %v7134_v37, %v7148_v59  ;;  %v7361_v31 = vsub.f32 %v7143_v8, %v7148_v59 }
 0x5ca   : > { %v2839_v56 = vadd.f32 %v2838_v57, %v2837_v2  ;;  %v2856_v2 = vsel %vm8915_vm7, %v2808_v50, 0.0  ;;  %v2811_v57 = vmul.f32 %v7284_v53, %v7284_v53 }
 0x5cb   : > { %v2821_v37 = vmul.f32 %v7354_v25, %v7354_v25 }
 0x5cc   : > { %v2841_v61 = vadd.f32 %v2840_v60, %v2839_v56  ;;  %v2858_v56 = vsel %vm8915_vm7, %v2809_v58, 0.0  ;;  %v2812_v60 = vmul.f32 %v7291_v43, %v7291_v43 }
 0x5cd   : > { %v2882_v8 = vsel %vm8915_vm7, %v2821_v37, 0.0 }
 0x5ce   : > { %v2843_v10 = vadd.f32 %v2842_v62, %v2841_v61  ;;  %v2860_v61 = vsel %vm8915_vm7, %v2810_v63, 0.0  ;;  %v2813_v62 = vmul.f32 %v7298_v41, %v7298_v41 }
 0x5d0   : > { %v2845_v14 = vadd.f32 %v2844_v24, %v2843_v10  ;;  %v2862_v10 = vsel %vm8915_vm7, %v2811_v57, 0.0  ;;  %v2814_v24 = vmul.f32 %v7305_v12, %v7305_v12 }
 0x5d2   : > { %v2847_v54 = vadd.f32 %v2846_v48, %v2845_v14  ;;  %v2864_v14 = vsel %vm8915_vm7, %v2812_v60, 0.0  ;;  %v2815_v48 = vmul.f32 %v7312_v51, %v7312_v51  ;;  %v2822_v60 = vmul.f32 %v7361_v31, %v7361_v31 }
 0x5d4   : > { %v2849_v7 = vadd.f32 %v2848_v40, %v2847_v54  ;;  %v2866_v54 = vsel %vm8915_vm7, %v2813_v62, 0.0  ;;  %v2816_v40 = vmul.f32 %v7319_v20, %v7319_v20  ;;  %v2884_v62 = vsel %vm8915_vm7, %v2822_v60, 0.0 }
 0x5d6   : > { %v2851_v28 = vadd.f32 %v2850_v4, %v2849_v7  ;;  %v2868_v7 = vsel %vm8915_vm7, %v2814_v24, 0.0  ;;  %v2817_v4 = vmul.f32 %v7326_v11, %v7326_v11 }
 0x5d8   : > { %v2853_v42 = vadd.f32 %v2852_v38, %v2851_v28  ;;  %v2870_v28 = vsel %vm8915_vm7, %v2815_v48, 0.0  ;;  %v2818_v38 = vmul.f32 %v7333_v35, %v7333_v35 }
 0x5da   : > { %v2855_v3 = vadd.f32 %v2854_v23, %v2853_v42  ;;  %v2872_v42 = vsel %vm8915_vm7, %v2816_v40, 0.0  ;;  %v2819_v23 = vmul.f32 %v7340_v22, %v7340_v22 }
 0x5dc   : > { %v2857_v9 = vadd.f32 %v2856_v2, %v2855_v3  ;;  %v2874_v3 = vsel %vm8915_vm7, %v2817_v4, 0.0  ;;  %v2820_v2 = vmul.f32 %v7347_v18, %v7347_v18 }
 0x5de   : > { %v2859_v6 = vadd.f32 %v2858_v56, %v2857_v9  ;;  %v2876_v9 = vsel %vm8915_vm7, %v2818_v38, 0.0  ;;  %v2878_v56 = vsel %vm8915_vm7, %v2819_v23, 0.0 }
 0x5e0   : > { %v2861_v44 = vadd.f32 %v2860_v61, %v2859_v6  ;;  %v2880_v61 = vsel %vm8915_vm7, %v2820_v2, 0.0 }
 0x5e2   : > { %v2863_v39 = vadd.f32 %v2862_v10, %v2861_v44 }
 0x5e4   : > { %v2865_v16 = vadd.f32 %v2864_v14, %v2863_v39 }
 0x5e6   : > { %v2867_v36 = vadd.f32 %v2866_v54, %v2865_v16 }
 0x5e8   : > { %v2869_v0 = vadd.f32 %v2868_v7, %v2867_v36 }
 0x5ea   : > { %v2871_v50 = vadd.f32 %v2870_v28, %v2869_v0 }
 0x5ec   : > { %v2873_v58 = vadd.f32 %v2872_v42, %v2871_v50 }
 0x5ee   : > { %v2875_v63 = vadd.f32 %v2874_v3, %v2873_v58  ;;  %v7379_v3 = vld [vmem:[%s8828_s6] ss:$0 sm:$0xff] }
 0x5f0   : > { %v2877_v57 = vadd.f32 %v2876_v9, %v2875_v63 }
 0x5f2   : > { %v2879_v6 = vadd.f32 %v2878_v56, %v2877_v57 }
 0x5f4   : > { %v2881_v44 = vadd.f32 %v2880_v61, %v2879_v6 }
 0x5f6   : > { %v2883_v59 = vadd.f32 %v2882_v8, %v2881_v44 }
 0x5f8   : > { %v2885_v10 = vadd.f32 %v2884_v62, %v2883_v59 }
 0x5fa   : > { %v2886_v39 = vrot.slane %v2885_v10, 4 }
 0x5fc   : > { %v2887_v24 = vadd.f32 %v2886_v39, %v2885_v10 }
 0x5fe   : > { %v2888_v14 = vrot.slane %v2887_v24, 2 }
 0x600   : > { %v2889_v16 = vadd.f32 %v2888_v14, %v2887_v24 }
 0x602   : > { %v2890_v48 = vrot.slane %v2889_v16, 1 }
 0x604   : > { %v2891_v54 = vadd.f32 %v2890_v48, %v2889_v16 }
 0x606   : > { %3892 = vmatmul.msk.f32.vlgmr.msra.gmra.mxu1 %vm8915_vm7, %v2891_v54 }
 0x683   : > { %v2912_v36 = vpop.f32.mrf.mxu1 }
 0x684   : > { %v2913_v40 = vadd.f32 1e-06, %v2912_v36 }
 0x686   : > { %4427 = vrsqrt.f32 %v2913_v40  ;;  %vm2921_vm15 = vweird.f32 %v2913_v40 }
 0x68c   : > { %v4428_v7 = vpop.eup %4427 }
 0x68d   : > { %v2916_v0 = vmul.f32 %v4428_v7, %v2913_v40  ;;  %vm2922_vm12 = vweird.f32 %v4428_v7 }
 0x68e   : > { %vm2923_vm1 = vmor %vm2921_vm15, %vm2922_vm12 }
 0x68f   : > { %v2917_v4 = vmul.f32 %v4428_v7, %v2916_v0 }
 0x691   : > { %v2918_v28 = vmul.f32 0.5, %v2917_v4 }
 0x693   : > { %v2919_v50 = vsub.f32 1.5, %v2918_v28 }
 0x695   : > { %v2920_v38 = vmul.f32 %v4428_v7, %v2919_v50 }
 0x697   : > { %v2924_v42 = vsel %vm2923_vm1, %v4428_v7, %v2920_v38 }
 0x698   : > { %v2925_v58 = vperm.slane %v2924_v42, 0 }
 0x69a   : > { %v2926_v23 = vmul.f32 %v2925_v58, %v7152_v46  ;;  %v2927_v63 = vmul.f32 %v2925_v58, %v7156_v15  ;;  %v2928_v2 = vmul.f32 %v2925_v58, %v7160_v47  ;;  %v2929_v9 = vmul.f32 %v2925_v58, %v7164_v21  ;;  %v7396_v21 = vld [vmem:[%s8829_s7] ss:$0 sm:$0xff] }
 0x69b   : > { %v2930_v57 = vmul.f32 %v2925_v58, %v7172_v5  ;;  %v2931_v37 = vmul.f32 %v2925_v58, %v7178_v19  ;;  %v2932_v56 = vmul.f32 %v2925_v58, %v7186_v26  ;;  %v2933_v6 = vmul.f32 %v2925_v58, %v7193_v17 }
 0x69c   : > { %v2934_v46 = vmul.f32 %v2925_v58, %v7200_v33  ;;  %v2935_v60 = vmul.f32 %v2925_v58, %v7207_v13  ;;  %v2936_v61 = vmul.f32 %v2925_v58, %v7214_v52  ;;  %v2937_v15 = vmul.f32 %v2925_v58, %v7221_v32 }
 0x69d   : > { %v2961_v47 = vmul.f32 %v7379_v3, %v2926_v23  ;;  %v2938_v5 = vmul.f32 %v2925_v58, %v7228_v55  ;;  %v2939_v19 = vmul.f32 %v2925_v58, %v7235_v27  ;;  %v2940_v26 = vmul.f32 %v2925_v58, %v7242_v29 }
 0x69e   : > { %v2962_v17 = vmul.f32 %v7379_v3, %v2927_v63  ;;  %v2941_v33 = vmul.f32 %v2925_v58, %v7249_v1  ;;  %v2942_v13 = vmul.f32 %v2925_v58, %v7256_v30  ;;  %v2943_v52 = vmul.f32 %v2925_v58, %v7263_v49 }
 0x69f   : > { %v2963_v32 = vmul.f32 %v7379_v3, %v2928_v2  ;;  %v2944_v44 = vmul.f32 %v2925_v58, %v7270_v45  ;;  %v2945_v8 = vmul.f32 %v2925_v58, %v7277_v34  ;;  %v7409_v55 = vmul.f32 %v2925_v58, %v7284_v53 }
 0x6a0   : > { %v2964_v27 = vmul.f32 %v7379_v3, %v2929_v9  ;;  %v7413_v29 = vmul.f32 %v2925_v58, %v7291_v43  ;;  %v7416_v1 = vmul.f32 %v2925_v58, %v7298_v41  ;;  %v2965_v30 = vmul.f32 %v7379_v3, %v2930_v57 }
 0x6a1   : > { %v7420_v49 = vadd.f32 %v7396_v21, %v2961_v47  ;;  %v7423_v45 = vmul.f32 %v2925_v58, %v7305_v12  ;;  %v7426_v34 = vmul.f32 %v2925_v58, %v7312_v51  ;;  %v2966_v53 = vmul.f32 %v7379_v3, %v2931_v37 }
 0x6a2   : > { %v7430_v59 = vadd.f32 %v7396_v21, %v2962_v17  ;;  %v7433_v43 = vmul.f32 %v2925_v58, %v7319_v20  ;;  %v7436_v41 = vmul.f32 %v2925_v58, %v7326_v11  ;;  %v2967_v62 = vmul.f32 %v7379_v3, %v2932_v56 }
 0x6a3   : > { %9104 = vst [vmem:[#allocation11_spill] sm:$0xff] %v7420_v49  ;;  %v7440_v10 = vadd.f32 %v7396_v21, %v2963_v32  ;;  %v7443_v12 = vmul.f32 %v2925_v58, %v7333_v35  ;;  %v7446_v51 = vmul.f32 %v2925_v58, %v7340_v22  ;;  %v2968_v39 = vmul.f32 %v7379_v3, %v2933_v6 }
 0x6a4   : > { %9105 = vst [vmem:[#allocation12_spill] sm:$0xff] %v7430_v59  ;;  %v7450_v24 = vadd.f32 %v7396_v21, %v2964_v27  ;;  %v7453_v20 = vmul.f32 %v2925_v58, %v7347_v18  ;;  %v2969_v11 = vmul.f32 %v7379_v3, %v2934_v46  ;;  %v7457_v14 = vadd.f32 %v7396_v21, %v2965_v30 }
 0x6a5   : > { %9106 = vst [vmem:[#allocation2_spill] sm:$0xff] %v7440_v10  ;;  %v3893_v16 = vmul.f32 -1.442695, %v7420_v49  ;;  %v7461_v35 = vmul.f32 %v2925_v58, %v7354_v25  ;;  %v2970_v22 = vmul.f32 %v7379_v3, %v2935_v60  ;;  %v7465_v48 = vadd.f32 %v7396_v21, %v2966_v53 }
 0x6a6   : > { %9107 = vst [vmem:[#allocation15_spill] sm:$0xff] %v7450_v24  ;;  %v3894_v54 = vmul.f32 -1.442695, %v7430_v59  ;;  %v7469_v18 = vmul.f32 %v2925_v58, %v7361_v31  ;;  %v2971_v36 = vmul.f32 %v7379_v3, %v2936_v61  ;;  %v7473_v40 = vadd.f32 %v7396_v21, %v2967_v62 }
 0x6a7   : > { %9108 = vst [vmem:[#allocation8_spill] sm:$0xff] %v7457_v14  ;;  %v3895_v7 = vmul.f32 -1.442695, %v7440_v10  ;;  %v2972_v25 = vmul.f32 %v7379_v3, %v2937_v15  ;;  %v2973_v0 = vmul.f32 %v7379_v3, %v2938_v5  ;;  %v7479_v4 = vadd.f32 %v7396_v21, %v2968_v39 }
 0x6a8   : > { %9109 = vst [vmem:[#allocation9_spill] sm:$0xff] %v7465_v48  ;;  %v3896_v28 = vmul.f32 -1.442695, %v7450_v24  ;;  %v2974_v50 = vmul.f32 %v7379_v3, %v2939_v19  ;;  %v7484_v31 = vadd.f32 %v7396_v21, %v2969_v11  ;;  %4429 = vpow2.f32 %v3893_v16 }
 0x6a9   : > { %9110 = vst [vmem:[#allocation19_spill] sm:$0xff] %v7473_v40  ;;  %v3897_v38 = vmul.f32 -1.442695, %v7457_v14  ;;  %v2975_v42 = vmul.f32 %v7379_v3, %v2940_v26  ;;  %v7489_v58 = vadd.f32 %v7396_v21, %v2970_v22  ;;  %4431 = vpow2.f32 %v3894_v54 }
 0x6aa   : > { %9111 = vst [vmem:[#allocation13_spill] sm:$0xff] %v7479_v4  ;;  %v3898_v23 = vmul.f32 -1.442695, %v7465_v48  ;;  %v2976_v63 = vmul.f32 %v7379_v3, %v2941_v33  ;;  %v7494_v2 = vadd.f32 %v7396_v21, %v2971_v36  ;;  %4433 = vpow2.f32 %v3895_v7 }
 0x6ab   : > { %9112 = vst [vmem:[#allocation5_spill] sm:$0xff] %v7484_v31  ;;  %v3899_v9 = vmul.f32 -1.442695, %v7473_v40  ;;  %v2977_v57 = vmul.f32 %v7379_v3, %v2942_v13  ;;  %v7499_v37 = vadd.f32 %v7396_v21, %v2972_v25  ;;  %4435 = vpow2.f32 %v3896_v28 }
 0x6ac   : > { %9113 = vst [vmem:[#allocation14_spill] sm:$0xff] %v7489_v58  ;;  %v3900_v56 = vmul.f32 -1.442695, %v7479_v4  ;;  %v2978_v6 = vmul.f32 %v7379_v3, %v2943_v52  ;;  %v7504_v46 = vadd.f32 %v7396_v21, %v2973_v0  ;;  %4437 = vpow2.f32 %v3897_v38 }
 0x6ad   : > { %9114 = vst [vmem:[#allocation6_spill] sm:$0xff] %v7494_v2  ;;  %v3901_v60 = vmul.f32 -1.442695, %v7484_v31  ;;  %v2979_v61 = vmul.f32 %v7379_v3, %v2944_v44  ;;  %v7509_v15 = vadd.f32 %v7396_v21, %v2974_v50  ;;  %4439 = vpow2.f32 %v3898_v23 }
 0x6ae   : > { %9115 = vst [vmem:[#allocation7_spill] sm:$0xff] %v7499_v37  ;;  %v3902_v47 = vmul.f32 -1.442695, %v7489_v58  ;;  %v7512_v5 = vpop.eup %4429  ;;  %v2980_v19 = vmul.f32 %v7379_v3, %v2945_v8  ;;  %v7516_v26 = vadd.f32 %v7396_v21, %v2975_v42  ;;  %4441 = vpow2.f32 %v3899_v9 }
 0x6af   : > { %9116 = vst [vmem:[#allocation18_spill] sm:$0xff] %v7504_v46  ;;  %v3903_v17 = vmul.f32 -1.442695, %v7494_v2  ;;  %v7519_v33 = vpop.eup %4431  ;;  %v2981_v13 = vmul.f32 %v7379_v3, %v7409_v55  ;;  %v7524_v52 = vadd.f32 %v7396_v21, %v2976_v63  ;;  %4443 = vpow2.f32 %v3900_v56 }
 0x6b0   : > { %9117 = vst [vmem:[#allocation4_spill] sm:$0xff] %v7509_v15  ;;  %v3904_v32 = vmul.f32 -1.442695, %v7499_v37  ;;  %v7527_v44 = vpop.eup %4433  ;;  %v2982_v8 = vmul.f32 %v7379_v3, %v7413_v29  ;;  %v7532_v27 = vadd.f32 %v7396_v21, %v2977_v57  ;;  %4445 = vpow2.f32 %v3901_v60 }
 0x6b1   : > { %9118 = vst [vmem:[#allocation3_spill] sm:$0xff] %v7516_v26  ;;  %v3905_v30 = vmul.f32 -1.442695, %v7504_v46  ;;  %v7535_v53 = vpop.eup %4435  ;;  %v2983_v55 = vmul.f32 %v7379_v3, %v7416_v1  ;;  %v7540_v62 = vadd.f32 %v7396_v21, %v2978_v6  ;;  %4447 = vpow2.f32 %v3902_v47 }
 0x6b2   : > { %9119 = vst [vmem:[#allocation16_spill] sm:$0xff] %v7524_v52  ;;  %v3906_v39 = vmul.f32 -1.442695, %v7509_v15  ;;  %v7543_v11 = vpop.eup %4437  ;;  %v2984_v29 = vmul.f32 %v7379_v3, %v7423_v45  ;;  %v7548_v16 = vadd.f32 %v7396_v21, %v2979_v61  ;;  %4449 = vpow2.f32 %v3903_v17 }
 0x6b3   : > { %9120 = vst [vmem:[#allocation17_spill] sm:$0xff] %v7532_v27  ;;  %v3907_v22 = vmul.f32 -1.442695, %v7516_v26  ;;  %v7551_v54 = vpop.eup %4439  ;;  %v2985_v1 = vmul.f32 %v7379_v3, %v7426_v34  ;;  %v7556_v36 = vadd.f32 %v7396_v21, %v2980_v19  ;;  %4451 = vpow2.f32 %v3904_v32 }
 0x6b4   : > { %9121 = vst [vmem:[#allocation10_spill] sm:$0xff] %v7540_v62  ;;  %v3908_v7 = vmul.f32 -1.442695, %v7524_v52  ;;  %v7559_v25 = vpop.eup %4441  ;;  %v2986_v45 = vmul.f32 %v7379_v3, %v7433_v43  ;;  %v7564_v0 = vadd.f32 %v7396_v21, %v2981_v13  ;;  %4453 = vpow2.f32 %v3905_v30 }
 0x6b5   : > { %9122 = vst [vmem:[#allocation20_spill] sm:$0xff] %v7548_v16  ;;  %v3909_v28 = vmul.f32 -1.442695, %v7532_v27  ;;  %v7567_v50 = vpop.eup %4443  ;;  %v2987_v34 = vmul.f32 %v7379_v3, %v7436_v41  ;;  %v7572_v38 = vadd.f32 %v7396_v21, %v2982_v8  ;;  %4455 = vpow2.f32 %v3906_v39 }
 0x6b6   : > { %9123 = vst [vmem:[#allocation21_spill] sm:$0xff] %v7556_v36  ;;  %v3910_v42 = vmul.f32 -1.442695, %v7540_v62  ;;  %v7575_v23 = vpop.eup %4445  ;;  %v2988_v43 = vmul.f32 %v7379_v3, %v7443_v12  ;;  %v7580_v63 = vadd.f32 %v7396_v21, %v2983_v55  ;;  %4457 = vpow2.f32 %v3907_v22 }
 0x6b7   : > { %9124 = vst [vmem:[#allocation22_spill] sm:$0xff] %v7564_v0  ;;  %v3911_v9 = vmul.f32 -1.442695, %v7548_v16  ;;  %v7583_v57 = vpop.eup %4447  ;;  %v2989_v41 = vmul.f32 %v7379_v3, %v7446_v51  ;;  %v7588_v56 = vadd.f32 %v7396_v21, %v2984_v29  ;;  %4459 = vpow2.f32 %v3908_v7 }
 0x6b8   : > { %9125 = vst [vmem:[#allocation23_spill] sm:$0xff] %v7572_v38  ;;  %v3912_v6 = vmul.f32 -1.442695, %v7556_v36  ;;  %v7591_v60 = vpop.eup %4449  ;;  %v2990_v12 = vmul.f32 %v7379_v3, %v7453_v20  ;;  %v7596_v61 = vadd.f32 %v7396_v21, %v2985_v1  ;;  %4461 = vpow2.f32 %v3909_v28 }
 0x6b9   : > { %9126 = vst [vmem:[#allocation24_spill] sm:$0xff] %v7580_v63  ;;  %v3913_v47 = vmul.f32 -1.442695, %v7564_v0  ;;  %v7599_v19 = vpop.eup %4451  ;;  %v2991_v51 = vmul.f32 %v7379_v3, %v7461_v35  ;;  %v7604_v17 = vadd.f32 %v7396_v21, %v2986_v45  ;;  %4463 = vpow2.f32 %v3910_v42 }
 0x6ba   : > { %9127 = vst [vmem:[#allocation25_spill] sm:$0xff] %v7588_v56  ;;  %v3914_v13 = vmul.f32 -1.442695, %v7572_v38  ;;  %v4454_v32 = vpop.eup %4453  ;;  %v2992_v20 = vmul.f32 %v7379_v3, %v7469_v18  ;;  %v7610_v8 = vadd.f32 %v7396_v21, %v2987_v34  ;;  %4465 = vpow2.f32 %v3911_v9 }
 0x6bb   : > { %9128 = vst [vmem:[#allocation26_spill] sm:$0xff] %v7596_v61  ;;  %v3915_v30 = vmul.f32 -1.442695, %v7580_v63  ;;  %v4456_v55 = vpop.eup %4455  ;;  %v7614_v39 = vadd.f32 %v7396_v21, %v2988_v43  ;;  %4467 = vpow2.f32 %v3912_v6  ;;  %v3916_v35 = vmul.f32 -1.442695, %v7588_v56 }
 0x6bc   : > { %9129 = vst [vmem:[#allocation27_spill] sm:$0xff] %v7604_v17  ;;  %v4458_v29 = vpop.eup %4457  ;;  %v7618_v22 = vadd.f32 %v7396_v21, %v2989_v41  ;;  %4469 = vpow2.f32 %v3913_v47  ;;  %v3917_v3 = vmul.f32 -1.442695, %v7596_v61  ;;  %v7622_v1 = vadd.f32 %v7396_v21, %v2990_v12 }
 0x6bd   : > { %9130 = vst [vmem:[#allocation28_spill] sm:$0xff] %v7610_v8  ;;  %v4460_v18 = vpop.eup %4459  ;;  %v7625_v7 = vadd.f32 %v7396_v21, %v2991_v51  ;;  %4471 = vpow2.f32 %v3914_v13  ;;  %v3918_v45 = vmul.f32 -1.442695, %v7604_v17  ;;  %v7629_v34 = vadd.f32 %v7396_v21, %v2992_v20 }
 0x6be   : > { %9131 = vst [vmem:[#allocation29_spill] sm:$0xff] %v7614_v39  ;;  %v4462_v28 = vpop.eup %4461  ;;  %4473 = vpow2.f32 %v3915_v30  ;;  %v3919_v42 = vmul.f32 -1.442695, %v7610_v8  ;;  %v3920_v9 = vmul.f32 -1.442695, %v7614_v39  ;;  %v7634_v41 = vadd.f32 1.0, %v7512_v5 }
 0x6bf   : > { %9132 = vst [vmem:[#allocation30_spill] sm:$0xff] %v7618_v22  ;;  %v4464_v43 = vpop.eup %4463  ;;  %4475 = vpow2.f32 %v3916_v35  ;;  %v3921_v12 = vmul.f32 -1.442695, %v7618_v22  ;;  %v3922_v51 = vmul.f32 -1.442695, %v7622_v1  ;;  %v7640_v13 = vadd.f32 1.0, %v7519_v33 }
 0x6c0   : > { %9133 = vst [vmem:[#allocation31_spill] sm:$0xff] %v7622_v1  ;;  %v4466_v6 = vpop.eup %4465  ;;  %4477 = vpow2.f32 %v3917_v3  ;;  %v3923_v21 = vmul.f32 -1.442695, %v7625_v7  ;;  %v3924_v30 = vmul.f32 -1.442695, %v7629_v34  ;;  %v7644_v5 = vadd.f32 1.0, %v7527_v44 }
 0x6c1   : > { %9134 = vst [vmem:[#allocation32_spill] sm:$0xff] %v7625_v7  ;;  %v4468_v47 = vpop.eup %4467  ;;  %4479 = vpow2.f32 %v3918_v45  ;;  %v7647_v35 = vadd.f32 1.0, %v7535_v53  ;;  %v7650_v45 = vadd.f32 1.0, %v7543_v11  ;;  %v7653_v7 = vadd.f32 1.0, %v7551_v54 }
 0x6c2   : > { %9135 = vst [vmem:[#allocation33_spill] sm:$0xff] %v7629_v34  ;;  %v4470_v20 = vpop.eup %4469  ;;  %4481 = vpow2.f32 %v3919_v42  ;;  %v3167_v33 = vand.u32 2147483648, %v7634_v41  ;;  %v7657_v42 = vadd.f32 1.0, %v7559_v25  ;;  %v7660_v44 = vadd.f32 1.0, %v7567_v50 }
 0x6c3   : > { %v4472_v3 = vpop.eup %4471  ;;  %4483 = vpow2.f32 %v3920_v9  ;;  %v7663_v53 = vadd.f32 1.0, %v7575_v23  ;;  %v7667_v11 = vadd.f32 1.0, %v7583_v57  ;;  %v3182_v34 = vand.u32 2147483648, %v7640_v13 }
 0x6c4   : > { %v4474_v1 = vpop.eup %4473  ;;  %4485 = vrcp.f32 %v7634_v41  ;;  %v7673_v22 = vadd.f32 1.0, %v7591_v60  ;;  %v3197_v23 = vand.u32 2147483648, %v7644_v5  ;;  %v7679_v57 = vadd.f32 1.0, %v7599_v19 }
 0x6c5   : > { %v4476_v9 = vpop.eup %4475  ;;  %4487 = vrcp.f32 %v7640_v13  ;;  %v7681_v54 = vadd.f32 1.0, %v4454_v32  ;;  %v7683_v8 = vor.u32 1.1754944e-38, %v3167_v33  ;;  %v7685_v61 = vadd.f32 1.0, %v4456_v55 }
 0x6c6   : > { %v4478_v25 = vpop.eup %4477  ;;  %4489 = vrcp.f32 %v7644_v5  ;;  %v3212_v50 = vand.u32 2147483648, %v7647_v35  ;;  %v7689_v63 = vadd.f32 1.0, %v4458_v29  ;;  %v7691_v38 = vor.u32 1.1754944e-38, %v3182_v34 }
 0x6c7   : > { %v4480_v39 = vpop.eup %4479  ;;  %4491 = vpow2.f32 %v3921_v12  ;;  %v3227_v19 = vand.u32 2147483648, %v7650_v45  ;;  %v7697_v12 = vadd.f32 1.0, %v4460_v18  ;;  %v7705_v29 = vadd.f32 1.0, %v4462_v28 }
 0x6c8   : > { %v4482_v17 = vpop.eup %4481  ;;  %4493 = vpow2.f32 %v3922_v51  ;;  %v7699_v51 = vor.u32 1.1754944e-38, %v3197_v23  ;;  %v7707_v34 = vadd.f32 1.0, %v4464_v43  ;;  %v7713_v18 = vadd.f32 1.0, %v4466_v6 }
 0x6c9   : > { %v4484_v56 = vpop.eup %4483  ;;  %4495 = vrcp.f32 %v7647_v35  ;;  %v7715_v23 = vadd.f32 1.0, %v4468_v47  ;;  %v7717_v55 = vor.u32 1.1754944e-38, %v3212_v50  ;;  %v7719_v16 = vadd.f32 1.0, %v4470_v20 }
 0x6ca   : > { %v7695_v32 = vpop.eup %4485  ;;  %4497 = vrcp.f32 %v7650_v45  ;;  %v7721_v28 = vor.u32 1.1754944e-38, %v3227_v19  ;;  %v3242_v43 = vand.u32 2147483648, %v7653_v7  ;;  %v3257_v47 = vand.u32 2147483648, %v7657_v42 }
 0x6cb   : > { %v7703_v33 = vpop.eup %4487  ;;  %4499 = vrcp.f32 %v7653_v7  ;;  %v7731_v62 = vadd.f32 1.0, %v4472_v3  ;;  %v7740_v27 = vadd.f32 1.0, %v4474_v1  ;;  %v7742_v52 = vadd.f32 1.0, %v4476_v9 }
 0x6cc   : > { %v7711_v0 = vpop.eup %4489  ;;  %4501 = vpow2.f32 %v3923_v21  ;;  %v3157_v21 = vmul.f32 %v7695_v32, %v7634_v41  ;;  %v3172_v20 = vmul.f32 %v7703_v33, %v7640_v13  ;;  %v7748_v26 = vadd.f32 1.0, %v4478_v25 }
 0x6cd   : > { %v4492_v36 = vpop.eup %4491  ;;  %4503 = vrcp.f32 %v7657_v42  ;;  %v3187_v19 = vmul.f32 %v7711_v0, %v7644_v5  ;;  %9136 = vst [vmem:[#allocation34_spill] sm:$0xff] %v7740_v27  ;;  %v7750_v15 = vadd.f32 1.0, %v4480_v39  ;;  %v7752_v46 = vor.u32 1.1754944e-38, %v3242_v43 }
 0x6ce   : > { %v4494_v60 = vpop.eup %4493  ;;  %4505 = vpow2.f32 %v3924_v30  ;;  %9137 = vst [vmem:[#allocation35_spill] sm:$0xff] %v7742_v52  ;;  %v3272_v37 = vand.u32 2147483648, %v7660_v44  ;;  %v3158_v58 = vsub.f32 1.0, %v3157_v21  ;;  %v7755_v1 = vor.u32 1.1754944e-38, %v3257_v47 }
 0x6cf   : > { %v7729_v50 = vpop.eup %4495  ;;  %4507 = vrcp.f32 %v7660_v44  ;;  %9138 = vst [vmem:[#allocation36_spill] sm:$0xff] %v7748_v26  ;;  %v3287_v9 = vand.u32 2147483648, %v7663_v53  ;;  %v3173_v31 = vsub.f32 1.0, %v3172_v20  ;;  %v3188_v4 = vsub.f32 1.0, %v3187_v19 }
 0x6d0   : > { %v7738_v30 = vpop.eup %4497  ;;  %4509 = vrcp.f32 %v7663_v53  ;;  %9139 = vst [vmem:[#allocation37_spill] sm:$0xff] %v7750_v15  ;;  %v3202_v39 = vmul.f32 %v7729_v50, %v7647_v35  ;;  %v7764_v43 = vadd.f32 1.0, %v4482_v17  ;;  %vm3161_vm14 = vweird.f32 %v7634_v41 }
 0x6d1   : > { %v7746_v3 = vpop.eup %4499  ;;  %4511 = vrcp.f32 %v7667_v11  ;;  %v3217_v21 = vmul.f32 %v7738_v30, %v7650_v45  ;;  %v7774_v19 = vadd.f32 1.0, %v4484_v56  ;;  %v7776_v48 = vadd.f32 1.0, %v4492_v36 }
 0x6d2   : > { %v4502_v2 = vpop.eup %4501  ;;  %4513 = vrcp.f32 %v7673_v22  ;;  %9140 = vst [vmem:[#allocation38_spill] sm:$0xff] %v7764_v43  ;;  %v3232_v47 = vmul.f32 %v7746_v3, %v7653_v7  ;;  %vm3176_vm2 = vweird.f32 %v7640_v13  ;;  %v7779_v17 = vor.u32 1.1754944e-38, %v3272_v37 }
 0x6d3   : > { %v7759_v6 = vpop.eup %4503  ;;  %9141 = vst [vmem:[#allocation39_spill] sm:$0xff] %v7774_v19  ;;  %v7784_v10 = vadd.f32 1.0, %v4494_v60  ;;  %v7786_v59 = vadd.f32 1.0, %v4502_v2  ;;  %v3159_v40 = vmul.f32 %v7695_v32, %v3158_v58  ;;  %vm3191_vm8 = vweird.f32 %v7644_v5 }
 0x6d4   : > { %v4506_v25 = vpop.eup %4505  ;;  %9142 = vst [vmem:[#allocation40_spill] sm:$0xff] %v7776_v48  ;;  %v3247_v36 = vmul.f32 %v7759_v6, %v7657_v42  ;;  %v3174_v56 = vmul.f32 %v7703_v33, %v3173_v31  ;;  %v3189_v37 = vmul.f32 %v7711_v0, %v3188_v4  ;;  %v3203_v49 = vsub.f32 1.0, %v3202_v39 }
 0x6d5   : > { %v7772_v20 = vpop.eup %4507  ;;  %9143 = vst [vmem:[#allocation41_spill] sm:$0xff] %v7784_v10  ;;  %v7794_v48 = vor.u32 1.1754944e-38, %v3287_v9  ;;  %v7798_v60 = vadd.f32 1.0, %v4506_v25  ;;  %vm3206_vm13 = vweird.f32 %v7647_v35  ;;  %v3218_v2 = vsub.f32 1.0, %v3217_v21 }
 0x6d6   : > { %v7782_v24 = vpop.eup %4509  ;;  %9144 = vst [vmem:[#allocation42_spill] sm:$0xff] %v7786_v59  ;;  %v3233_v58 = vsub.f32 1.0, %v3232_v47  ;;  %vm3162_vm9 = vweird.f32 %v7695_v32  ;;  %v9146_v31 = vand.u32 2147483647, %v7634_v41  ;;  %v9149_v9 = vand.u32 2147483647, %v7640_v13 }
 0x6d7   : > { %v7796_v14 = vpop.eup %4511  ;;  %9145 = vst [vmem:[#allocation43_spill] sm:$0xff] %v7798_v60  ;;  %vm3221_vm0 = vweird.f32 %v7650_v45  ;;  %v3262_v25 = vmul.f32 %v7772_v20, %v7660_v44  ;;  %v3277_v21 = vmul.f32 %v7782_v24, %v7663_v53  ;;  %v3302_v47 = vand.u32 2147483648, %v7667_v11  ;;  %vm7848_vm15 = vmor %vm3161_vm14, %vm3162_vm9 }
 0x6d8   : > { %v7802_v10 = vpop.eup %4513  ;;  %vm7807_vm4 = vcmp.eq.f32.partialorder %v9146_v31, 8.507059e+37  ;;  %vm7813_vm11 = vcmp.eq.f32.partialorder %v9149_v9, 8.507059e+37  ;;  %v3160_v31 = vadd.f32 %v7695_v32, %v3159_v40  ;;  %vm3177_vm3 = vweird.f32 %v7703_v33 }
 0x6d9   : > { %vm3192_vm5 = vweird.f32 %v7711_v0  ;;  %v9152_v9 = vand.u32 2147483647, %v7644_v5  ;;  %v3248_v60 = vsub.f32 1.0, %v3247_v36  ;;  %v3175_v19 = vadd.f32 %v7703_v33, %v3174_v56  ;;  %vm7865_vm14 = vmor %vm3176_vm2, %vm3177_vm3 }
 0x6da   : > { %v3190_v43 = vadd.f32 %v7711_v0, %v3189_v37  ;;  %v3204_v15 = vmul.f32 %v7729_v50, %v3203_v49  ;;  %v3292_v40 = vmul.f32 %v7796_v14, %v7667_v11  ;;  %v3219_v26 = vmul.f32 %v7738_v30, %v3218_v2  ;;  %vm7884_vm2 = vmor %vm3191_vm8, %vm3192_vm5 }
 0x6db   : > { %vm7828_vm6 = vcmp.eq.f32.partialorder %v9152_v9, 8.507059e+37  ;;  %v3234_v52 = vmul.f32 %v7746_v3, %v3233_v58  ;;  %v3307_v9 = vmul.f32 %v7802_v10, %v7673_v22  ;;  %4515 = vrcp.f32 %v7679_v57 }
 0x6dc   : > { %vm3207_vm1 = vweird.f32 %v7729_v50  ;;  %v9157_v36 = vand.u32 2147483647, %v7647_v35  ;;  %v3263_v37 = vsub.f32 1.0, %v3262_v25  ;;  %v3278_v2 = vsub.f32 1.0, %v3277_v21 }
 0x6dd   : > { %v7859_v58 = vor.u32 1.1754944e-38, %v3302_v47  ;;  %vm3222_vm9 = vweird.f32 %v7738_v30  ;;  %vm3237_vm12 = vweird.f32 %v7746_v3  ;;  %vm3266_vm10 = vweird.f32 %v7660_v44  ;;  %vm7917_vm5 = vmor %vm3206_vm13, %vm3207_vm1 }
 0x6de   : > { %vm7855_vm7 = vcmp.eq.f32.partialorder %v9157_v36, 8.507059e+37  ;;  %v3249_v36 = vmul.f32 %v7759_v6, %v3248_v60  ;;  %4517 = vrcp.f32 %v7681_v54  ;;  %v3164_v25 = vsel %vm7848_vm15, %v7695_v32, %v3160_v31  ;;  %vm7942_vm13 = vmor %vm3221_vm0, %vm3222_vm9 }
 0x6df   : > { %v3179_v13 = vsel %vm7865_vm14, %v7703_v33, %v3175_v19  ;;  %v3205_v60 = vadd.f32 %v7729_v50, %v3204_v15  ;;  %v9164_v47 = vand.u32 2147483647, %v7650_v45  ;;  %v9167_v32 = vand.u32 2147483647, %v7653_v7 }
 0x6e0   : > { %v3293_v5 = vsub.f32 1.0, %v3292_v40  ;;  %v3194_v19 = vsel %vm7884_vm2, %v7711_v0, %v3190_v43  ;;  %v3220_v15 = vadd.f32 %v7738_v30, %v3219_v26  ;;  %v3235_v31 = vadd.f32 %v7746_v3, %v3234_v52 }
 0x6e1   : > { %vm7891_vm3 = vcmp.eq.f32.partialorder %v9164_v47, 8.507059e+37  ;;  %vm7897_vm15 = vcmp.eq.f32.partialorder %v9167_v32, 8.507059e+37  ;;  %v9170_v49 = vand.u32 2147483647, %v7657_v42  ;;  %v3308_v47 = vsub.f32 1.0, %v3307_v9  ;;  %v7926_v0 = vpop.eup %4515 }
 0x6e2   : > { %vm3252_vm2 = vweird.f32 %v7759_v6  ;;  %v3264_v26 = vmul.f32 %v7772_v20, %v3263_v37  ;;  %v3279_v52 = vmul.f32 %v7782_v24, %v3278_v2  ;;  %vm3296_vm14 = vweird.f32 %v7667_v11 }
 0x6e3   : > { %vm7909_vm8 = vcmp.eq.f32.partialorder %v9170_v49, 8.507059e+37  ;;  %4519 = vrcp.f32 %v7685_v61  ;;  %v7931_v35 = vsel %vm7807_vm4, %v7683_v8, %v3164_v25  ;;  %v7936_v43 = vsel %vm7813_vm11, %v7691_v38, %v3179_v13 }
 0x6e4   : > { %v3250_v37 = vadd.f32 %v7759_v6, %v3249_v36  ;;  %vm3311_vm1 = vweird.f32 %v7673_v22  ;;  %4521 = vrcp.f32 %v7689_v63  ;;  %v7952_v8 = vsel %vm7828_vm6, %v7699_v51, %v3194_v19 }
 0x6e5   : > { %v3209_v38 = vsel %vm7917_vm5, %v7729_v50, %v3205_v60  ;;  %vm9177_vm4 = vweird.f32 %v7653_v7  ;;  %v9180_v4 = vand.u32 2147483647, %v7660_v44  ;;  %v9183_v59 = vand.u32 2147483647, %v7663_v53  ;;  %v7979_v7 = vpop.eup %4517 }
 0x6e6   : > { %vm7961_vm11 = vmor %vm9177_vm4, %vm3237_vm12  ;;  %v3294_v50 = vmul.f32 %v7796_v14, %v3293_v5  ;;  %4523 = vrcp.f32 %v7697_v12  ;;  %v3224_v2 = vsel %vm7942_vm13, %v7738_v30, %v3220_v15  ;;  %vm3267_vm12 = vweird.f32 %v7772_v20 }
 0x6e7   : > { %vm7967_vm0 = vcmp.eq.f32.partialorder %v9180_v4, 8.507059e+37  ;;  %vm7973_vm6 = vcmp.eq.f32.partialorder %v9183_v59, 8.507059e+37  ;;  %v3239_v36 = vsel %vm7961_vm11, %v7746_v3, %v3235_v31  ;;  %v3309_v25 = vmul.f32 %v7802_v10, %v3308_v47 }
 0x6e8   : > { %vm9186_vm9 = vweird.f32 %v7657_v42  ;;  %v3265_v21 = vadd.f32 %v7772_v20, %v3264_v26  ;;  %v3280_v30 = vadd.f32 %v7782_v24, %v3279_v52  ;;  %vm3282_vm13 = vweird.f32 %v7782_v24 }
 0x6e9   : > { %vm7993_vm5 = vmor %vm9186_vm9, %vm3252_vm2  ;;  %v9189_v3 = vand.u32 2147483647, %v7667_v11  ;;  %v3322_v32 = vmul.f32 %v7926_v0, %v7679_v57  ;;  %v8011_v42 = vsel %vm7855_vm7, %v7717_v55, %v3209_v38  ;;  %v3315_v19 = vand.u32 2147483647, %v7673_v22  ;;  %v8018_v31 = vpop.eup %4519 }
 0x6ea   : > { %v3254_v5 = vsel %vm7993_vm5, %v7759_v6, %v3250_v37  ;;  %v3317_v15 = vand.u32 2147483648, %v7673_v22  ;;  %vm8022_vm2 = vmor %vm3266_vm10, %vm3267_vm12  ;;  %v3295_v56 = vadd.f32 %v7796_v14, %v3294_v50  ;;  %vm3297_vm7 = vweird.f32 %v7796_v14  ;;  %v8031_v6 = vpop.eup %4521 }
 0x6eb   : > { %vm8002_vm4 = vcmp.eq.f32.partialorder %v9189_v3, 8.507059e+37  ;;  %v3337_v55 = vmul.f32 %v7979_v7, %v7681_v54  ;;  %4525 = vrcp.f32 %v7705_v29  ;;  %v8036_v47 = vsel %vm7891_vm3, %v7721_v28, %v3224_v2  ;;  %vm8068_vm3 = vmor %vm3296_vm14, %vm3297_vm7 }
 0x6ec   : > { %v8041_v44 = vsel %vm7897_vm15, %v7752_v46, %v3239_v36  ;;  %vm9194_vm10 = vweird.f32 %v7663_v53  ;;  %v3310_v26 = vadd.f32 %v7802_v10, %v3309_v25  ;;  %vm3312_vm12 = vweird.f32 %v7802_v10  ;;  %v8053_v27 = vpop.eup %4523 }
 0x6ed   : > { %vm8047_vm11 = vmor %vm9194_vm10, %vm3282_vm13  ;;  %v8058_v28 = vsel %vm7909_vm8, %v7755_v1, %v3254_v5  ;;  %v3269_v46 = vsel %vm8022_vm2, %v7772_v20, %v3265_v21  ;;  %v3323_v33 = vsub.f32 1.0, %v3322_v32  ;;  %vm8072_vm15 = vcmp.eq.f32.partialorder %v3315_v19, 8.507059e+37 }
 0x6ee   : > { %v3284_v53 = vsel %vm8047_vm11, %v7782_v24, %v3280_v30  ;;  %v3318_v1 = vor.u32 1.1754944e-38, %v3317_v15  ;;  %v3332_v41 = vand.u32 2147483648, %v7679_v57  ;;  %v3352_v20 = vmul.f32 %v8018_v31, %v7685_v61  ;;  %vm8084_vm14 = vmor %vm3311_vm1, %vm3312_vm12 }
 0x6ef   : > { %v3299_v24 = vsel %vm8068_vm3, %v7796_v14, %v3295_v56  ;;  %vm3326_vm8 = vweird.f32 %v7679_v57  ;;  %v3330_v37 = vand.u32 2147483647, %v7679_v57  ;;  %v3338_v38 = vsub.f32 1.0, %v3337_v55 }
 0x6f0   : > { %v3367_v45 = vmul.f32 %v8031_v6, %v7689_v63  ;;  %v8095_v4 = vsel %vm7967_vm0, %v7779_v17, %v3269_v46  ;;  %v8100_v14 = vsel %vm7973_vm6, %v7794_v48, %v3284_v53  ;;  %v3314_v22 = vsel %vm8084_vm14, %v7802_v10, %v3310_v26 }
 0x6f1   : > { %v3382_v59 = vmul.f32 %v8053_v27, %v7697_v12  ;;  %v8107_v50 = vpop.eup %4525  ;;  %v3324_v2 = vmul.f32 %v7926_v0, %v3323_v33  ;;  %vm3341_vm1 = vweird.f32 %v7681_v54  ;;  %v3345_v17 = vand.u32 2147483647, %v7681_v54 }
 0x6f2   : > { %v3347_v39 = vand.u32 2147483648, %v7681_v54  ;;  %4527 = vrcp.f32 %v7707_v34  ;;  %v8117_v48 = vsel %vm8002_vm4, %v7859_v58, %v3299_v24  ;;  %vm3327_vm0 = vweird.f32 %v7926_v0 }
 0x6f3   : > { %v3333_v10 = vor.u32 1.1754944e-38, %v3332_v41  ;;  %v3353_v51 = vsub.f32 1.0, %v3352_v20  ;;  %v8122_v36 = vsel %vm8072_vm15, %v3318_v1, %v3314_v22  ;;  %v3339_v25 = vmul.f32 %v7979_v7, %v3338_v38  ;;  %vm8156_vm2 = vmor %vm3326_vm8, %vm3327_vm0 }
 0x6f4   : > { %v3360_v13 = vand.u32 2147483647, %v7685_v61  ;;  %v3368_v21 = vsub.f32 1.0, %v3367_v45  ;;  %vm8126_vm6 = vcmp.eq.f32.partialorder %v3330_v37, 8.507059e+37  ;;  %vm3356_vm9 = vweird.f32 %v7685_v61 }
 0x6f5   : > { %v3362_v58 = vand.u32 2147483648, %v7685_v61  ;;  %v3377_v3 = vand.u32 2147483648, %v7689_v63  ;;  %v3383_v60 = vsub.f32 1.0, %v3382_v59  ;;  %v3397_v32 = vmul.f32 %v8107_v50, %v7705_v29 }
 0x6f6   : > { %v3325_v5 = vadd.f32 %v7926_v0, %v3324_v2  ;;  %vm8136_vm5 = vcmp.eq.f32.partialorder %v3345_v17, 8.507059e+37  ;;  %v3348_v15 = vor.u32 1.1754944e-38, %v3347_v39  ;;  %v3375_v49 = vand.u32 2147483647, %v7689_v63  ;;  %v9217_v2 = vld [vmem:[#allocation34_spill] sm:$0xff] }
 0x6f7   : > { %4529 = vrcp.f32 %v7713_v18  ;;  %v3354_v56 = vmul.f32 %v8018_v31, %v3353_v51  ;;  %vm3371_vm13 = vweird.f32 %v7689_v63  ;;  %v3390_v55 = vand.u32 2147483647, %v7697_v12 }
 0x6f8   : > { %4531 = vrcp.f32 %v7715_v23  ;;  %v8146_v40 = vpop.eup %4527  ;;  %v3340_v26 = vadd.f32 %v7979_v7, %v3339_v25  ;;  %vm3342_vm4 = vweird.f32 %v7979_v7  ;;  %v3369_v46 = vmul.f32 %v8031_v6, %v3368_v21 }
 0x6f9   : > { %4533 = vrcp.f32 %v7719_v16  ;;  %vm8160_vm7 = vcmp.eq.f32.partialorder %v3360_v13, 8.507059e+37  ;;  %v3363_v52 = vor.u32 1.1754944e-38, %v3362_v58  ;;  %v3378_v9 = vor.u32 1.1754944e-38, %v3377_v3  ;;  %vm8177_vm3 = vmor %vm3341_vm1, %vm3342_vm4 }
 0x6fa   : > { %v3384_v1 = vmul.f32 %v8053_v27, %v3383_v60  ;;  %v3398_v41 = vsub.f32 1.0, %v3397_v32  ;;  %v3329_v20 = vsel %vm8156_vm2, %v7926_v0, %v3325_v5  ;;  %vm3357_vm10 = vweird.f32 %v8018_v31 }
 0x6fb   : > { %vm8169_vm11 = vcmp.eq.f32.partialorder %v3375_v49, 8.507059e+37  ;;  %vm3386_vm12 = vweird.f32 %v7697_v12  ;;  %v3392_v24 = vand.u32 2147483648, %v7697_v12  ;;  %v3355_v37 = vadd.f32 %v8018_v31, %v3354_v56  ;;  %vm8214_vm0 = vmor %vm3356_vm9, %vm3357_vm10 }
 0x6fc   : > { %vm8182_vm15 = vcmp.eq.f32.partialorder %v3390_v55, 8.507059e+37  ;;  %v3405_v38 = vand.u32 2147483647, %v7705_v29  ;;  %v3412_v45 = vmul.f32 %v8146_v40, %v7707_v34  ;;  %4535 = vrcp.f32 %v7731_v62  ;;  %v9226_v55 = vld [vmem:[#allocation35_spill] sm:$0xff] }
 0x6fd   : > { %v8190_v22 = vpop.eup %4529  ;;  %v3344_v54 = vsel %vm8177_vm3, %v7979_v7, %v3340_v26  ;;  %v3370_v59 = vadd.f32 %v8031_v6, %v3369_v46  ;;  %vm3372_vm14 = vweird.f32 %v8031_v6  ;;  %4537 = vrcp.f32 %v9217_v2 }
 0x6fe   : > { %v8198_v17 = vpop.eup %4531  ;;  %v3385_v39 = vadd.f32 %v8053_v27, %v3384_v1  ;;  %vm3387_vm8 = vweird.f32 %v8053_v27  ;;  %v3399_v51 = vmul.f32 %v8107_v50, %v3398_v41  ;;  %vm3401_vm1 = vweird.f32 %v7705_v29 }
 0x6ff   : > { %v8204_v25 = vpop.eup %4533  ;;  %v8208_v7 = vsel %vm8126_vm6, %v3333_v10, %v3329_v20  ;;  %v3393_v21 = vor.u32 1.1754944e-38, %v3392_v24  ;;  %v3407_v58 = vand.u32 2147483648, %v7705_v29  ;;  %v3422_v3 = vand.u32 2147483648, %v7707_v34  ;;  %vm8231_vm6 = vmor %vm3371_vm13, %vm3372_vm14 }
 0x700   : > { %v8222_v60 = vsel %vm8136_vm5, %v3348_v15, %v3344_v54  ;;  %v3359_v10 = vsel %vm8214_vm0, %v8018_v31, %v3355_v37  ;;  %vm8235_vm9 = vcmp.eq.f32.partialorder %v3405_v38, 8.507059e+37  ;;  %v3413_v32 = vsub.f32 1.0, %v3412_v45  ;;  %vm8248_vm5 = vmor %vm3386_vm12, %vm3387_vm8 }
 0x701   : > { %v3427_v5 = vmul.f32 %v8190_v22, %v7713_v18  ;;  %v3374_v31 = vsel %vm8231_vm6, %v8031_v6, %v3370_v59  ;;  %vm3402_vm13 = vweird.f32 %v8107_v50  ;;  %v3420_v19 = vand.u32 2147483647, %v7707_v34 }
 0x702   : > { %v3442_v15 = vmul.f32 %v8198_v17, %v7715_v23  ;;  %v8256_v49 = vpop.eup %4535  ;;  %v3389_v6 = vsel %vm8248_vm5, %v8053_v27, %v3385_v39  ;;  %v3400_v56 = vadd.f32 %v8107_v50, %v3399_v51  ;;  %vm3416_vm4 = vweird.f32 %v7707_v34  ;;  %vm8287_vm2 = vmor %vm3401_vm1, %vm3402_vm13  ;;  %v9231_v51 = vld [vmem:[#allocation36_spill] sm:$0xff] }
 0x703   : > { %v3457_v12 = vmul.f32 %v8204_v25, %v7719_v16  ;;  %4539 = vrcp.f32 %v9226_v55  ;;  %v8266_v26 = vpop.eup %4537  ;;  %v8270_v46 = vsel %vm8160_vm7, %v3363_v52, %v3359_v10  ;;  %v3408_v53 = vor.u32 1.1754944e-38, %v3407_v58 }
 0x704   : > { %v3423_v1 = vor.u32 1.1754944e-38, %v3422_v3  ;;  %v3437_v41 = vand.u32 2147483648, %v7713_v18  ;;  %v8275_v27 = vsel %vm8169_vm11, %v3378_v9, %v3374_v31  ;;  %v3414_v20 = vmul.f32 %v8146_v40, %v3413_v32 }
 0x705   : > { %v3428_v24 = vsub.f32 1.0, %v3427_v5  ;;  %v3435_v11 = vand.u32 2147483647, %v7713_v18  ;;  %v8281_v37 = vsel %vm8182_vm15, %v3393_v21, %v3389_v6  ;;  %vm3417_vm7 = vweird.f32 %v8146_v40 }
 0x706   : > { %v3443_v52 = vsub.f32 1.0, %v3442_v15  ;;  %v3452_v9 = vand.u32 2147483648, %v7715_v23  ;;  %v3404_v57 = vsel %vm8287_vm2, %v8107_v50, %v3400_v56  ;;  %vm8296_vm10 = vcmp.eq.f32.partialorder %v3420_v19, 8.507059e+37  ;;  %vm8330_vm8 = vmor %vm3416_vm4, %vm3417_vm7 }
 0x707   : > { %vm3431_vm11 = vweird.f32 %v7713_v18  ;;  %v3458_v29 = vsub.f32 1.0, %v3457_v12  ;;  %v3472_v38 = vmul.f32 %v8256_v49, %v7731_v62  ;;  %v3487_v45 = vmul.f32 %v8266_v26, %v9217_v2 }
 0x708   : > { %v3438_v54 = vor.u32 1.1754944e-38, %v3437_v41  ;;  %v3450_v59 = vand.u32 2147483647, %v7715_v23  ;;  %v3467_v39 = vand.u32 2147483648, %v7719_v16  ;;  %4541 = vrcp.f32 %v9231_v51 }
 0x709   : > { %v8308_v50 = vpop.eup %4539  ;;  %v3415_v13 = vadd.f32 %v8146_v40, %v3414_v20  ;;  %v3429_v21 = vmul.f32 %v8190_v22, %v3428_v24  ;;  %vm3446_vm12 = vweird.f32 %v7715_v23  ;;  %v3465_v58 = vand.u32 2147483647, %v7719_v16  ;;  %v9240_v20 = vld [vmem:[#allocation37_spill] sm:$0xff]  ;;  %v9275_v23 = vld [vmem:[#allocation19_spill] sm:$0xff] }
 0x70a   : > { %v8316_v3 = vsel %vm8235_vm9, %v3408_v53, %v3404_v57  ;;  %vm3432_vm3 = vweird.f32 %v8190_v22  ;;  %v3444_v10 = vmul.f32 %v8198_v17, %v3443_v52  ;;  %vm3461_vm15 = vweird.f32 %v7719_v16 }
 0x70b   : > { %vm8321_vm14 = vcmp.eq.f32.partialorder %v3435_v11, 8.507059e+37  ;;  %v3453_v32 = vor.u32 1.1754944e-38, %v3452_v9  ;;  %v3459_v5 = vmul.f32 %v8204_v25, %v3458_v29  ;;  %v3473_v31 = vsub.f32 1.0, %v3472_v38  ;;  %vm8370_vm4 = vmor %vm3431_vm11, %vm3432_vm3 }
 0x70c   : > { %v3488_v63 = vsub.f32 1.0, %v3487_v45  ;;  %vm8334_vm1 = vcmp.eq.f32.partialorder %v3450_v59, 8.507059e+37  ;;  %v3468_v15 = vor.u32 1.1754944e-38, %v3467_v39  ;;  %vm3476_vm0 = vweird.f32 %v7731_v62  ;;  %v9243_v59 = vld [vmem:[#allocation38_spill] sm:$0xff] }
 0x70d   : > { %v3480_v6 = vand.u32 2147483647, %v7731_v62  ;;  %v3502_v56 = vmul.f32 %v8308_v50, %v9226_v55  ;;  %v3419_v34 = vsel %vm8330_vm8, %v8146_v40, %v3415_v13  ;;  %v3430_v12 = vadd.f32 %v8190_v22, %v3429_v21 }
 0x70e   : > { %vm8346_vm6 = vcmp.eq.f32.partialorder %v3465_v58, 8.507059e+37  ;;  %v3482_v41 = vand.u32 2147483648, %v7731_v62  ;;  %4543 = vrcp.f32 %v9240_v20  ;;  %v8352_v24 = vpop.eup %4541  ;;  %v3445_v11 = vadd.f32 %v8198_v17, %v3444_v10 }
 0x70f   : > { %vm3447_vm9 = vweird.f32 %v8198_v17  ;;  %vm3491_vm5 = vweird.f32 %v9217_v2  ;;  %v3495_v40 = vand.u32 2147483647, %v9217_v2  ;;  %v3460_v33 = vadd.f32 %v8204_v25, %v3459_v5 }
 0x710   : > { %vm3462_vm13 = vweird.f32 %v8204_v25  ;;  %v3474_v52 = vmul.f32 %v8256_v49, %v3473_v31  ;;  %v3489_v9 = vmul.f32 %v8266_v26, %v3488_v63  ;;  %v8364_v57 = vsel %vm8296_vm10, %v3423_v1, %v3419_v34  ;;  %vm8381_vm2 = vmor %vm3446_vm12, %vm3447_vm9 }
 0x711   : > { %v3497_v38 = vand.u32 2147483648, %v9217_v2  ;;  %v3503_v45 = vsub.f32 1.0, %v3502_v56  ;;  %4545 = vrcp.f32 %v9243_v59  ;;  %v3434_v39 = vsel %vm8370_vm4, %v8190_v22, %v3430_v12  ;;  %vm8399_vm10 = vmor %vm3461_vm15, %vm3462_vm13 }
 0x712   : > { %vm8385_vm7 = vcmp.eq.f32.partialorder %v3480_v6, 8.507059e+37  ;;  %v3483_v0 = vor.u32 1.1754944e-38, %v3482_v41  ;;  %v3510_v13 = vand.u32 2147483647, %v9226_v55  ;;  %v3517_v21 = vmul.f32 %v8352_v24, %v9231_v51 }
 0x713   : > { %v3449_v22 = vsel %vm8381_vm2, %v8198_v17, %v3445_v11  ;;  %vm3477_vm11 = vweird.f32 %v8256_v49  ;;  %vm8404_vm12 = vcmp.eq.f32.partialorder %v3495_v40, 8.507059e+37  ;;  %vm3506_vm3 = vweird.f32 %v9226_v55 }
 0x714   : > { %v3512_v10 = vand.u32 2147483648, %v9226_v55  ;;  %v8410_v5 = vpop.eup %4543  ;;  %v3464_v16 = vsel %vm8399_vm10, %v8204_v25, %v3460_v33  ;;  %v3475_v17 = vadd.f32 %v8256_v49, %v3474_v52  ;;  %v3490_v31 = vadd.f32 %v8266_v26, %v3489_v9  ;;  %vm8430_vm8 = vmor %vm3476_vm0, %vm3477_vm11  ;;  %v9259_v33 = vld [vmem:[#allocation40_spill] sm:$0xff]  ;;  %v9260_v52 = vld [vmem:[#allocation41_spill] sm:$0xff] }
 0x715   : > { %vm3492_vm15 = vweird.f32 %v8266_v26  ;;  %v8420_v63 = vsel %vm8321_vm14, %v3438_v54, %v3434_v39  ;;  %v3498_v30 = vor.u32 1.1754944e-38, %v3497_v38  ;;  %v3504_v6 = vmul.f32 %v8308_v50, %v3503_v45  ;;  %v9254_v54 = vld [vmem:[#allocation39_spill] sm:$0xff]  ;;  %v9261_v38 = vld [vmem:[#allocation42_spill] sm:$0xff] }
 0x716   : > { %v3525_v56 = vand.u32 2147483647, %v9231_v51  ;;  %v8426_v34 = vsel %vm8334_vm1, %v3453_v32, %v3449_v22  ;;  %v3518_v12 = vsub.f32 1.0, %v3517_v21  ;;  %v3527_v61 = vand.u32 2147483648, %v9231_v51  ;;  %vm8444_vm14 = vmor %vm3491_vm5, %vm3492_vm15  ;;  %v9262_v39 = vld [vmem:[#allocation43_spill] sm:$0xff] }
 0x717   : > { %4547 = vrcp.f32 %v9254_v54  ;;  %v8436_v41 = vpop.eup %4545  ;;  %v8440_v11 = vsel %vm8346_vm6, %v3468_v15, %v3464_v16  ;;  %vm8448_vm1 = vcmp.eq.f32.partialorder %v3510_v13, 8.507059e+37  ;;  %v3513_v19 = vor.u32 1.1754944e-38, %v3512_v10  ;;  %v9267_v16 = vld [vmem:[#allocation11_spill] sm:$0xff] }
 0x718   : > { %v3532_v40 = vmul.f32 %v8410_v5, %v9240_v20  ;;  %4549 = vrcp.f32 %v9259_v33  ;;  %v3479_v15 = vsel %vm8430_vm8, %v8256_v49, %v3475_v17  ;;  %v3494_v2 = vsel %vm8444_vm14, %v8266_v26, %v3490_v31 }
 0x719   : > { %vm3521_vm0 = vweird.f32 %v9231_v51  ;;  %v3542_v53 = vand.u32 2147483648, %v9240_v20  ;;  %4551 = vrcp.f32 %v9260_v52  ;;  %v3505_v9 = vadd.f32 %v8308_v50, %v3504_v6 }
 0x71a   : > { %vm3507_vm6 = vweird.f32 %v8308_v50  ;;  %v3540_v29 = vand.u32 2147483647, %v9240_v20  ;;  %4553 = vrcp.f32 %v9261_v38  ;;  %v3519_v49 = vmul.f32 %v8352_v24, %v3518_v12  ;;  %v9270_v12 = vld [vmem:[#allocation15_spill] sm:$0xff] }
 0x71b   : > { %v8469_v45 = vor.u32 1.1754944e-38, %v3527_v61  ;;  %v3547_v26 = vmul.f32 %v8436_v41, %v9243_v59  ;;  %4555 = vrcp.f32 %v9262_v39  ;;  %v8483_v1 = vsel %vm8385_vm7, %v3483_v0, %v3479_v15  ;;  %vm8494_vm5 = vmor %vm3506_vm3, %vm3507_vm6 }
 0x71c   : > { %v8487_v13 = vsel %vm8404_vm12, %v3498_v30, %v3494_v2  ;;  %vm3522_vm9 = vweird.f32 %v8352_v24  ;;  %v3533_v21 = vsub.f32 1.0, %v3532_v40  ;;  %vm8498_vm13 = vcmp.eq.f32.partialorder %v3525_v56, 8.507059e+37  ;;  %v9268_v30 = vld [vmem:[#allocation12_spill] sm:$0xff]  ;;  %v9269_v56 = vld [vmem:[#allocation2_spill] sm:$0xff] }
 0x71d   : > { %v8490_v22 = vpop.eup %4547  ;;  %v8502_v18 = vor.u32 1.1754944e-38, %v3542_v53  ;;  %v3555_v0 = vand.u32 2147483647, %v9243_v59  ;;  %v3557_v58 = vand.u32 2147483648, %v9243_v59  ;;  %v3636_v17 = vmul.f32 %v7931_v35, %v9267_v16  ;;  %v9273_v53 = vld [vmem:[#allocation9_spill] sm:$0xff]  ;;  %vm8557_vm3 = vmor %vm3521_vm0, %vm3522_vm9 }
 0x71e   : > { %v8508_v31 = vpop.eup %4549  ;;  %v3509_v55 = vsel %vm8494_vm5, %v8308_v50, %v3505_v9  ;;  %vm3536_vm4 = vweird.f32 %v9240_v20  ;;  %v3637_v6 = vmul.f32 %v7936_v43, %v9268_v30  ;;  %v3638_v25 = vmul.f32 %v7952_v8, %v9269_v56  ;;  %v9283_v30 = vld [vmem:[#allocation5_spill] sm:$0xff] }
 0x71f   : > { %v3639_v61 = vmul.f32 %v8011_v42, %v9270_v12  ;;  %v8520_v32 = vpop.eup %4551  ;;  %v3520_v35 = vadd.f32 %v8352_v24, %v3519_v49  ;;  %vm3537_vm2 = vweird.f32 %v8410_v5  ;;  %v3548_v50 = vsub.f32 1.0, %v3547_v26  ;;  %v9272_v42 = vld [vmem:[#allocation8_spill] sm:$0xff]  ;;  %v9285_v12 = vld [vmem:[#allocation14_spill] sm:$0xff] }
 0x720   : > { %v3570_v40 = vand.u32 2147483647, %v9254_v54  ;;  %vm9271_vm7 = vcmask 523264   ;;  %v8527_v15 = vpop.eup %4553  ;;  %v3534_v43 = vmul.f32 %v8410_v5, %v3533_v21  ;;  %v3562_v8 = vmul.f32 %v8490_v22, %v9254_v54 }
 0x721   : > { %3668 = vst.msk [vmem:[%s8479_s25] sm:$0xff] %vm9271_vm7, %v3636_v17  ;;  %v3640_v2 = vmul.f32 %v8036_v47, %v9272_v42  ;;  %v3641_v9 = vmul.f32 %v8041_v44, %v9273_v53  ;;  %vm9274_vm10 = vmmov %vm9271_vm7  ;;  %v8538_v49 = vpop.eup %4555  ;;  %v8542_v26 = vsel %vm8448_vm1, %v3513_v19, %v3509_v55  ;;  %vm3551_vm11 = vweird.f32 %v9243_v59  ;;  %v9297_v44 = vld [vmem:[#allocation4_spill] sm:$0xff] }
 0x722   : > { %3669 = vst.msk [vmem:[%s8479_s25 + $0x8] sm:$0xff] %vm9274_vm10, %v3637_v6  ;;  %v8545_v21 = vor.u32 1.1754944e-38, %v3557_v58  ;;  %v3577_v47 = vmul.f32 %v8508_v31, %v9259_v33  ;;  %v3642_v16 = vmul.f32 %v8058_v28, %v9275_v23  ;;  %vm9276_vm12 = vmmov %vm9271_vm7  ;;  %vm8561_vm15 = vcmp.eq.f32.partialorder %v3540_v29, 8.507059e+37  ;;  %v9281_v58 = vld [vmem:[#allocation13_spill] sm:$0xff] }
 0x723   : > { %3670 = vst.msk [vmem:[%s8479_s25 + $0x10] sm:$0xff] %vm9276_vm12, %v3638_v25  ;;  %vm3552_vm8 = vweird.f32 %v8436_v41  ;;  %v3572_v19 = vand.u32 2147483648, %v9254_v54  ;;  %v3592_v28 = vmul.f32 %v8520_v32, %v9260_v52  ;;  %v3643_v17 = vmul.f32 %v8095_v4, %v9281_v58  ;;  %vm9282_vm14 = vmmov %vm9271_vm7  ;;  %v9299_v58 = vld [vmem:[#allocation3_spill] sm:$0xff] }
 0x724   : > { %3671 = vst.msk [vmem:[%s8479_s25 + $0x18] sm:$0xff] %vm9282_vm14, %v3639_v61  ;;  %v3524_v51 = vsel %vm8557_vm3, %v8352_v24, %v3520_v35  ;;  %v3549_v29 = vmul.f32 %v8436_v41, %v3548_v50  ;;  %v3607_v55 = vmul.f32 %v8527_v15, %v9261_v38  ;;  %v3644_v6 = vmul.f32 %v8100_v14, %v9283_v30  ;;  %vm9284_vm1 = vmmov %vm9271_vm7 }
 0x725   : > { %3672 = vst.msk [vmem:[%s8479_s25 + $0x20] sm:$0xff] %vm9284_vm1, %v3640_v2  ;;  %v3535_v56 = vadd.f32 %v8410_v5, %v3534_v43  ;;  %v3563_v4 = vsub.f32 1.0, %v3562_v8  ;;  %v3622_v25 = vmul.f32 %v8538_v49, %v9262_v39  ;;  %v3645_v24 = vmul.f32 %v8117_v48, %v9285_v12  ;;  %vm9286_vm0 = vmmov %vm9284_vm1  ;;  %v9289_v43 = vld [vmem:[#allocation6_spill] sm:$0xff]  ;;  %v9291_v2 = vld [vmem:[#allocation7_spill] sm:$0xff] }
 0x726   : > { %3673 = vst.msk [vmem:[%s8479_s25 + $0x28] sm:$0xff] %vm9286_vm0, %v3641_v9  ;;  %vm8590_vm6 = vcmp.eq.f32.partialorder %v3555_v0, 8.507059e+37  ;;  %v3578_v35 = vsub.f32 1.0, %v3577_v47  ;;  %v3585_v14 = vand.u32 2147483647, %v9259_v33  ;;  %v3587_v50 = vand.u32 2147483648, %v9259_v33  ;;  %vm9290_vm9 = vmmov %vm9286_vm0 }
 0x727   : > { %v3646_v8 = vmul.f32 %v8122_v36, %v9289_v43  ;;  %3674 = vst.msk [vmem:[%s8479_s25 + $0x30] sm:$0xff] %vm9290_vm9, %v3642_v16  ;;  %v8603_v48 = vsel %vm8498_vm13, %v8469_v45, %v3524_v51  ;;  %vm3566_vm5 = vweird.f32 %v9254_v54  ;;  %v8606_v0 = vor.u32 1.1754944e-38, %v3572_v19  ;;  %vm9292_vm7 = vmmov %vm9286_vm0  ;;  %v9295_v47 = vld [vmem:[#allocation18_spill] sm:$0xff] }
 0x728   : > { %v3593_v42 = vsub.f32 1.0, %v3592_v28  ;;  %v3647_v53 = vmul.f32 %v8208_v7, %v9291_v2  ;;  %3675 = vst.msk [vmem:[%s8479_s25 + $0x38] sm:$0xff] %vm9292_vm7, %v3643_v17  ;;  %vm8616_vm10 = vmor %vm3536_vm4, %vm3537_vm2  ;;  %v3550_v45 = vadd.f32 %v8436_v41, %v3549_v29  ;;  %vm3581_vm13 = vweird.f32 %v9259_v33  ;;  %v9305_v29 = vld [vmem:[#allocation16_spill] sm:$0xff]  ;;  %v9321_v43 = vld [vmem:[#allocation22_spill] sm:$0xff] }
 0x729   : > { %v3600_v10 = vand.u32 2147483647, %v9260_v52  ;;  %v3608_v9 = vsub.f32 1.0, %v3607_v55  ;;  %v3648_v7 = vmul.f32 %v8222_v60, %v9295_v47  ;;  %vm9296_vm12 = vmmov %vm9286_vm0  ;;  %v3539_v20 = vsel %vm8616_vm10, %v8410_v5, %v3535_v56  ;;  %v9309_v56 = vld [vmem:[#allocation17_spill] sm:$0xff]  ;;  %v9345_v5 = vld [vmem:[#allocation30_spill] sm:$0xff] }
 0x72a   : > { %3676 = vst.msk [vmem:[%s8479_s25 + $0x40] sm:$0xff] %vm9296_vm12, %v3644_v6  ;;  %v3564_v23 = vmul.f32 %v8490_v22, %v3563_v4  ;;  %v3623_v16 = vsub.f32 1.0, %v3622_v25  ;;  %v3649_v19 = vmul.f32 %v8270_v46, %v9297_v44  ;;  %vm9298_vm4 = vmmov %vm9286_vm0  ;;  %vm3567_vm2 = vweird.f32 %v8490_v22  ;;  %v9313_v4 = vld [vmem:[#allocation10_spill] sm:$0xff] }
 0x72b   : > { %3677 = vst.msk [vmem:[%s8479_s25 + $0x48] sm:$0xff] %vm9298_vm4, %v3645_v24  ;;  %v3579_v28 = vmul.f32 %v8508_v31, %v3578_v35  ;;  %v3588_v60 = vor.u32 1.1754944e-38, %v3587_v50  ;;  %v3650_v17 = vmul.f32 %v8275_v27, %v9299_v58  ;;  %vm9300_vm3 = vmmov %vm9286_vm0  ;;  %vm8649_vm1 = vcmp.eq.f32.partialorder %v3570_v40, 8.507059e+37 }
 0x72c   : > { %3678 = vst.msk [vmem:[%s8479_s25 + $0x50] sm:$0xff] %vm9300_vm3, %v3646_v8  ;;  %vm8645_vm14 = vmor %vm3551_vm11, %vm3552_vm8  ;;  %v3594_v51 = vmul.f32 %v8520_v32, %v3593_v42  ;;  %vm3596_vm0 = vweird.f32 %v9260_v52  ;;  %v3602_v27 = vand.u32 2147483648, %v9260_v52  ;;  %v3651_v55 = vmul.f32 %v8281_v37, %v9305_v29  ;;  %v9349_v29 = vld [vmem:[#allocation32_spill] sm:$0xff] }
 0x72d   : > { %vm9306_vm9 = vmmov %vm9300_vm3  ;;  %v3544_v59 = vsel %vm8561_vm15, %v8502_v18, %v3539_v20  ;;  %v3554_v40 = vsel %vm8645_vm14, %v8436_v41, %v3550_v45  ;;  %vm8666_vm11 = vcmp.eq.f32.partialorder %v3585_v14, 8.507059e+37  ;;  %v3609_v6 = vmul.f32 %v8527_v15, %v3608_v9  ;;  %v9317_v14 = vld [vmem:[#allocation21_spill] sm:$0xff] }
 0x72e   : > { %3679 = vst.msk [vmem:[%s8479_s25 + $0x58] sm:$0xff] %vm9306_vm9, %v3647_v53  ;;  %v3652_v37 = vmul.f32 %v8316_v3, %v9309_v56  ;;  %vm9310_vm8 = vmmov %vm9300_vm3  ;;  %v3565_v62 = vadd.f32 %v8490_v22, %v3564_v23  ;;  %vm8676_vm7 = vcmp.eq.f32.partialorder %v3600_v10, 8.507059e+37  ;;  %v3624_v41 = vmul.f32 %v8538_v49, %v3623_v16  ;;  %v9315_v3 = vld [vmem:[#allocation20_spill] sm:$0xff]  ;;  %v9339_v23 = vld [vmem:[#allocation27_spill] sm:$0xff] }
 0x72f   : > { %3680 = vst.msk [vmem:[%s8479_s25 + $0x60] sm:$0xff] %vm9310_vm8, %v3648_v7  ;;  %v3653_v25 = vmul.f32 %v8364_v57, %v9313_v4  ;;  %vm9314_vm15 = vmmov %vm9300_vm3  ;;  %v3580_v12 = vadd.f32 %v8508_v31, %v3579_v28  ;;  %vm3582_vm10 = vweird.f32 %v8508_v31  ;;  %vm3611_vm12 = vweird.f32 %v9261_v38 }
 0x730   : > { %3681 = vst.msk [vmem:[%s8479_s25 + $0x68] sm:$0xff] %vm9314_vm15, %v3649_v19  ;;  %v3654_v24 = vmul.f32 %v8420_v63, %v9315_v3  ;;  %vm9316_vm4 = vmmov %vm9300_vm3  ;;  %v3559_v35 = vsel %vm8590_vm6, %v8545_v21, %v3554_v40  ;;  %v3595_v57 = vadd.f32 %v8520_v32, %v3594_v51  ;;  %vm3597_vm3 = vweird.f32 %v8520_v32  ;;  %v9341_v19 = vld [vmem:[#allocation28_spill] sm:$0xff]  ;;  %v9347_v51 = vld [vmem:[#allocation31_spill] sm:$0xff] }
 0x731   : > { %3682 = vst.msk [vmem:[%s8479_s25 + $0x70] sm:$0xff] %vm9316_vm4, %v3650_v17  ;;  %v3655_v50 = vmul.f32 %v8426_v34, %v9317_v14  ;;  %vm9318_vm14 = vmmov %vm9316_vm4  ;;  %v3610_v21 = vadd.f32 %v8527_v15, %v3609_v6  ;;  %vm3612_vm6 = vweird.f32 %v8527_v15  ;;  %v3617_v61 = vand.u32 2147483648, %v9261_v38 }
 0x732   : > { %3683 = vst.msk [vmem:[%s8479_s25 + $0x78] sm:$0xff] %vm9318_vm14, %v3651_v55  ;;  %vm8705_vm9 = vmor %vm3566_vm5, %vm3567_vm2  ;;  %v3656_v34 = vmul.f32 %v8440_v11, %v9321_v43  ;;  %v3625_v42 = vadd.f32 %v8538_v49, %v3624_v41  ;;  %vm3627_vm2 = vweird.f32 %v8538_v49  ;;  %v9325_v11 = vld [vmem:[#allocation23_spill] sm:$0xff]  ;;  %v3615_v53 = vand.u32 2147483647, %v9261_v38 }
 0x733   : > { %vm9322_vm8 = vmmov %vm9316_vm4  ;;  %v3569_v54 = vsel %vm8705_vm9, %v8490_v22, %v3565_v62  ;;  %v3657_v2 = vmul.f32 %v8483_v1, %v9325_v11  ;;  %v3632_v36 = vand.u32 2147483648, %v9262_v39  ;;  %v9329_v1 = vld [vmem:[#allocation24_spill] sm:$0xff]  ;;  %v3630_v10 = vand.u32 2147483647, %v9262_v39 }
 0x734   : > { %3684 = vst.msk [vmem:[%s8479_s25 + $0x80] sm:$0xff] %vm9322_vm8, %v3652_v37  ;;  %vm8723_vm5 = vmor %vm3581_vm13, %vm3582_vm10  ;;  %v3658_v45 = vmul.f32 %v8487_v13, %v9329_v1  ;;  %v9333_v13 = vld [vmem:[#allocation25_spill] sm:$0xff]  ;;  %v3603_v38 = vor.u32 1.1754944e-38, %v3602_v27  ;;  %v3618_v20 = vor.u32 1.1754944e-38, %v3617_v61  ;;  %v3661_v16 = vmul.f32 %v3544_v59, %v9339_v23 }
 0x735   : > { %vm9326_vm15 = vmmov %vm9316_vm4  ;;  %v3584_v22 = vsel %vm8723_vm5, %v8508_v31, %v3580_v12  ;;  %v3659_v9 = vmul.f32 %v8542_v26, %v9333_v13  ;;  %vm3616_vm9 = vcmp.eq.f32.partialorder %v3615_v53, 8.507059e+37  ;;  %v3633_v44 = vor.u32 1.1754944e-38, %v3632_v36  ;;  %v9351_v59 = vld [vmem:[#allocation33_spill] sm:$0xff] }
 0x736   : > { %3685 = vst.msk [vmem:[%s8479_s25 + $0x88] sm:$0xff] %vm9326_vm15, %v3653_v25  ;;  %vm8740_vm13 = vmor %vm3596_vm0, %vm3597_vm3  ;;  %v3662_v28 = vmul.f32 %v3559_v35, %v9341_v19 }
 0x737   : > { %vm9330_vm10 = vmmov %vm9316_vm4  ;;  %v3599_v31 = vsel %vm8740_vm13, %v8520_v32, %v3595_v57  ;;  %vm3626_vm4 = vweird.f32 %v9262_v39  ;;  %v3574_v32 = vsel %vm8649_vm1, %v8606_v0, %v3569_v54  ;;  %v9337_v39 = vld [vmem:[#allocation26_spill] sm:$0xff]  ;;  %v3589_v0 = vsel %vm8666_vm11, %v3588_v60, %v3584_v22  ;;  %v9343_v60 = vld [vmem:[#allocation29_spill] sm:$0xff] }
 0x738   : > { %3686 = vst.msk [vmem:[%s8479_s25 + $0x90] sm:$0xff] %vm9330_vm10, %v3654_v24  ;;  %vm8757_vm0 = vmor %vm3611_vm12, %vm3612_vm6  ;;  %v3660_v26 = vmul.f32 %v8603_v48, %v9337_v39  ;;  %v3604_v48 = vsel %vm8676_vm7, %v3603_v38, %v3599_v31  ;;  %vm3631_vm6 = vcmp.eq.f32.partialorder %v3630_v10, 8.507059e+37  ;;  %v3663_v58 = vmul.f32 %v3574_v32, %v9343_v60 }
 0x739   : > { %vm9334_vm3 = vmmov %vm9322_vm8  ;;  %v3614_v47 = vsel %vm8757_vm0, %v8527_v15, %v3610_v21  ;;  %v3664_v46 = vmul.f32 %v3589_v0, %v9345_v5  ;;  %v3665_v27 = vmul.f32 %v3604_v48, %v9347_v51 }
 0x73a   : > { %3687 = vst.msk [vmem:[%s8479_s25 + $0x98] sm:$0xff] %vm9334_vm3, %v3655_v50  ;;  %vm8775_vm12 = vmor %vm3626_vm4, %vm3627_vm2 }
 0x73b   : > { %vm9338_vm14 = vmmov %vm9334_vm3  ;;  %v3629_v15 = vsel %vm8775_vm12, %v8538_v49, %v3625_v42  ;;  %v3619_v49 = vsel %vm3616_vm9, %v3618_v20, %v3614_v47 }
 0x73c   : > { %3688 = vst.msk [vmem:[%s8479_s25 + $0xa0] sm:$0xff] %vm9338_vm14, %v3656_v34  ;;  %vm9340_vm1 = vmmov %vm9334_vm3  ;;  %v3634_v17 = vsel %vm3631_vm6, %v3633_v44, %v3629_v15  ;;  %v3666_v55 = vmul.f32 %v3619_v49, %v9349_v29 }
 0x73d   : > { %3689 = vst.msk [vmem:[%s8479_s25 + $0xa8] sm:$0xff] %vm9340_vm1, %v3657_v2  ;;  %vm9342_vm11 = vmmov %vm9340_vm1  ;;  %v3667_v40 = vmul.f32 %v3634_v17, %v9351_v59 }
 0x73e   : > { %3690 = vst.msk [vmem:[%s8479_s25 + $0xb0] sm:$0xff] %vm9342_vm11, %v3658_v45  ;;  %vm9344_vm8 = vmmov %vm9340_vm1 }
 0x73f   : > { %3691 = vst.msk [vmem:[%s8479_s25 + $0xb8] sm:$0xff] %vm9344_vm8, %v3659_v9  ;;  %vm9346_vm7 = vmmov %vm9340_vm1 }
 0x740   : > { %3692 = vst.msk [vmem:[%s8479_s25 + $0xc0] sm:$0xff] %vm9346_vm7, %v3660_v26  ;;  %vm9348_vm5 = vmmov %vm9340_vm1 }
 0x741   : > { %3693 = vst.msk [vmem:[%s8479_s25 + $0xc8] sm:$0xff] %vm9348_vm5, %v3661_v16  ;;  %vm9350_vm2 = vmmov %vm9340_vm1 }
 0x742   : > { %3694 = vst.msk [vmem:[%s8479_s25 + $0xd0] sm:$0xff] %vm9350_vm2, %v3662_v28  ;;  %vm9352_vm15 = vmmov %vm9340_vm1 }
 0x743   : > { %3695 = vst.msk [vmem:[%s8479_s25 + $0xd8] sm:$0xff] %vm9352_vm15, %v3663_v58  ;;  %vm9353_vm13 = vmmov %vm9340_vm1 }
 0x744   : > { %3696 = vst.msk [vmem:[%s8479_s25 + $0xe0] sm:$0xff] %vm9353_vm13, %v3664_v46  ;;  %vm9354_vm10 = vmmov %vm9340_vm1 }
 0x745   : > { %3697 = vst.msk [vmem:[%s8479_s25 + $0xe8] sm:$0xff] %vm9354_vm10, %v3665_v27  ;;  %vm9355_vm0 = vmmov %vm9340_vm1 }
 0x746   : > { %3698 = vst.msk [vmem:[%s8479_s25 + $0xf0] sm:$0xff] %vm9355_vm0, %v3666_v55  ;;  %vm9356_vm4 = vmmov %vm9355_vm0 }
 0x747   : > { %3699 = vst.msk [vmem:[%s8479_s25 + $0xf8] sm:$0xff] %vm9356_vm4, %v3667_v40 }
 0x748 PF: > { %s19_s30 = sadd.s32 1, %s4565_s30  }
 0x749   : > { %p16_p4 = scmp.ge.s32.totalorder %s19_s30, 4  }
 0x74b   :  { %18 = sbr.rel (!%p16_p4) target bundleno = 1 (0x1), region = 86 }

</bundles_post_ra>
